<compile_context>
chip_gen: v5e
topology: v5e:2x2
jax: 0.10.0
libtpu: 0.0.40
codegen_flags: <defaults>
</compile_context>

<pallas_src>
import functools

import numpy as np
import jax
import jax.numpy as jnp
from jax import lax
from jax.experimental import pallas as pl
from jax.experimental.pallas import tpu as pltpu


LANE = 128                      # channel dims padded to multiples of the lane width
VMEM_LIMIT = 32 * 1024 * 1024   # working set here is ~2 MiB, safe on v5e/v6e/v7x


def _round_up(n, m):
    return ((n + m - 1) // m) * m


# ---------------------------------------------------------------------------
# Fused Pallas kernel (one invocation per batch element)
# ---------------------------------------------------------------------------
def _fused_block_kernel(x_ref, w1_ref, b1_ref, w2_ref, b2_ref, m1_ref, m2_ref,
                        fc1w_ref, fc1b_ref, fc2w_ref, fc2b_ref, scw_ref, scb_ref,
                        out_ref, out1_scr, *, S, L1, N2, inv_hw, packed, id_off):
    """Whole ResidualSEBlock for one batch element.

    x_ref  : packed:(L1, 128) im2col canvas  |  fallback:(Lx, Ci) padded canvas (bf16)
    w1_ref : packed:(128, Co)                |  fallback:(9, Ci, Co)        (bf16, BN folded)
    w2_ref : (9, Co, Co) per-tap conv2 weights (bf16, BN folded)
    m1_ref : (L1, 1)  interior mask of the out1 canvas (zero border / slack)
    m2_ref : (N2, 1)  valid-pixel mask of the output canvas (zero junk columns)
    out_ref: (N2, Co) final fp32 output canvas
    out1_scr: (L1, Co) bf16 VMEM scratch -- conv2's zero-padded input canvas
    """
    co = w2_ref.shape[-1]

    # ---- conv1 (+ folded BN1) + ReLU -> out1 padded canvas in VMEM ----------
    if packed:
        # all 9 taps folded into the contraction dim -> one MXU matmul
        acc1 = jnp.dot(x_ref[...], w1_ref[...], preferred_element_type=jnp.float32)
    else:
        acc1 = jnp.zeros((L1, co), jnp.float32)
        for dy in range(3):
            for dx in range(3):
                acc1 += jnp.dot(x_ref[pl.ds(dy * S + dx, L1), :], w1_ref[dy * 3 + dx],
                                preferred_element_type=jnp.float32)
    out1 = jnp.maximum(acc1 + b1_ref[...], 0.0) * m1_ref[...]
    out1_scr[...] = out1.astype(out1_scr.dtype)

    # ---- conv2 (+ folded BN2): 9 shifted-slice matmuls over the out1 canvas --
    acc2 = jnp.zeros((N2, co), jnp.float32)
    for dy in range(3):
        for dx in range(3):
            acc2 += jnp.dot(out1_scr[pl.ds(dy * S + dx, N2), :], w2_ref[dy * 3 + dx],
                            preferred_element_type=jnp.float32)
    out2 = acc2 + b2_ref[...]                                   # pre-SE, fp32

    # ---- SE squeeze (junk columns masked) + excitation ----------------------
    y = jnp.sum(out2 * m2_ref[...], axis=0, keepdims=True) * inv_hw      # (1, Co)
    y8 = jnp.broadcast_to(y, (8, co))                                     # sublane-safe M
    h8 = jnp.maximum(jnp.dot(y8, fc1w_ref[...], preferred_element_type=jnp.float32)
                     + fc1b_ref[...], 0.0)
    z8 = jnp.dot(h8, fc2w_ref[...], preferred_element_type=jnp.float32) + fc2b_ref[...]
    s = 1.0 / (1.0 + jnp.exp(-z8[0:1, :]))                                # sigmoid (1, Co)

    # ---- 1x1-conv(+BN) shortcut + SE scale + residual add + ReLU ------------
    ident = jnp.dot(x_ref[pl.ds(id_off, N2), :], scw_ref[...],
                    preferred_element_type=jnp.float32) + scb_ref[...]
    out_ref[...] = jnp.maximum(out2 * s + ident, 0.0)


def _fused_call(x_in, w1, b1, w2, b2, m1, m2, fc1w, fc1b, fc2w, fc2b, scw, scb,
                *, S, L1, N2, inv_hw, packed, id_off, vmem_limit):
    B = x_in.shape[0]
    co = w2.shape[-1]
    kernel = functools.partial(_fused_block_kernel, S=S, L1=L1, N2=N2,
                               inv_hw=inv_hw, packed=packed, id_off=id_off)

    def fixed(a):                               # whole-array block, fetched once
        return pl.BlockSpec(a.shape, lambda b, _n=a.ndim: (0,) * _n)

    in_specs = [
        pl.BlockSpec((None,) + x_in.shape[1:], lambda b: (b, 0, 0)),
        fixed(w1), fixed(b1), fixed(w2), fixed(b2), fixed(m1), fixed(m2),
        fixed(fc1w), fixed(fc1b), fixed(fc2w), fixed(fc2b), fixed(scw), fixed(scb),
    ]

    flops = 2 * B * (L1 * w1.shape[-2] * co * (1 if packed else 9)
                     + N2 * 9 * co * co + N2 * scw.shape[0] * co + 16 * co * co)
    bytes_accessed = sum(int(a.size) * a.dtype.itemsize
                         for a in (x_in, w1, b1, w2, b2, m1, m2,
                                   fc1w, fc1b, fc2w, fc2b, scw, scb))
    bytes_accessed += B * N2 * co * 4

    return pl.pallas_call(
        kernel,
        out_shape=jax.ShapeDtypeStruct((B, N2, co), jnp.float32),
        grid=(B,),
        in_specs=in_specs,
        out_specs=pl.BlockSpec((None, N2, co), lambda b: (b, 0, 0)),
        scratch_shapes=[pltpu.VMEM((L1, co), jnp.bfloat16)],
        compiler_params=pltpu.CompilerParams(
            dimension_semantics=("parallel",), vmem_limit_bytes=vmem_limit),
        cost_estimate=pl.CostEstimate(flops=int(flops),
                                      transcendentals=int(B * 16 * co),
                                      bytes_accessed=int(bytes_accessed)),
    )(x_in, w1, b1, w2, b2, m1, m2, fc1w, fc1b, fc2w, fc2b, scw, scb)


# ---------------------------------------------------------------------------
# Plain-JAX glue (layout prep, BN folding)
# ---------------------------------------------------------------------------
def fold_bn(w, b, gamma, beta, mean, var, eps=1e-5):
    """Fold inference-mode BatchNorm2d into conv weight/bias (per out-channel)."""
    scale = gamma / jnp.sqrt(var + eps)
    w_f = w * scale[:, None, None, None]          # (Cout, Cin, kh, kw)
    b_f = (b - mean) * scale + beta
    return w_f, b_f


def residual_se_block_pallas(x_nchw, p, *, vmem_limit=VMEM_LIMIT):
    # TODO(synk): stride-2 / downsample path and the identity-shortcut variant
    # (in_channels == out_channels, stride 1) of the PyTorch module are not implemented.
    # TODO(synk): images whose padded canvas does not fit VMEM need a spatially tiled
    # (halo-exchange) variant; this fused version keeps the whole per-batch canvas resident.
    x = jnp.transpose(x_nchw, (0, 2, 3, 1))                   # NHWC (cast once to bf16 below)
    B, H, W, Cin = x.shape
    Cout = p['conv1_w'].shape[0]
    hidden = p['fc1_w'].shape[0]

    S = W + 2                                                  # padded row stride
    N2 = H * S                                                 # output canvas rows (2 junk cols/row)
    L1 = _round_up(N2 + 2 * S + 2, 8)                          # out1 canvas rows (conv2 tap overreach)
    Lx = _round_up(L1 + 2 * S + 2, 8)                          # input canvas rows (conv1 tap overreach)
    Ci, Co, Hd = _round_up(Cin, LANE), _round_up(Cout, LANE), _round_up(hidden, LANE)
    packed = 9 * Cin <= LANE                                   # fold taps into the contraction dim?

    # Fold inference-mode BN into conv weights / biases.
    w1f, b1f = fold_bn(p['conv1_w'], p['conv1_b'], p['bn1_g'], p['bn1_b'], p['bn1_m'], p['bn1_v'])
    w2f, b2f = fold_bn(p['conv2_w'], p['conv2_b'], p['bn2_g'], p['bn2_b'], p['bn2_m'], p['bn2_v'])
    wsf, bsf = fold_bn(p['sc_w'], p['sc_b'], p['bnsc_g'], p['bnsc_b'], p['bnsc_m'], p['bnsc_v'])

    def pack_bias(bf):
        return jnp.zeros((1, Co), jnp.float32).at[0, :Cout].set(bf)

    b1_r, b2_r, sc_b = pack_bias(b1f), pack_bias(b2f), pack_bias(bsf)

    # conv2 weights: per-tap (9, Co, Co) bf16 matrices
    w2_t = jnp.transpose(w2f, (2, 3, 1, 0)).reshape(9, Cout, Cout)
    w2_p = jnp.zeros((9, Co, Co), jnp.float32).at[:, :Cout, :Cout].set(w2_t).astype(jnp.bfloat16)

    # SE excitation weights (nn.Linear: y @ W.T + b)
    fc1w = jnp.zeros((Co, Hd), jnp.float32).at[:Cout, :hidden].set(p['fc1_w'].T)
    fc1b = jnp.zeros((1, Hd), jnp.float32).at[0, :hidden].set(p['fc1_b'])
    fc2w = jnp.zeros((Hd, Co), jnp.float32).at[:hidden, :Cout].set(p['fc2_w'].T)
    fc2b = jnp.zeros((1, Co), jnp.float32).at[0, :Cout].set(p['fc2_b'])

    # Zero-padded image, flattened with row stride S (single canvas, no dx preshift).
    xflat = jnp.pad(x.astype(jnp.bfloat16),
                    ((0, 0), (1, 1), (1, 1), (0, 0))).reshape(B, (H + 2) * S, Cin)
    w1_t = jnp.transpose(w1f, (2, 3, 1, 0)).reshape(9, Cin, Cout)

    if packed:
        # conv1 taps folded into K: one matmul for conv1; the 1x1 shortcut rides on the
        # centre-tap lane group of the same canvas.  Same HBM footprint as the 128-lane
        # channel-padded image.
        K1 = LANE
        back = L1 + S + 1 - (H + 2) * S
        xbig = jnp.pad(xflat, ((0, 0), (S + 1, back), (0, 0)))
        offs = [dy * S + dx for dy in range(3) for dx in range(3)]
        taps = [xbig[:, t:t + L1, :] for t in offs]
        x_in = jnp.zeros((B, L1, K1), jnp.bfloat16).at[:, :, :9 * Cin].set(
            jnp.concatenate(taps, axis=-1))
        w1_p = jnp.zeros((K1, Co), jnp.float32).at[:9 * Cin, :Cout].set(
            w1_t.reshape(9 * Cin, Cout)).astype(jnp.bfloat16)
        sc_w = jnp.zeros((K1, Co), jnp.float32).at[4 * Cin:5 * Cin, :Cout].set(
            wsf[:, :, 0, 0].T).astype(jnp.bfloat16)
        id_off = S + 1                      # centre tap of row q+S+1 == input pixel q
    else:
        # single channel-padded canvas; 9 per-tap matmuls in-kernel
        x_in = jnp.zeros((B, Lx, Ci), jnp.bfloat16).at[
            :, S + 1:S + 1 + (H + 2) * S, :Cin].set(xflat)
        w1_p = jnp.zeros((9, Ci, Co), jnp.float32).at[:, :Cin, :Cout].set(
            w1_t).astype(jnp.bfloat16)
        sc_w = jnp.zeros((Ci, Co), jnp.float32).at[:Cin, :Cout].set(
            wsf[:, :, 0, 0].T).astype(jnp.bfloat16)
        id_off = 2 * S + 2                  # input pixel (y,x) lives at canvas row q+2S+2

    # Validity masks (static, tiny): out1 canvas border / output junk columns.
    k = np.arange(L1)
    m1 = jnp.asarray((((k // S) >= 1) & ((k // S) <= H) & ((k % S) >= 1) & ((k % S) <= W))
                     .astype(np.float32).reshape(L1, 1))
    q = np.arange(N2)
    m2 = jnp.asarray(((q % S) < W).astype(np.float32).reshape(N2, 1))

    out_canvas = _fused_call(x_in, w1_p, b1_r, w2_p, b2_r, m1, m2,
                             fc1w, fc1b, fc2w, fc2b, sc_w, sc_b,
                             S=S, L1=L1, N2=N2, inv_hw=1.0 / float(H * W),
                             packed=packed, id_off=id_off, vmem_limit=vmem_limit)
    out = out_canvas.reshape(B, H, S, Co)[:, :, :W, :Cout]     # drop junk cols + channel pad
    return jnp.transpose(out, (0, 3, 1, 2))                    # back to NCHW


# ---------------------------------------------------------------------------
# Deterministic parameter init + pure-JAX reference
# ---------------------------------------------------------------------------
def init_params(key, cin, cout, reduction):
    hidden = cout // reduction
    ks = jax.random.split(key, 22)
    n = lambda k, s, sc=0.1: sc * jax.random.normal(k, s, dtype=jnp.float32)
    p = dict(
        conv1_w=n(ks[0], (cout, cin, 3, 3)), conv1_b=n(ks[1], (cout,)),
        bn1_g=1.0 + n(ks[2], (cout,)), bn1_b=n(ks[3], (cout,)),
        bn1_m=n(ks[4], (cout,)), bn1_v=jax.random.uniform(ks[5], (cout,), minval=0.5, maxval=1.5),
        conv2_w=n(ks[6], (cout, cout, 3, 3)), conv2_b=n(ks[7], (cout,)),
        bn2_g=1.0 + n(ks[8], (cout,)), bn2_b=n(ks[9], (cout,)),
        bn2_m=n(ks[10], (cout,)), bn2_v=jax.random.uniform(ks[11], (cout,), minval=0.5, maxval=1.5),
        fc1_w=n(ks[12], (hidden, cout), 0.3), fc1_b=n(ks[13], (hidden,)),
        fc2_w=n(ks[14], (cout, hidden), 0.3), fc2_b=n(ks[15], (cout,)),
        sc_w=n(ks[16], (cout, cin, 1, 1)), sc_b=n(ks[17], (cout,)),
        bnsc_g=1.0 + n(ks[18], (cout,)), bnsc_b=n(ks[19], (cout,)),
        bnsc_m=n(ks[20], (cout,)), bnsc_v=jax.random.uniform(ks[21], (cout,), minval=0.5, maxval=1.5),
    )
    return {k: v.astype(jnp.float32) for k, v in p.items()}


def reference_forward(x, p, eps=1e-5):
    def bn(y, g, be, m, v):
        return ((y - m[None, :, None, None]) / jnp.sqrt(v + eps)[None, :, None, None]
                * g[None, :, None, None] + be[None, :, None, None])

    def conv(z, w, b, pad):
        y = lax.conv_general_dilated(z, w, (1, 1), ((pad, pad), (pad, pad)),
                                     dimension_numbers=('NCHW', 'OIHW', 'NCHW'))
        return y + b[None, :, None, None]

    identity = bn(conv(x, p['sc_w'], p['sc_b'], 0),
                  p['bnsc_g'], p['bnsc_b'], p['bnsc_m'], p['bnsc_v'])
    out = jax.nn.relu(bn(conv(x, p['conv1_w'], p['conv1_b'], 1),
                         p['bn1_g'], p['bn1_b'], p['bn1_m'], p['bn1_v']))
    out = bn(conv(out, p['conv2_w'], p['conv2_b'], 1),
             p['bn2_g'], p['bn2_b'], p['bn2_m'], p['bn2_v'])
    B, C, H, W = out.shape
    y = out.reshape(B, C, -1).mean(axis=2)
    y = jax.nn.relu(y @ p['fc1_w'].T + p['fc1_b'])
    y = jax.nn.sigmoid(y @ p['fc2_w'].T + p['fc2_b'])
    out = out * y[:, :, None, None]
    return jax.nn.relu(out + identity)


if __name__ == "__main__":
    def run_case(key, B, Cin, H, W, Cout, reduction):
        kx, kp = jax.random.split(key)
        x = jax.random.normal(kx, (B, Cin, H, W), dtype=jnp.float32)
        params = init_params(kp, Cin, Cout, reduction)
        out = jax.block_until_ready(jax.jit(residual_se_block_pallas)(x, params))
        ref = reference_forward(x, params)
        # bf16 MXU operands with fp32 accumulation -> compare with a looser tolerance.
        np.testing.assert_allclose(np.asarray(out), np.asarray(ref), rtol=2e-2, atol=2e-2)

    key = jax.random.PRNGKey(0)
    k1, k2 = jax.random.split(key)
    run_case(k1, B=2, Cin=4, H=16, W=16, Cout=8, reduction=4)    # packed-tap conv1 path
    run_case(k2, B=1, Cin=16, H=8, W=8, Cout=32, reduction=8)    # per-tap fallback path
    print("KERNEL_OK")
</pallas_src>

<mosaic_0001>
module attributes {stable_mosaic.version = 11 : i64} {
  func.func @_fused_block_kernel(%arg0: i32, %arg1: memref<1x328x128xbf16, #tpu.memory_space<vmem>>, %arg2: memref<128x128xbf16, #tpu.memory_space<vmem>>, %arg3: memref<1x128xf32, #tpu.memory_space<vmem>>, %arg4: memref<9x128x128xbf16, #tpu.memory_space<vmem>>, %arg5: memref<1x128xf32, #tpu.memory_space<vmem>>, %arg6: memref<328x1xf32, #tpu.memory_space<vmem>>, %arg7: memref<288x1xf32, #tpu.memory_space<vmem>>, %arg8: memref<128x128xf32, #tpu.memory_space<vmem>>, %arg9: memref<1x128xf32, #tpu.memory_space<vmem>>, %arg10: memref<128x128xf32, #tpu.memory_space<vmem>>, %arg11: memref<1x128xf32, #tpu.memory_space<vmem>>, %arg12: memref<128x128xbf16, #tpu.memory_space<vmem>>, %arg13: memref<1x128xf32, #tpu.memory_space<vmem>>, %arg14: memref<1x288x128xf32, #tpu.memory_space<vmem>>, %arg15: memref<328x128xbf16, #tpu.memory_space<vmem>>) attributes {dimension_semantics = [#tpu.dimension_semantics<parallel>], iteration_bounds = array<i64: 2>, scalar_prefetch = 0 : i64, scratch_operands = 1 : i64, tpu.core_type = #tpu.core_type<tc>, window_params = [{transform_indices = @transform_0, window_bounds = array<i64: 1, 328, 128>}, {pipeline_mode = #tpu.pipeline_mode<synchronous>, transform_indices = @transform_1, window_bounds = array<i64: 128, 128>}, {pipeline_mode = #tpu.pipeline_mode<synchronous>, transform_indices = @transform_2, window_bounds = array<i64: 1, 128>}, {pipeline_mode = #tpu.pipeline_mode<synchronous>, transform_indices = @transform_3, window_bounds = array<i64: 9, 128, 128>}, {pipeline_mode = #tpu.pipeline_mode<synchronous>, transform_indices = @transform_4, window_bounds = array<i64: 1, 128>}, {pipeline_mode = #tpu.pipeline_mode<synchronous>, transform_indices = @transform_5, window_bounds = array<i64: 328, 1>}, {pipeline_mode = #tpu.pipeline_mode<synchronous>, transform_indices = @transform_6, window_bounds = array<i64: 288, 1>}, {pipeline_mode = #tpu.pipeline_mode<synchronous>, transform_indices = @transform_7, window_bounds = array<i64: 128, 128>}, {pipeline_mode = #tpu.pipeline_mode<synchronous>, transform_indices = @transform_8, window_bounds = array<i64: 1, 128>}, {pipeline_mode = #tpu.pipeline_mode<synchronous>, transform_indices = @transform_9, window_bounds = array<i64: 128, 128>}, {pipeline_mode = #tpu.pipeline_mode<synchronous>, transform_indices = @transform_10, window_bounds = array<i64: 1, 128>}, {pipeline_mode = #tpu.pipeline_mode<synchronous>, transform_indices = @transform_11, window_bounds = array<i64: 128, 128>}, {pipeline_mode = #tpu.pipeline_mode<synchronous>, transform_indices = @transform_12, window_bounds = array<i64: 1, 128>}, {transform_indices = @transform_13, window_bounds = array<i64: 1, 288, 128>}]} {
    %c0 = arith.constant 0 : index
    %c0_0 = arith.constant 0 : index
    %c0_1 = arith.constant 0 : index
    %0 = vector.load %arg1[%c0, %c0_0, %c0_1] : memref<1x328x128xbf16, #tpu.memory_space<vmem>>, vector<1x328x128xbf16>
    %1 = vector.shape_cast %0 : vector<1x328x128xbf16> to vector<328x128xbf16>
    %c0_2 = arith.constant 0 : index
    %c0_3 = arith.constant 0 : index
    %2 = vector.load %arg2[%c0_2, %c0_3] : memref<128x128xbf16, #tpu.memory_space<vmem>>, vector<128x128xbf16>
    %cst = arith.constant dense<0.000000e+00> : vector<328x128xf32>
    %3 = tpu.matmul %1, %2, %cst {dimension_numbers = #tpu.dot_dimension_numbers<[1], [0], [0], [1], [0, 0, 1, 1], [], []>} : vector<328x128xbf16>, vector<128x128xbf16>, vector<328x128xf32> -> vector<328x128xf32>
    %c0_4 = arith.constant 0 : index
    %c0_5 = arith.constant 0 : index
    %4 = vector.load %arg3[%c0_4, %c0_5] : memref<1x128xf32, #tpu.memory_space<vmem>>, vector<1x128xf32>
    %5 = vector.broadcast %4 : vector<1x128xf32> to vector<328x128xf32>
    %6 = arith.addf %3, %5 : vector<328x128xf32>
    %cst_6 = arith.constant 0.000000e+00 : f32
    %7 = vector.broadcast %cst_6 : f32 to vector<328x128xf32>
    %8 = arith.maximumf %6, %7 : vector<328x128xf32>
    %c0_7 = arith.constant 0 : index
    %c0_8 = arith.constant 0 : index
    %9 = vector.load %arg6[%c0_7, %c0_8] : memref<328x1xf32, #tpu.memory_space<vmem>>, vector<328x1xf32>
    %10 = vector.broadcast %9 : vector<328x1xf32> to vector<328x128xf32>
    %11 = arith.mulf %8, %10 : vector<328x128xf32>
    %12 = arith.truncf %11 : vector<328x128xf32> to vector<328x128xbf16>
    %c0_9 = arith.constant 0 : index
    %c0_10 = arith.constant 0 : index
    %13 = vector.load %arg15[%c0_9, %c0_10] : memref<328x128xbf16, #tpu.memory_space<vmem>>, vector<328x128xbf16>
    tpu.vector_store %arg15[%c0_9, %c0_10], %12 {strides = array<i32>} : memref<328x128xbf16, #tpu.memory_space<vmem>>, vector<328x128xbf16>,
    %cst_11 = arith.constant 0.000000e+00 : f32
    %14 = vector.broadcast %cst_11 : f32 to vector<288x128xf32>
    %c0_12 = arith.constant 0 : index
    %c0_13 = arith.constant 0 : index
    %15 = vector.load %arg15[%c0_12, %c0_13] : memref<328x128xbf16, #tpu.memory_space<vmem>>, vector<288x128xbf16>
    %c0_14 = arith.constant 0 : index
    %c0_15 = arith.constant 0 : index
    %c0_16 = arith.constant 0 : index
    %16 = vector.load %arg4[%c0_14, %c0_15, %c0_16] : memref<9x128x128xbf16, #tpu.memory_space<vmem>>, vector<1x128x128xbf16>
    %17 = vector.shape_cast %16 : vector<1x128x128xbf16> to vector<128x128xbf16>
    %cst_17 = arith.constant dense<0.000000e+00> : vector<288x128xf32>
    %18 = tpu.matmul %15, %17, %cst_17 {dimension_numbers = #tpu.dot_dimension_numbers<[1], [0], [0], [1], [0, 0, 1, 1], [], []>} : vector<288x128xbf16>, vector<128x128xbf16>, vector<288x128xf32> -> vector<288x128xf32>
    %19 = arith.addf %14, %18 : vector<288x128xf32>
    %c1 = arith.constant 1 : index
    %c0_18 = arith.constant 0 : index
    %20 = vector.load %arg15[%c1, %c0_18] : memref<328x128xbf16, #tpu.memory_space<vmem>>, vector<288x128xbf16>
    %c1_19 = arith.constant 1 : index
    %c0_20 = arith.constant 0 : index
    %c0_21 = arith.constant 0 : index
    %21 = vector.load %arg4[%c1_19, %c0_20, %c0_21] : memref<9x128x128xbf16, #tpu.memory_space<vmem>>, vector<1x128x128xbf16>
    %22 = vector.shape_cast %21 : vector<1x128x128xbf16> to vector<128x128xbf16>
    %cst_22 = arith.constant dense<0.000000e+00> : vector<288x128xf32>
    %23 = tpu.matmul %20, %22, %cst_22 {dimension_numbers = #tpu.dot_dimension_numbers<[1], [0], [0], [1], [0, 0, 1, 1], [], []>} : vector<288x128xbf16>, vector<128x128xbf16>, vector<288x128xf32> -> vector<288x128xf32>
    %24 = arith.addf %19, %23 : vector<288x128xf32>
    %c2 = arith.constant 2 : index
    %c0_23 = arith.constant 0 : index
    %25 = vector.load %arg15[%c2, %c0_23] : memref<328x128xbf16, #tpu.memory_space<vmem>>, vector<288x128xbf16>
    %c2_24 = arith.constant 2 : index
    %c0_25 = arith.constant 0 : index
    %c0_26 = arith.constant 0 : index
    %26 = vector.load %arg4[%c2_24, %c0_25, %c0_26] : memref<9x128x128xbf16, #tpu.memory_space<vmem>>, vector<1x128x128xbf16>
    %27 = vector.shape_cast %26 : vector<1x128x128xbf16> to vector<128x128xbf16>
    %cst_27 = arith.constant dense<0.000000e+00> : vector<288x128xf32>
    %28 = tpu.matmul %25, %27, %cst_27 {dimension_numbers = #tpu.dot_dimension_numbers<[1], [0], [0], [1], [0, 0, 1, 1], [], []>} : vector<288x128xbf16>, vector<128x128xbf16>, vector<288x128xf32> -> vector<288x128xf32>
    %29 = arith.addf %24, %28 : vector<288x128xf32>
    %c18 = arith.constant 18 : index
    %c0_28 = arith.constant 0 : index
    %30 = vector.load %arg15[%c18, %c0_28] : memref<328x128xbf16, #tpu.memory_space<vmem>>, vector<288x128xbf16>
    %c3 = arith.constant 3 : index
    %c0_29 = arith.constant 0 : index
    %c0_30 = arith.constant 0 : index
    %31 = vector.load %arg4[%c3, %c0_29, %c0_30] : memref<9x128x128xbf16, #tpu.memory_space<vmem>>, vector<1x128x128xbf16>
    %32 = vector.shape_cast %31 : vector<1x128x128xbf16> to vector<128x128xbf16>
    %cst_31 = arith.constant dense<0.000000e+00> : vector<288x128xf32>
    %33 = tpu.matmul %30, %32, %cst_31 {dimension_numbers = #tpu.dot_dimension_numbers<[1], [0], [0], [1], [0, 0, 1, 1], [], []>} : vector<288x128xbf16>, vector<128x128xbf16>, vector<288x128xf32> -> vector<288x128xf32>
    %34 = arith.addf %29, %33 : vector<288x128xf32>
    %c19 = arith.constant 19 : index
    %c0_32 = arith.constant 0 : index
    %35 = vector.load %arg15[%c19, %c0_32] : memref<328x128xbf16, #tpu.memory_space<vmem>>, vector<288x128xbf16>
    %c4 = arith.constant 4 : index
    %c0_33 = arith.constant 0 : index
    %c0_34 = arith.constant 0 : index
    %36 = vector.load %arg4[%c4, %c0_33, %c0_34] : memref<9x128x128xbf16, #tpu.memory_space<vmem>>, vector<1x128x128xbf16>
    %37 = vector.shape_cast %36 : vector<1x128x128xbf16> to vector<128x128xbf16>
    %cst_35 = arith.constant dense<0.000000e+00> : vector<288x128xf32>
    %38 = tpu.matmul %35, %37, %cst_35 {dimension_numbers = #tpu.dot_dimension_numbers<[1], [0], [0], [1], [0, 0, 1, 1], [], []>} : vector<288x128xbf16>, vector<128x128xbf16>, vector<288x128xf32> -> vector<288x128xf32>
    %39 = arith.addf %34, %38 : vector<288x128xf32>
    %c20 = arith.constant 20 : index
    %c0_36 = arith.constant 0 : index
    %40 = vector.load %arg15[%c20, %c0_36] : memref<328x128xbf16, #tpu.memory_space<vmem>>, vector<288x128xbf16>
    %c5 = arith.constant 5 : index
    %c0_37 = arith.constant 0 : index
    %c0_38 = arith.constant 0 : index
    %41 = vector.load %arg4[%c5, %c0_37, %c0_38] : memref<9x128x128xbf16, #tpu.memory_space<vmem>>, vector<1x128x128xbf16>
    %42 = vector.shape_cast %41 : vector<1x128x128xbf16> to vector<128x128xbf16>
    %cst_39 = arith.constant dense<0.000000e+00> : vector<288x128xf32>
    %43 = tpu.matmul %40, %42, %cst_39 {dimension_numbers = #tpu.dot_dimension_numbers<[1], [0], [0], [1], [0, 0, 1, 1], [], []>} : vector<288x128xbf16>, vector<128x128xbf16>, vector<288x128xf32> -> vector<288x128xf32>
    %44 = arith.addf %39, %43 : vector<288x128xf32>
    %c36 = arith.constant 36 : index
    %c0_40 = arith.constant 0 : index
    %45 = vector.load %arg15[%c36, %c0_40] : memref<328x128xbf16, #tpu.memory_space<vmem>>, vector<288x128xbf16>
    %c6 = arith.constant 6 : index
    %c0_41 = arith.constant 0 : index
    %c0_42 = arith.constant 0 : index
    %46 = vector.load %arg4[%c6, %c0_41, %c0_42] : memref<9x128x128xbf16, #tpu.memory_space<vmem>>, vector<1x128x128xbf16>
    %47 = vector.shape_cast %46 : vector<1x128x128xbf16> to vector<128x128xbf16>
    %cst_43 = arith.constant dense<0.000000e+00> : vector<288x128xf32>
    %48 = tpu.matmul %45, %47, %cst_43 {dimension_numbers = #tpu.dot_dimension_numbers<[1], [0], [0], [1], [0, 0, 1, 1], [], []>} : vector<288x128xbf16>, vector<128x128xbf16>, vector<288x128xf32> -> vector<288x128xf32>
    %49 = arith.addf %44, %48 : vector<288x128xf32>
    %c37 = arith.constant 37 : index
    %c0_44 = arith.constant 0 : index
    %50 = vector.load %arg15[%c37, %c0_44] : memref<328x128xbf16, #tpu.memory_space<vmem>>, vector<288x128xbf16>
    %c7 = arith.constant 7 : index
    %c0_45 = arith.constant 0 : index
    %c0_46 = arith.constant 0 : index
    %51 = vector.load %arg4[%c7, %c0_45, %c0_46] : memref<9x128x128xbf16, #tpu.memory_space<vmem>>, vector<1x128x128xbf16>
    %52 = vector.shape_cast %51 : vector<1x128x128xbf16> to vector<128x128xbf16>
    %cst_47 = arith.constant dense<0.000000e+00> : vector<288x128xf32>
    %53 = tpu.matmul %50, %52, %cst_47 {dimension_numbers = #tpu.dot_dimension_numbers<[1], [0], [0], [1], [0, 0, 1, 1], [], []>} : vector<288x128xbf16>, vector<128x128xbf16>, vector<288x128xf32> -> vector<288x128xf32>
    %54 = arith.addf %49, %53 : vector<288x128xf32>
    %c38 = arith.constant 38 : index
    %c0_48 = arith.constant 0 : index
    %55 = vector.load %arg15[%c38, %c0_48] : memref<328x128xbf16, #tpu.memory_space<vmem>>, vector<288x128xbf16>
    %c8 = arith.constant 8 : index
    %c0_49 = arith.constant 0 : index
    %c0_50 = arith.constant 0 : index
    %56 = vector.load %arg4[%c8, %c0_49, %c0_50] : memref<9x128x128xbf16, #tpu.memory_space<vmem>>, vector<1x128x128xbf16>
    %57 = vector.shape_cast %56 : vector<1x128x128xbf16> to vector<128x128xbf16>
    %cst_51 = arith.constant dense<0.000000e+00> : vector<288x128xf32>
    %58 = tpu.matmul %55, %57, %cst_51 {dimension_numbers = #tpu.dot_dimension_numbers<[1], [0], [0], [1], [0, 0, 1, 1], [], []>} : vector<288x128xbf16>, vector<128x128xbf16>, vector<288x128xf32> -> vector<288x128xf32>
    %59 = arith.addf %54, %58 : vector<288x128xf32>
    %c0_52 = arith.constant 0 : index
    %c0_53 = arith.constant 0 : index
    %60 = vector.load %arg5[%c0_52, %c0_53] : memref<1x128xf32, #tpu.memory_space<vmem>>, vector<1x128xf32>
    %61 = vector.broadcast %60 : vector<1x128xf32> to vector<288x128xf32>
    %62 = arith.addf %59, %61 : vector<288x128xf32>
    %c0_54 = arith.constant 0 : index
    %c0_55 = arith.constant 0 : index
    %63 = vector.load %arg7[%c0_54, %c0_55] : memref<288x1xf32, #tpu.memory_space<vmem>>, vector<288x1xf32>
    %64 = vector.broadcast %63 : vector<288x1xf32> to vector<288x128xf32>
    %65 = arith.mulf %62, %64 : vector<288x128xf32>
    %cst_56 = arith.constant dense<0.000000e+00> : vector<128xf32>
    %66 = vector.multi_reduction <add>, %65, %cst_56 [0] : vector<288x128xf32> to vector<128xf32>
    %67 = vector.shape_cast %66 : vector<128xf32> to vector<1x128xf32>
    %cst_57 = arith.constant 3.906250e-03 : f32
    %68 = vector.broadcast %cst_57 : f32 to vector<1x128xf32>
    %69 = arith.mulf %67, %68 : vector<1x128xf32>
    %70 = vector.shape_cast %69 : vector<1x128xf32> to vector<1x128xf32>
    %71 = vector.broadcast %70 : vector<1x128xf32> to vector<8x128xf32>
    %c0_58 = arith.constant 0 : index
    %c0_59 = arith.constant 0 : index
    %72 = vector.load %arg8[%c0_58, %c0_59] : memref<128x128xf32, #tpu.memory_space<vmem>>, vector<128x128xf32>
    %cst_60 = arith.constant dense<0.000000e+00> : vector<8x128xf32>
    %73 = tpu.matmul %71, %72, %cst_60 {dimension_numbers = #tpu.dot_dimension_numbers<[1], [0], [0], [1], [0, 0, 1, 1], [], []>} : vector<8x128xf32>, vector<128x128xf32>, vector<8x128xf32> -> vector<8x128xf32>
    %c0_61 = arith.constant 0 : index
    %c0_62 = arith.constant 0 : index
    %74 = vector.load %arg9[%c0_61, %c0_62] : memref<1x128xf32, #tpu.memory_space<vmem>>, vector<1x128xf32>
    %75 = vector.broadcast %74 : vector<1x128xf32> to vector<8x128xf32>
    %76 = arith.addf %73, %75 : vector<8x128xf32>
    %cst_63 = arith.constant 0.000000e+00 : f32
    %77 = vector.broadcast %cst_63 : f32 to vector<8x128xf32>
    %78 = arith.maximumf %76, %77 : vector<8x128xf32>
    %c0_64 = arith.constant 0 : index
    %c0_65 = arith.constant 0 : index
    %79 = vector.load %arg10[%c0_64, %c0_65] : memref<128x128xf32, #tpu.memory_space<vmem>>, vector<128x128xf32>
    %cst_66 = arith.constant dense<0.000000e+00> : vector<8x128xf32>
    %80 = tpu.matmul %78, %79, %cst_66 {dimension_numbers = #tpu.dot_dimension_numbers<[1], [0], [0], [1], [0, 0, 1, 1], [], []>} : vector<8x128xf32>, vector<128x128xf32>, vector<8x128xf32> -> vector<8x128xf32>
    %c0_67 = arith.constant 0 : index
    %c0_68 = arith.constant 0 : index
    %81 = vector.load %arg11[%c0_67, %c0_68] : memref<1x128xf32, #tpu.memory_space<vmem>>, vector<1x128xf32>
    %82 = vector.broadcast %81 : vector<1x128xf32> to vector<8x128xf32>
    %83 = arith.addf %80, %82 : vector<8x128xf32>
    %84 = vector.extract_strided_slice %83 {offsets = [0, 0], sizes = [1, 128], strides = [1, 1]} : vector<8x128xf32> to vector<1x128xf32>
    %cst_69 = arith.constant 0.000000e+00 : f32
    %85 = vector.broadcast %cst_69 : f32 to vector<1x128xf32>
    %86 = arith.subf %85, %84 : vector<1x128xf32>
    %87 = math.exp %86 : vector<1x128xf32>
    %cst_70 = arith.constant 1.000000e+00 : f32
    %88 = vector.broadcast %cst_70 : f32 to vector<1x128xf32>
    %89 = arith.addf %88, %87 : vector<1x128xf32>
    %cst_71 = arith.constant 1.000000e+00 : f32
    %90 = vector.broadcast %cst_71 : f32 to vector<1x128xf32>
    %91 = arith.divf %90, %89 : vector<1x128xf32>
    %c0_72 = arith.constant 0 : index
    %c19_73 = arith.constant 19 : index
    %c0_74 = arith.constant 0 : index
    %92 = vector.load %arg1[%c0_72, %c19_73, %c0_74] : memref<1x328x128xbf16, #tpu.memory_space<vmem>>, vector<1x288x128xbf16>
    %93 = vector.shape_cast %92 : vector<1x288x128xbf16> to vector<288x128xbf16>
    %c0_75 = arith.constant 0 : index
    %c0_76 = arith.constant 0 : index
    %94 = vector.load %arg12[%c0_75, %c0_76] : memref<128x128xbf16, #tpu.memory_space<vmem>>, vector<128x128xbf16>
    %cst_77 = arith.constant dense<0.000000e+00> : vector<288x128xf32>
    %95 = tpu.matmul %93, %94, %cst_77 {dimension_numbers = #tpu.dot_dimension_numbers<[1], [0], [0], [1], [0, 0, 1, 1], [], []>} : vector<288x128xbf16>, vector<128x128xbf16>, vector<288x128xf32> -> vector<288x128xf32>
    %c0_78 = arith.constant 0 : index
    %c0_79 = arith.constant 0 : index
    %96 = vector.load %arg13[%c0_78, %c0_79] : memref<1x128xf32, #tpu.memory_space<vmem>>, vector<1x128xf32>
    %97 = vector.broadcast %96 : vector<1x128xf32> to vector<288x128xf32>
    %98 = arith.addf %95, %97 : vector<288x128xf32>
    %99 = vector.broadcast %91 : vector<1x128xf32> to vector<288x128xf32>
    %100 = arith.mulf %62, %99 : vector<288x128xf32>
    %101 = arith.addf %100, %98 : vector<288x128xf32>
    %cst_80 = arith.constant 0.000000e+00 : f32
    %102 = vector.broadcast %cst_80 : f32 to vector<288x128xf32>
    %103 = arith.maximumf %101, %102 : vector<288x128xf32>
    %c0_81 = arith.constant 0 : index
    %c0_82 = arith.constant 0 : index
    %c0_83 = arith.constant 0 : index
    %104 = vector.load %arg14[%c0_81, %c0_82, %c0_83] : memref<1x288x128xf32, #tpu.memory_space<vmem>>, vector<1x288x128xf32>
    %105 = vector.shape_cast %104 : vector<1x288x128xf32> to vector<288x128xf32>
    %106 = vector.shape_cast %103 : vector<288x128xf32> to vector<1x288x128xf32>
    tpu.vector_store %arg14[%c0_81, %c0_82, %c0_83], %106 {strides = array<i32>} : memref<1x288x128xf32, #tpu.memory_space<vmem>>, vector<1x288x128xf32>,
    return
  }
  func.func @transform_0(%arg0: i32) -> (i32, i32, i32) {
    %c0_i32 = arith.constant 0 : i32
    %c0_i32_0 = arith.constant 0 : i32
    %c0_i32_1 = arith.constant 0 : i32
    return %arg0, %c0_i32, %c0_i32_0 : i32, i32, i32
  }
  func.func @transform_1(%arg0: i32) -> (i32, i32) {
    %c0_i32 = arith.constant 0 : i32
    %c0_i32_0 = arith.constant 0 : i32
    %c0_i32_1 = arith.constant 0 : i32
    return %c0_i32, %c0_i32_0 : i32, i32
  }
  func.func @transform_2(%arg0: i32) -> (i32, i32) {
    %c0_i32 = arith.constant 0 : i32
    %c0_i32_0 = arith.constant 0 : i32
    %c0_i32_1 = arith.constant 0 : i32
    return %c0_i32, %c0_i32_0 : i32, i32
  }
  func.func @transform_3(%arg0: i32) -> (i32, i32, i32) {
    %c0_i32 = arith.constant 0 : i32
    %c0_i32_0 = arith.constant 0 : i32
    %c0_i32_1 = arith.constant 0 : i32
    %c0_i32_2 = arith.constant 0 : i32
    return %c0_i32, %c0_i32_0, %c0_i32_1 : i32, i32, i32
  }
  func.func @transform_4(%arg0: i32) -> (i32, i32) {
    %c0_i32 = arith.constant 0 : i32
    %c0_i32_0 = arith.constant 0 : i32
    %c0_i32_1 = arith.constant 0 : i32
    return %c0_i32, %c0_i32_0 : i32, i32
  }
  func.func @transform_5(%arg0: i32) -> (i32, i32) {
    %c0_i32 = arith.constant 0 : i32
    %c0_i32_0 = arith.constant 0 : i32
    %c0_i32_1 = arith.constant 0 : i32
    return %c0_i32, %c0_i32_0 : i32, i32
  }
  func.func @transform_6(%arg0: i32) -> (i32, i32) {
    %c0_i32 = arith.constant 0 : i32
    %c0_i32_0 = arith.constant 0 : i32
    %c0_i32_1 = arith.constant 0 : i32
    return %c0_i32, %c0_i32_0 : i32, i32
  }
  func.func @transform_7(%arg0: i32) -> (i32, i32) {
    %c0_i32 = arith.constant 0 : i32
    %c0_i32_0 = arith.constant 0 : i32
    %c0_i32_1 = arith.constant 0 : i32
    return %c0_i32, %c0_i32_0 : i32, i32
  }
  func.func @transform_8(%arg0: i32) -> (i32, i32) {
    %c0_i32 = arith.constant 0 : i32
    %c0_i32_0 = arith.constant 0 : i32
    %c0_i32_1 = arith.constant 0 : i32
    return %c0_i32, %c0_i32_0 : i32, i32
  }
  func.func @transform_9(%arg0: i32) -> (i32, i32) {
    %c0_i32 = arith.constant 0 : i32
    %c0_i32_0 = arith.constant 0 : i32
    %c0_i32_1 = arith.constant 0 : i32
    return %c0_i32, %c0_i32_0 : i32, i32
  }
  func.func @transform_10(%arg0: i32) -> (i32, i32) {
    %c0_i32 = arith.constant 0 : i32
    %c0_i32_0 = arith.constant 0 : i32
    %c0_i32_1 = arith.constant 0 : i32
    return %c0_i32, %c0_i32_0 : i32, i32
  }
  func.func @transform_11(%arg0: i32) -> (i32, i32) {
    %c0_i32 = arith.constant 0 : i32
    %c0_i32_0 = arith.constant 0 : i32
    %c0_i32_1 = arith.constant 0 : i32
    return %c0_i32, %c0_i32_0 : i32, i32
  }
  func.func @transform_12(%arg0: i32) -> (i32, i32) {
    %c0_i32 = arith.constant 0 : i32
    %c0_i32_0 = arith.constant 0 : i32
    %c0_i32_1 = arith.constant 0 : i32
    return %c0_i32, %c0_i32_0 : i32, i32
  }
  func.func @transform_13(%arg0: i32) -> (i32, i32, i32) {
    %c0_i32 = arith.constant 0 : i32
    %c0_i32_0 = arith.constant 0 : i32
    %c0_i32_1 = arith.constant 0 : i32
    return %arg0, %c0_i32, %c0_i32_0 : i32, i32, i32
  }
}

</mosaic_0001>

<bundles_post_ra>
// kernel: residual_se_block_pallas.1
= control target key start
LH: loop header
LB: loop body
LE: loop exit
PB: predicated region body
PF: predicated region fallthrough
CT: control target
= control target key end

     0   :  { %s6589_s25 = smov 0   ;;  %s9350_s0 = inlined_call_operand.vmem [shape: bf16[2,328,128], index: 0, kind: input, shape index: {}]   ;;  %s9351_s1 = inlined_call_operand.vmem [shape: bf16[128,128], index: 1, kind: input, shape index: {}]   ;;  %s9352_s2 = inlined_call_operand.vmem [shape: f32[1,128], index: 2, kind: input, shape index: {}]   ;;  %s9353_s3 = inlined_call_operand.vmem [shape: bf16[9,128,128], index: 3, kind: input, shape index: {}]   ;;  %s9354_s4 = inlined_call_operand.vmem [shape: f32[1,128], index: 4, kind: input, shape index: {}]   ;;  %s9355_s5 = inlined_call_operand.vmem [shape: f32[328,1], index: 5, kind: input, shape index: {}]   ;;  %s9356_s6 = inlined_call_operand.vmem [shape: f32[288,1], index: 6, kind: input, shape index: {}]   ;;  %s9357_s7 = inlined_call_operand.vmem [shape: f32[128,128], index: 7, kind: input, shape index: {}]   ;;  %s9358_s8 = inlined_call_operand.vmem [shape: f32[1,128], index: 8, kind: input, shape index: {}]   ;;  %s9359_s9 = inlined_call_operand.vmem [shape: f32[128,128], index: 9, kind: input, shape index: {}]   ;;  %s9360_s10 = inlined_call_operand.vmem [shape: f32[1,128], index: 10, kind: input, shape index: {}]   ;;  %s9361_s11 = inlined_call_operand.vmem [shape: bf16[128,128], index: 11, kind: input, shape index: {}]   ;;  %s9362_s12 = inlined_call_operand.vmem [shape: f32[1,128], index: 12, kind: input, shape index: {}]   ;;  %s9363_s13 = inlined_call_operand.vmem [shape: f32[2,288,128], index: 13, kind: output, shape index: {}]  }
   0x1 LB: > { %s5294_s26 = sadd.s32 4294967295, %s6516_s25   ;;  %p5298_p0 = scmp.ge.s32.totalorder %s6516_s25, 1  ;;  %s6516_s25 = sphi %s6589_s25, %s23_s25  }
   0x2   : > { %p387_p1 = scmp.lt.s32.totalorder %s6516_s25, 3 }
   0x4   : > { %p388_p2 = pnand %p5298_p0, %p387_p1 }
   0x6   : > { %391 = sbr.rel (%p388_p2) target bundleno = 1522 (0x5f2), region = 72 }
   0xb   : > { %v832_v0 = vld [vmem:[%s9355_s5 + $0x20] sm:$0xff]  ;;  %v830_v1 = vld [vmem:[%s9355_s5 + $0x10] sm:$0xff]  ;;  %v6518_v3 = vmov 0   ;;  %v6166_v4 = vld [vmem:[%s9351_s1 + $0x38] sm:$0xff]  ;;  %p431_p3 = scmp.lt.s32.totalorder %s5294_s26, 1  ;;  %vm2898_vm1 = vcmask 1045504  }
   0xc   : > { %v828_v2 = vld [vmem:[%s9355_s5] sm:$0xff]  ;;  %6479 = vset.pattern.permute.xlu2 %v6518_v3  ;;  %6478 = vset.pattern.permute.xlu1 %v6518_v3  ;;  %v6165_v5 = vld [vmem:[%s9351_s1 + $0x30] sm:$0xff]  ;;  %v833_v6 = vld [vmem:[%s9355_s5 + $0x28] sm:$0xff]  ;;  %vm1360_vm0 = vsmask.f32 7424  ;;  %vm3936_vm2 = vcmask 1044480  }
   0xd   : > { %6477 = vset.pattern.permute.xlu0 %v6518_v3  ;;  %891 = vperm.xlu2 %6479, %v832_v0   ;;  %v831_v7 = vld [vmem:[%s9355_s5 + $0x18] sm:$0xff]  ;;  %v829_v8 = vld [vmem:[%s9355_s5 + $0x8] sm:$0xff]  ;;  %v6163_v10 = vld [vmem:[%s9351_s1 + $0x20] sm:$0xff]  ;;  %s9633_s26 = smov (!%p431_p3, %s5294_s26), 1  ;;  %vm1860_vm3 = vcmask 1046528  }
   0xe   : > { %881 = vperm.xlu1 %6478, %v830_v1   ;;  %871 = vperm.xlu0 %6477, %v828_v2   ;;  %v6164_v9 = vld [vmem:[%s9351_s1 + $0x28] sm:$0xff]  ;;  %v836_v11 = vld [vmem:[%s9355_s5 + $0x40] sm:$0xff]  ;;  %v835_v12 = vld [vmem:[%s9355_s5 + $0x38] sm:$0xff]  ;;  %s6466_s18 = smul.u32 164, %s9633_s26  ;;  %vm3543_vm4 = vsmask.f32 5376 }
   0xf   : > { %674 = vmatpush.bf16.msra.mxu0 %v6166_v4  ;;  %6442 = vmatpush.bf16.msra.mxu3 %v6166_v4  ;;  %v834_v13 = vld [vmem:[%s9355_s5 + $0x30] sm:$0xff]  ;;  %v6162_v14 = vld [vmem:[%s9351_s1 + $0x18] sm:$0xff]  ;;  %v837_v18 = vld [vmem:[%s9355_s5 + $0x48] sm:$0xff]  ;;  %vm2505_vm5 = vsmask.f32 6400  ;;  %s6467_s27 = smul.u32 288, %s9633_s26 }
  0x10   : > { %v6161_v15 = vld [vmem:[%s9351_s1 + $0x10] sm:$0xff]  ;;  %v839_v16 = vld [vmem:[%s9355_s5 + $0x58] sm:$0xff]  ;;  %v6160_v19 = vld [vmem:[%s9351_s1 + $0x8] sm:$0xff]  ;;  %s6667_s23 = scalar_lea.vmem %s9350_s0, %s6466_s18 }
  0x11   : > { %v838_v17 = vld [vmem:[%s9355_s5 + $0x50] sm:$0xff]  ;;  %v6159_v20 = vld [vmem:[%s9351_s1] sm:$0xff]  ;;  %v841_v22 = vld [vmem:[%s9355_s5 + $0x68] sm:$0xff]  ;;  %s9203_s29 = scalar_lea.vmem %s9363_s13, %s6467_s27 }
  0x12   : > { %v842_v21 = vld [vmem:[%s9355_s5 + $0x70] sm:$0xff]  ;;  %v840_v23 = vld [vmem:[%s9355_s5 + $0x60] sm:$0xff]  ;;  %v6154_v25 = vld [vmem:[%s6667_s23 + $0x78] sm:$0xff] }
  0x13   : > { %675 = vmatpush.bf16.msra.mxu0 %v6165_v5  ;;  %6443 = vmatpush.bf16.msra.mxu3 %v6165_v5  ;;  %v6139_v24 = vld [vmem:[%s6667_s23] sm:$0xff]  ;;  %v845_v26 = vld [vmem:[%s9355_s5 + $0x88] sm:$0xff]  ;;  %v843_v28 = vld [vmem:[%s9355_s5 + $0x78] sm:$0xff] }
  0x14   : > { %v844_v27 = vld [vmem:[%s9355_s5 + $0x80] sm:$0xff]  ;;  %v858_v29 = vld [vmem:[%s9355_s5 + $0xf0] sm:$0xff]  ;;  %v847_v30 = vld [vmem:[%s9355_s5 + $0x98] sm:$0xff] }
  0x15   : > { %896 = vperm.xlu2 %6479, %v833_v6   ;;  %v846_v31 = vld [vmem:[%s9355_s5 + $0x90] sm:$0xff]  ;;  %v6140_v32 = vld [vmem:[%s6667_s23 + $0x8] sm:$0xff]  ;;  %v6155_v33 = vld [vmem:[%s6667_s23 + $0x80] sm:$0xff] }
  0x16   : > { %886 = vperm.xlu1 %6478, %v831_v7   ;;  %876 = vperm.xlu0 %6477, %v829_v8   ;;  %v861_v34 = vld [vmem:[%s9355_s5 + $0x108] sm:$0xff]  ;;  %v860_v35 = vld [vmem:[%s9355_s5 + $0x100] sm:$0xff]  ;;  %v859_v36 = vld [vmem:[%s9355_s5 + $0xf8] sm:$0xff] }
  0x17   : > { %676 = vmatpush.bf16.msra.mxu0 %v6164_v9  ;;  %6444 = vmatpush.bf16.msra.mxu3 %v6164_v9  ;;  %v862_v37 = vld [vmem:[%s9355_s5 + $0x110] sm:$0xff]  ;;  %v849_v38 = vld [vmem:[%s9355_s5 + $0xa8] sm:$0xff]  ;;  %v848_v39 = vld [vmem:[%s9355_s5 + $0xa0] sm:$0xff] }
  0x18   : > { %v6141_v40 = vld [vmem:[%s6667_s23 + $0x10] sm:$0xff]  ;;  %v6156_v41 = vld [vmem:[%s6667_s23 + $0x88] sm:$0xff]  ;;  %v851_v42 = vld [vmem:[%s9355_s5 + $0xb8] sm:$0xff] }
  0x19   : > { %v850_v43 = vld [vmem:[%s9355_s5 + $0xb0] sm:$0xff]  ;;  %v863_v44 = vld [vmem:[%s9355_s5 + $0x118] sm:$0xff]  ;;  %v852_v45 = vld [vmem:[%s9355_s5 + $0xc0] sm:$0xff] }
  0x1a   : > { %v865_v46 = vld [vmem:[%s9355_s5 + $0x128] sm:$0xff]  ;;  %v864_v47 = vld [vmem:[%s9355_s5 + $0x120] sm:$0xff]  ;;  %v6142_v48 = vld [vmem:[%s6667_s23 + $0x18] sm:$0xff] }
  0x1b   : > { %677 = vmatpush.bf16.msra.mxu0 %v6163_v10  ;;  %6445 = vmatpush.bf16.msra.mxu3 %v6163_v10  ;;  %v6157_v49 = vld [vmem:[%s6667_s23 + $0x90] sm:$0xff]  ;;  %v855_v50 = vld [vmem:[%s9355_s5 + $0xd8] sm:$0xff]  ;;  %v853_v52 = vld [vmem:[%s9355_s5 + $0xc8] sm:$0xff] }
  0x1c   : > { %v854_v51 = vld [vmem:[%s9355_s5 + $0xd0] sm:$0xff]  ;;  %v857_v54 = vld [vmem:[%s9355_s5 + $0xe8] sm:$0xff]  ;;  %v856_v55 = vld [vmem:[%s9355_s5 + $0xe0] sm:$0xff] }
  0x1d   : > { %911 = vperm.xlu2 %6479, %v836_v11   ;;  %v866_v53 = vld [vmem:[%s9355_s5 + $0x130] sm:$0xff]  ;;  %v6143_v56 = vld [vmem:[%s6667_s23 + $0x20] sm:$0xff]  ;;  %v6158_v57 = vld [vmem:[%s6667_s23 + $0x98] sm:$0xff] }
  0x1e   : > { %906 = vperm.xlu1 %6478, %v835_v12   ;;  %901 = vperm.xlu0 %6477, %v834_v13   ;;  %v4215_v58 = vld [vmem:[%s9356_s6] sm:$0xff]  ;;  %v867_v60 = vld [vmem:[%s9355_s5 + $0x138] sm:$0xff]  ;;  %v4217_v0 = vld [vmem:[%s9356_s6 + $0x10] sm:$0xff] }
  0x1f   : > { %678 = vmatpush.bf16.msra.mxu0 %v6162_v14  ;;  %6446 = vmatpush.bf16.msra.mxu3 %v6162_v14  ;;  %v868_v59 = vld [vmem:[%s9355_s5 + $0x140] sm:$0xff]  ;;  %v4218_v63 = vld [vmem:[%s9356_s6 + $0x18] sm:$0xff]  ;;  %v4216_v1 = vld [vmem:[%s9356_s6 + $0x8] sm:$0xff] }
  0x20   : > { %v481_v61 = vld [vmem:[%s6667_s23 + $0xa0] sm:$0xf]  ;;  %v6144_v2 = vld [vmem:[%s6667_s23 + $0x28] sm:$0xff]  ;;  %v6783_v4 = vld [vmem:[%s9353_s3 + $0x38] sm:$0xff] }
  0x21   : > { %v583_v62 = vunpack.c.l.b16 %v481_v61  ;;  %1740 = vmatpush.bf16.msra.mxu2 %v6783_v4  ;;  %v6793_v7 = vld [vmem:[%s9353_s3 + $0x30] sm:$0xff]  ;;  %v4220_v9 = vld [vmem:[%s9356_s6 + $0x28] sm:$0xff]  ;;  %v4219_v10 = vld [vmem:[%s9356_s6 + $0x20] sm:$0xff] }
  0x22   : > { %v4221_v8 = vld [vmem:[%s9356_s6 + $0x30] sm:$0xff]  ;;  %v6810_v12 = vld [vmem:[%s9353_s3 + $0x28] sm:$0xff]  ;;  %v6818_v14 = vld [vmem:[%s9353_s3 + $0x20] sm:$0xff] }
  0x23   : > { %679 = vmatpush.bf16.msra.mxu0 %v6161_v15  ;;  %6447 = vmatpush.bf16.msra.mxu3 %v6161_v15  ;;  %v604_v3 = vpack.c.b16 %v583_v62, %v583_v62  ;;  %v6193_v61 = vld [vmem:[%s9353_s3 + $0x48] sm:$0xff]  ;;  %v4238_v62 = vld [vmem:[%s9356_s6 + $0xb8] sm:$0xff] }
  0x25   : > { %926 = vperm.xlu2 %6479, %v839_v16   ;;  %1741 = vmatpush.bf16.msra.mxu2 %v6793_v7  ;;  %v4224_v16 = vld [vmem:[%s9356_s6 + $0x48] sm:$0xff] }
  0x26   : > { %921 = vperm.xlu1 %6478, %v838_v17   ;;  %916 = vperm.xlu0 %6477, %v837_v18   ;;  %v4223_v17 = vld [vmem:[%s9356_s6 + $0x40] sm:$0xff]  ;;  %v4222_v18 = vld [vmem:[%s9356_s6 + $0x38] sm:$0xff] }
  0x27   : > { %680 = vmatpush.bf16.msra.mxu0 %v6160_v19  ;;  %6448 = vmatpush.bf16.msra.mxu3 %v6160_v19  ;;  %v6145_v19 = vld [vmem:[%s6667_s23 + $0x30] sm:$0xff] }
  0x29   : > { %1742 = vmatpush.bf16.msra.mxu2 %v6810_v12 }
  0x2b   : > { %681 = vmatpush.bf16.msra.mxu0 %v6159_v20  ;;  %6449 = vmatpush.bf16.msra.mxu3 %v6159_v20  ;;  %v6836_v20 = vld [vmem:[%s9353_s3 + $0x18] sm:$0xff] }
  0x2d   : > { %941 = vperm.xlu2 %6479, %v842_v21   ;;  %1743 = vmatpush.bf16.msra.mxu2 %v6818_v14 }
  0x2e   : > { %936 = vperm.xlu1 %6478, %v841_v22   ;;  %931 = vperm.xlu0 %6477, %v840_v23   ;;  %v6846_v23 = vld [vmem:[%s9353_s3 + $0x10] sm:$0xff] }
  0x2f   : > { %682 = vmatmul.bf16.vlgmr.msra.gmra.mxu0 %v6139_v24  ;;  %757 = vmatmul.bf16.vlgmr.msra.gmra.mxu3 %v6154_v25  ;;  %v4227_v24 = vld [vmem:[%s9356_s6 + $0x60] sm:$0xff]  ;;  %v4226_v25 = vld [vmem:[%s9356_s6 + $0x58] sm:$0xff] }
  0x31   : > { %1744 = vmatpush.bf16.msra.mxu2 %v6836_v20 }
  0x35   : > { %956 = vperm.xlu2 %6479, %v845_v26   ;;  %v4225_v26 = vld [vmem:[%s9356_s6 + $0x50] sm:$0xff]  ;;  %1745 = vmatpush.bf16.msra.mxu2 %v6846_v23 }
  0x36   : > { %951 = vperm.xlu1 %6478, %v844_v27   ;;  %946 = vperm.xlu0 %6477, %v843_v28   ;;  %v6863_v28 = vld [vmem:[%s9353_s3 + $0x8] sm:$0xff] }
  0x39   : > { %1746 = vmatpush.bf16.msra.mxu2 %v6863_v28 }
  0x3d   : > { %1021 = vperm.xlu2 %6479, %v858_v29  }
  0x3e   : > { %966 = vperm.xlu1 %6478, %v847_v30   ;;  %961 = vperm.xlu0 %6477, %v846_v31   ;;  %v6873_v31 = vld [vmem:[%s9353_s3] sm:$0xff] }
  0x3f   : > { %687 = vmatmul.bf16.gmra.mxu0 %v6140_v32  ;;  %762 = vmatmul.bf16.gmra.mxu3 %v6155_v33  ;;  %v4230_v32 = vld [vmem:[%s9356_s6 + $0x78] sm:$0xff] }
  0x40   : > { %v6199_v33 = vld [vmem:[%s9353_s3 + $0x78] sm:$0xff]  ;;  %1747 = vmatpush.bf16.msra.mxu2 %v6873_v31 }
  0x41   : > { %1575 = vmatpush.bf16.msra.mxu1 %v6199_v33  ;;  %6450 = vmatpush.bf16.msrb.mxu3 %v6199_v33  ;;  %v6148_v33 = vld [vmem:[%s6667_s23 + $0x48] sm:$0xff] }
  0x45   : > { %1036 = vperm.xlu2 %6479, %v861_v34   ;;  %v4229_v34 = vld [vmem:[%s9356_s6 + $0x70] sm:$0xff] }
  0x46   : > { %1031 = vperm.xlu1 %6478, %v860_v35   ;;  %1026 = vperm.xlu0 %6477, %v859_v36   ;;  %v4228_v35 = vld [vmem:[%s9356_s6 + $0x68] sm:$0xff]  ;;  %v6146_v36 = vld [vmem:[%s6667_s23 + $0x38] sm:$0xff] }
  0x4d   : > { %1041 = vperm.xlu2 %6479, %v862_v37  }
  0x4e   : > { %976 = vperm.xlu1 %6478, %v849_v38   ;;  %971 = vperm.xlu0 %6477, %v848_v39   ;;  %v6198_v38 = vld [vmem:[%s9353_s3 + $0x70] sm:$0xff] }
  0x4f   : > { %692 = vmatmul.bf16.gmra.mxu0 %v6141_v40  ;;  %767 = vmatmul.bf16.gmra.mxu3 %v6156_v41  ;;  %v4233_v41 = vld [vmem:[%s9356_s6 + $0x90] sm:$0xff] }
  0x50   : > { %1576 = vmatpush.bf16.msra.mxu1 %v6198_v38  ;;  %6451 = vmatpush.bf16.msrb.mxu3 %v6198_v38 }
  0x55   : > { %986 = vperm.xlu2 %6479, %v851_v42   ;;  %v6197_v42 = vld [vmem:[%s9353_s3 + $0x68] sm:$0xff] }
  0x56   : > { %981 = vperm.xlu1 %6478, %v850_v43   ;;  %1046 = vperm.xlu0 %6477, %v863_v44   ;;  %v4232_v43 = vld [vmem:[%s9356_s6 + $0x88] sm:$0xff]  ;;  %v4231_v44 = vld [vmem:[%s9356_s6 + $0x80] sm:$0xff] }
  0x57   : > { %1577 = vmatpush.bf16.msra.mxu1 %v6197_v42  ;;  %6452 = vmatpush.bf16.msrb.mxu3 %v6197_v42 }
  0x5d   : > { %991 = vperm.xlu2 %6479, %v852_v45   ;;  %v6196_v45 = vld [vmem:[%s9353_s3 + $0x60] sm:$0xff] }
  0x5e   : > { %1056 = vperm.xlu1 %6478, %v865_v46   ;;  %1051 = vperm.xlu0 %6477, %v864_v47  }
  0x5f   : > { %697 = vmatmul.bf16.gmra.mxu0 %v6142_v48  ;;  %772 = vmatmul.bf16.gmra.mxu3 %v6157_v49  ;;  %v4236_v48 = vld [vmem:[%s9356_s6 + $0xa8] sm:$0xff]  ;;  %v6195_v49 = vld [vmem:[%s9353_s3 + $0x58] sm:$0xff] }
  0x60   : > { %1578 = vmatpush.bf16.msra.mxu1 %v6196_v45  ;;  %6453 = vmatpush.bf16.msrb.mxu3 %v6196_v45 }
  0x64   : > { %1579 = vmatpush.bf16.msra.mxu1 %v6195_v49  ;;  %6454 = vmatpush.bf16.msrb.mxu3 %v6195_v49  ;;  %v4245_v49 = vld [vmem:[%s9356_s6 + $0xf0] sm:$0xff] }
  0x65   : > { %1006 = vperm.xlu2 %6479, %v855_v50   ;;  %v4235_v50 = vld [vmem:[%s9356_s6 + $0xa0] sm:$0xff] }
  0x66   : > { %1001 = vperm.xlu1 %6478, %v854_v51   ;;  %996 = vperm.xlu0 %6477, %v853_v52   ;;  %v4234_v51 = vld [vmem:[%s9356_s6 + $0x98] sm:$0xff]  ;;  %v6147_v52 = vld [vmem:[%s6667_s23 + $0x40] sm:$0xff] }
  0x67   : > { %v6785_v5 = vpop.permute.xlu2 %891 }
  0x6d   : > { %1061 = vperm.xlu2 %6479, %v866_v53  }
  0x6e   : > { %1016 = vperm.xlu1 %6478, %v857_v54   ;;  %1011 = vperm.xlu0 %6477, %v856_v55   ;;  %v6935_v55 = vld [vmem:[%s9352_s2] ss:$0 sm:$0xff] }
  0x6f   : > { %702 = vmatmul.bf16.gmra.mxu0 %v6143_v56  ;;  %777 = vmatmul.bf16.gmra.mxu3 %v6158_v57  ;;  %v6820_v15 = vpop.permute.xlu2 %896  ;;  %v6194_v56 = vld [vmem:[%s9353_s3 + $0x50] sm:$0xff] }
  0x70   : > { %1580 = vmatpush.bf16.msra.mxu1 %v6194_v56  ;;  %6455 = vmatpush.bf16.msrb.mxu3 %v6194_v56 }
  0x74   : > { %1581 = vmatpush.bf16.msra.mxu1 %v6193_v61  ;;  %6456 = vmatpush.bf16.msrb.mxu3 %v6193_v61 }
  0x75   : > { %4253 = vperm.xlu2 %6479, %v4215_v58  }
  0x76   : > { %1071 = vperm.xlu1 %6478, %v868_v59   ;;  %1066 = vperm.xlu0 %6477, %v867_v60   ;;  %v4239_v60 = vld [vmem:[%s9356_s6 + $0xc0] sm:$0xff] }
  0x77   : > { %v6857_v27 = vpop.permute.xlu2 %911 }
  0x7d   : > { %4268 = vperm.xlu2 %6479, %v4218_v63   ;;  %v4237_v63 = vld [vmem:[%s9356_s6 + $0xb0] sm:$0xff] }
  0x7e   : > { %4263 = vperm.xlu1 %6478, %v4217_v0   ;;  %4258 = vperm.xlu0 %6477, %v4216_v1  }
  0x7f   : > { %707 = vmatmul.bf16.gmra.mxu0 %v6144_v2  ;;  %782 = vmatmul.bf16.gmra.mxu3 %v604_v3  ;;  %v6889_v37 = vpop.permute.xlu2 %926 }
  0x80   : > { %v6787_v6 = vpop.permute.xlu0 %871  ;;  %v6804_v11 = vpop.permute.xlu1 %881 }
  0x85   : > { %4283 = vperm.xlu2 %6479, %v4221_v8  }
  0x86   : > { %4278 = vperm.xlu1 %6478, %v4220_v9   ;;  %4273 = vperm.xlu0 %6477, %v4219_v10  }
  0x87   : > { %v6913_v46 = vpop.permute.xlu2 %941 }
  0x88   : > { %v6812_v13 = vpop.permute.xlu0 %876  ;;  %v6838_v21 = vpop.permute.xlu1 %886 }
  0x8d   : > { %4298 = vperm.xlu2 %6479, %v4224_v16   ;;  %v6192_v16 = vld [vmem:[%s9353_s3 + $0x40] sm:$0xff] }
  0x8e   : > { %4293 = vperm.xlu1 %6478, %v4223_v17   ;;  %4288 = vperm.xlu0 %6477, %v4222_v18  }
  0x8f   : > { %712 = vmatmul.bf16.gmra.mxu0 %v6145_v19  ;;  %v6941_v58 = vpop.permute.xlu2 %956  ;;  %1582 = vmatpush.bf16.msra.mxu1 %v6192_v16 }
  0x90   : > { %v6840_v22 = vpop.permute.xlu0 %901  ;;  %v6865_v29 = vpop.permute.xlu1 %906  ;;  %6457 = vmatpush.bf16.msrb.mxu3 %v6192_v16 }
  0x94   : > { %6458 = vmatpush.bf16.msra.mxu3 %v6783_v4  ;;  %v6240_v4 = vld [vmem:[%s9353_s3 + $0x138] sm:$0xff] }
  0x95   : > { %4313 = vperm.xlu2 %6479, %v4227_v24   ;;  %2742 = vmatpush.bf16.msrb.mxu2 %v6240_v4 }
  0x96   : > { %4308 = vperm.xlu1 %6478, %v4226_v25   ;;  %4303 = vperm.xlu0 %6477, %v4225_v26   ;;  %v4242_v25 = vld [vmem:[%s9356_s6 + $0xd8] sm:$0xff] }
  0x98   : > { %v6867_v30 = vpop.permute.xlu0 %916  ;;  %v6896_v40 = vpop.permute.xlu1 %921  ;;  %6459 = vmatpush.bf16.msra.mxu3 %v6793_v7  ;;  %v6232_v7 = vld [vmem:[%s9353_s3 + $0xf8] sm:$0xff] }
  0x99   : > { %2349 = vmatpush.bf16.msrb.mxu1 %v6232_v7 }
  0x9c   : > { %6460 = vmatpush.bf16.msra.mxu3 %v6810_v12  ;;  %v4248_v12 = vld [vmem:[%s9356_s6 + $0x108] sm:$0xff] }
  0x9d   : > { %4328 = vperm.xlu2 %6479, %v4230_v32  }
  0x9e   : > { %4323 = vperm.xlu1 %6478, %v4229_v34   ;;  %4318 = vperm.xlu0 %6477, %v4228_v35   ;;  %v1022_v34 = vpop.permute.xlu2 %1021 }
  0x9f   : > { %717 = vmatmul.bf16.gmra.mxu0 %v6146_v36 }
  0xa0   : > { %v6894_v39 = vpop.permute.xlu0 %931  ;;  %v6930_v53 = vpop.permute.xlu1 %936  ;;  %6461 = vmatpush.bf16.msra.mxu3 %v6818_v14  ;;  %v6149_v14 = vld [vmem:[%s6667_s23 + $0x50] sm:$0xff] }
  0xa4   : > { %6462 = vmatpush.bf16.msra.mxu3 %v6836_v20  ;;  %v4250_v20 = vld [vmem:[%s9356_s6 + $0x118] sm:$0xff] }
  0xa5   : > { %4343 = vperm.xlu2 %6479, %v4233_v41  }
  0xa6   : > { %4338 = vperm.xlu1 %6478, %v4232_v43   ;;  %4333 = vperm.xlu0 %6477, %v4231_v44  }
  0xa8   : > { %v6915_v47 = vpop.permute.xlu0 %946  ;;  %v6959_v9 = vpop.permute.xlu1 %951  ;;  %6463 = vmatpush.bf16.msra.mxu3 %v6846_v23 }
  0xac   : > { %v683_v54 = vpop.f32.mrf.mxu0  ;;  %6464 = vmatpush.bf16.msra.mxu3 %v6863_v28 }
  0xad   : > { %4358 = vperm.xlu2 %6479, %v4236_v48   ;;  %v684_v57 = vadd.f32 %v6935_v55, %v683_v54 }
  0xae   : > { %4353 = vperm.xlu1 %6478, %v4235_v50   ;;  %4348 = vperm.xlu0 %6477, %v4234_v51   ;;  %v4244_v50 = vld [vmem:[%s9356_s6 + $0xe8] sm:$0xff]  ;;  %v4243_v51 = vld [vmem:[%s9356_s6 + $0xe0] sm:$0xff] }
  0xaf   : > { %722 = vmatmul.bf16.gmra.mxu0 %v6147_v52  ;;  %v787_v2 = vmax.f32 %v684_v57, 0.0 }
  0xb0   : > { %v6955_v0 = vpop.permute.xlu0 %961  ;;  %v6985_v43 = vpop.permute.xlu1 %966  ;;  %6465 = vmatpush.bf16.msra.mxu3 %v6873_v31  ;;  %v6150_v31 = vld [vmem:[%s6667_s23 + $0x58] sm:$0xff] }
  0xb1   : > { %v1074_v17 = vmul.f32 %v6787_v6, %v787_v2  ;;  %v4241_v6 = vld [vmem:[%s9356_s6 + $0xd0] sm:$0xff] }
  0xb2   : > { %v758_v59 = vpop.f32.mrf.mxu3 }
  0xb3   : > { %v759_v3 = vadd.f32 %v6935_v55, %v758_v59 }
  0xb4   : > { %v685_v1 = vpop.f32.mrf.mxu0 }
  0xb5   : > { %v686_v8 = vadd.f32 %v6935_v55, %v685_v1  ;;  %4373 = vperm.xlu2 %6479, %v4239_v60   ;;  %v817_v18 = vmax.f32 %v759_v3, 0.0  ;;  %v1037_v1 = vpop.permute.xlu2 %1036 }
  0xb6   : > { %4368 = vperm.xlu1 %6478, %v4238_v62   ;;  %4363 = vperm.xlu0 %6477, %v4237_v63  }
  0xb7   : > { %v788_v10 = vmax.f32 %v686_v8, 0.0  ;;  %v1104_v36 = vmul.f32 %v1022_v34, %v817_v18 }
  0xb8   : > { %v1027_v41 = vpop.permute.xlu0 %1026  ;;  %v1032_v62 = vpop.permute.xlu1 %1031 }
  0xb9   : > { %v1075_v19 = vmul.f32 %v6812_v13, %v788_v10  ;;  %v4240_v13 = vld [vmem:[%s9356_s6 + $0xc8] sm:$0xff]  ;;  %v4247_v10 = vld [vmem:[%s9356_s6 + $0x100] sm:$0xff] }
  0xba   : > { %v760_v24 = vpop.f32.mrf.mxu3 }
  0xbb   : > { %v6970_v26 = vpack.c.bf16 %v1075_v19, %v1074_v17  ;;  %v761_v32 = vadd.f32 %v6935_v55, %v760_v24 }
  0xbc   : > { %v688_v35 = vpop.f32.mrf.mxu0 }
  0xbd   : > { %6320 = vst [vmem:[#allocation2] sm:$0xff] %v6970_v26   ;;  %v818_v38 = vmax.f32 %v761_v32, 0.0  ;;  %4388 = vperm.xlu2 %6479, %v4242_v25   ;;  %1748 = vmatmul.bf16.vlgmr.msra.gmra.mxu2 %v6970_v26  ;;  %v689_v45 = vadd.f32 %v6935_v55, %v688_v35  ;;  %v1364_v24 = vshll.u32 %v6970_v26, 16 }
  0xbe   : > { %4383 = vperm.xlu1 %6478, %v4241_v6   ;;  %4378 = vperm.xlu0 %6477, %v4240_v13  }
  0xbf   : > { %v1105_v42 = vmul.f32 %v1027_v41, %v818_v38  ;;  %727 = vmatmul.bf16.gmra.mxu0 %v6148_v33  ;;  %v789_v54 = vmax.f32 %v689_v45, 0.0  ;;  %v4249_v33 = vld [vmem:[%s9356_s6 + $0x110] sm:$0xff]  ;;  %v1366_v35 = vrot.slane %v1364_v24, 1  ;;  %v1042_v38 = vpop.permute.xlu2 %1041 }
  0xc0   : > { %v7032_v34 = vpop.permute.xlu1 %976 }
  0xc1   : > { %v6394_v44 = vpack.c.bf16 %v1105_v42, %v1104_v36  ;;  %v1076_v60 = vmul.f32 %v6804_v11, %v789_v54  ;;  %v4246_v11 = vld [vmem:[%s9356_s6 + $0xf8] sm:$0xff]  ;;  %v1362_v42 = vshrl.u32 %v6970_v26, 16 }
  0xc2   : > { %v763_v48 = vpop.f32.mrf.mxu3 }
  0xc3   : > { %6434 = vst [vmem:[#allocation2 + $0x78] sm:$0xff] %v6394_v44   ;;  %v764_v57 = vadd.f32 %v6935_v55, %v763_v48  ;;  %v1367_v28 = vor.u32 %v1366_v35, %v1362_v42 }
  0xc4   : > { %v690_v52 = vpop.f32.mrf.mxu0 }
  0xc5   : > { %v691_v56 = vadd.f32 %v6935_v55, %v690_v52  ;;  %4403 = vperm.xlu2 %6479, %v4245_v49   ;;  %v819_v2 = vmax.f32 %v764_v57, 0.0 }
  0xc6   : > { %4398 = vperm.xlu1 %6478, %v4244_v50   ;;  %4393 = vperm.xlu0 %6477, %v4243_v51  }
  0xc7   : > { %v790_v59 = vmax.f32 %v691_v56, 0.0  ;;  %v1106_v18 = vmul.f32 %v1032_v62, %v819_v2 }
  0xc9   : > { %v1077_v61 = vmul.f32 %v6838_v21, %v790_v59  ;;  %v7018_v21 = vpop.permute.xlu0 %971 }
  0xca   : > { %v765_v63 = vpop.f32.mrf.mxu3  ;;  %v7024_v13 = vld [vmem:[#allocation2 + $0x78] sm:$0xff] }
  0xcb   : > { %v6324_v3 = vpack.c.bf16 %v1077_v61, %v1076_v60  ;;  %v766_v8 = vadd.f32 %v6935_v55, %v765_v63  ;;  %v1481_v48 = vshll.u32 %v7024_v13, 16  ;;  %v1485_v59 = vshrl.u32 %v7024_v13, 16  ;;  %v7057_v63 = vld [vmem:[#allocation2 + $0x78] sm:$0xff] }
  0xcc   : > { %v693_v16 = vpop.f32.mrf.mxu0 }
  0xcd   : > { %6420 = vst [vmem:[#allocation2 + $0x8] sm:$0xff] %v6324_v3   ;;  %v820_v17 = vmax.f32 %v766_v8, 0.0  ;;  %4418 = vperm.xlu2 %6479, %v4248_v12   ;;  %v694_v32 = vadd.f32 %v6935_v55, %v693_v16  ;;  %v7052_v57 = vrot.slane %v1481_v48, 1  ;;  %v7060_v12 = vld [vmem:[#allocation2 + $0x78] sm:$0xff]  ;;  %v6239_v3 = vld [vmem:[%s9353_s3 + $0x130] sm:$0xff] }
  0xce   : > { %4413 = vperm.xlu1 %6478, %v4247_v10   ;;  %4408 = vperm.xlu0 %6477, %v4246_v11   ;;  %v7071_v11 = vpop.permute.xlu1 %981  ;;  %v6231_v48 = vld [vmem:[%s9353_s3 + $0xf0] sm:$0xff] }
  0xcf   : > { %v1107_v19 = vmul.f32 %v1037_v1, %v820_v17  ;;  %732 = vmatmul.bf16.gmra.mxu0 %v6149_v14  ;;  %v791_v4 = vmax.f32 %v694_v32, 0.0  ;;  %9404 = vst [vmem:[#allocation3_spill] sm:$0xff] %v7052_v57  ;;  %v1487_v14 = vor.u32 %v1485_v59, %v7052_v57  ;;  %2743 = vmatpush.bf16.msrb.mxu2 %v6239_v3  ;;  %v9365_v32 = vrot.slane %v7057_v63, 2 }
  0xd0   : > { %2350 = vmatpush.bf16.msrb.mxu1 %v6231_v48 }
  0xd1   : > { %v6399_v25 = vpack.c.bf16 %v1107_v19, %v1106_v18  ;;  %v1047_v44 = vpop.permute.xlu0 %1046  ;;  %v1078_v26 = vmul.f32 %v6785_v5, %v791_v4  ;;  %v7076_v18 = vpop.permute.xlu2 %986 }
  0xd2   : > { %v768_v6 = vpop.f32.mrf.mxu3 }
  0xd3   : > { %6435 = vst [vmem:[#allocation2 + $0x80] sm:$0xff] %v6399_v25   ;;  %v769_v49 = vadd.f32 %v6935_v55, %v768_v6  ;;  %v6273_v25 = vld [vmem:[%s9353_s3 + $0x1b8] sm:$0xff] }
  0xd4   : > { %v695_v36 = vpop.f32.mrf.mxu0  ;;  %v7034_v23 = vld [vmem:[#allocation2 + $0x8] sm:$0xff]  ;;  %3387 = vmatpush.bf16.msrb.mxu0 %v6273_v25 }
  0xd5   : > { %v696_v41 = vadd.f32 %v6935_v55, %v695_v36  ;;  %v1369_v45 = vshll.u32 %v7034_v23, 16  ;;  %1753 = vmatmul.bf16.gmra.mxu2 %v7034_v23  ;;  %v821_v60 = vmax.f32 %v769_v49, 0.0  ;;  %v7067_v8 = vld [vmem:[#allocation2 + $0xc] sm:$0xf]  ;;  %v2877_v17 = vld [vmem:[#allocation2 + $0x8] sm:$0xc] }
  0xd6   : > { %4428 = vperm.xlu1 %6478, %v4250_v20   ;;  %4423 = vperm.xlu0 %6477, %v4249_v33   ;;  %v9366_v33 = vunpack.c.l.b16 %v7067_v8  ;;  %v9364_v36 = vrot.slane %v7060_v12, 3  ;;  %v6272_v49 = vld [vmem:[%s9353_s3 + $0x1b0] sm:$0xff]  ;;  %v1057_v3 = vpop.permute.xlu1 %1056 }
  0xd7   : > { %v792_v50 = vmax.f32 %v696_v41, 0.0  ;;  %v7043_v51 = vrot.slane %v1369_v45, 1  ;;  %v1108_v19 = vmul.f32 %v1042_v38, %v821_v60  ;;  %v2896_v41 = vunpack.c.l.b16 %v2877_v17 }
  0xd8   : > { %3388 = vmatpush.bf16.msrb.mxu0 %v6272_v49  ;;  %v1373_v60 = vshrl.u32 %v7034_v23, 16 }
  0xd9   : > { %v1079_v7 = vmul.f32 %v6820_v15, %v792_v50  ;;  %v1372_v54 = vsel %vm1360_vm0, %v1367_v28, %v7043_v51  ;;  %v7082_v6 = vpop.permute.xlu0 %1051  ;;  %v2897_v59 = vpack.c.b16 %v9366_v33, %v2896_v41 }
  0xda   : > { %v770_v52 = vpop.f32.mrf.mxu3  ;;  %v7050_v56 = vld [vmem:[#allocation2 + $0x80] sm:$0xff]  ;;  %1583 = vmatmul.bf16.vlgmr.msra.gmra.mxu1 %v1372_v54 }
  0xdb   : > { %v6329_v61 = vpack.c.bf16 %v1079_v7, %v1078_v26  ;;  %v771_v62 = vadd.f32 %v6935_v55, %v770_v52  ;;  %v1489_v15 = vshll.u32 %v7050_v56, 16  ;;  %v7062_v1 = vld [vmem:[#allocation2 + $0x80] sm:$0xff] }
  0xdc   : > { %v698_v5 = vpop.f32.mrf.mxu0  ;;  %v7069_v10 = vld [vmem:[#allocation2 + $0x80] sm:$0xff]  ;;  %v2928_v35 = vrot.slane %v7062_v1, 2 }
  0xdd   : > { %6421 = vst [vmem:[#allocation2 + $0x10] sm:$0xff] %v6329_v61   ;;  %v822_v2 = vmax.f32 %v771_v62, 0.0  ;;  %v7074_v16 = vrot.slane %v1489_v15, 1  ;;  %v699_v4 = vadd.f32 %v6935_v55, %v698_v5  ;;  %v3964_v42 = vrot.slane %v7069_v10, 3 }
  0xde   : > { %v7096_v45 = vsel %vm2898_vm1, %v9365_v32, %v2928_v35  ;;  %v9367_v62 = vrot.slane %v7034_v23, 1 }
  0xdf   : > { %v1109_v24 = vmul.f32 %v1047_v44, %v822_v2  ;;  %737 = vmatmul.bf16.gmra.mxu0 %v6150_v31  ;;  %v1492_v20 = vsel %vm1360_vm0, %v1487_v14, %v7074_v16  ;;  %9405 = vst [vmem:[#allocation4_spill] sm:$0xff] %v7096_v45  ;;  %v7109_v50 = vsel %vm3936_vm2, %v9364_v36, %v3964_v42  ;;  %v793_v7 = vmax.f32 %v699_v4, 0.0  ;;  %v6271_v2 = vld [vmem:[%s9353_s3 + $0x1a8] sm:$0xff] }
  0xe0   : > { %1658 = vmatmul.bf16.vlgmr.msrb.gmra.mxu3 %v1492_v20  ;;  %9406 = vst [vmem:[#allocation5_spill] sm:$0xff] %v7109_v50  ;;  %v1375_v14 = vor.u32 %v1373_v60, %v7043_v51  ;;  %3389 = vmatpush.bf16.msrb.mxu0 %v6271_v2  ;;  %v1493_v60 = vshrl.u32 %v7050_v56, 16 }
  0xe1   : > { %v6404_v38 = vpack.c.bf16 %v1109_v24, %v1108_v19  ;;  %v7137_v24 = vpop.permute.xlu2 %991  ;;  %v1080_v25 = vmul.f32 %v6840_v22, %v793_v7  ;;  %v7142_v4 = vpop.permute.xlu0 %996  ;;  %v6151_v22 = vld [vmem:[%s6667_s23 + $0x60] sm:$0xff] }
  0xe2   : > { %v773_v44 = vpop.f32.mrf.mxu3 }
  0xe3   : > { %6436 = vst [vmem:[#allocation2 + $0x88] sm:$0xff] %v6404_v38   ;;  %v774_v5 = vadd.f32 %v6935_v55, %v773_v44  ;;  %v2899_v38 = vrot.slane %v2897_v59, 2 }
  0xe4   : > { %v700_v28 = vpop.f32.mrf.mxu0  ;;  %v7111_v26 = vld [vmem:[#allocation2 + $0x10] sm:$0xff] }
  0xe5   : > { %v701_v52 = vadd.f32 %v6935_v55, %v700_v28  ;;  %v7114_v54 = vld [vmem:[#allocation2 + $0x10] sm:$0xff]  ;;  %v1377_v61 = vshll.u32 %v7111_v26, 16  ;;  %v1864_v31 = vrot.slane %v7111_v26, 1  ;;  %1758 = vmatmul.bf16.gmra.mxu2 %v7111_v26  ;;  %v823_v49 = vmax.f32 %v774_v5, 0.0 }
  0xe6   : > { %v9370_v51 = vrot.slane %v7114_v54, 2 }
  0xe7   : > { %v794_v15 = vmax.f32 %v701_v52, 0.0  ;;  %v7128_v17 = vrot.slane %v1377_v61, 1  ;;  %v7135_v19 = vsel %vm1860_vm3, %v9367_v62, %v1864_v31 }
  0xe8   : > { %v7156_v7 = vsel %vm2898_vm1, %v2899_v38, %v9370_v51  ;;  %v6269_v38 = vld [vmem:[%s9353_s3 + $0x198] sm:$0xff] }
  0xe9   : > { %v1081_v20 = vmul.f32 %v6865_v29, %v794_v15  ;;  %v1380_v44 = vsel %vm1360_vm0, %v1375_v14, %v7128_v17  ;;  %v6270_v29 = vld [vmem:[%s9353_s3 + $0x1a0] sm:$0xff]  ;;  %9407 = vst [vmem:[#allocation6_spill] sm:$0xff] %v7156_v7  ;;  %v1495_v15 = vor.u32 %v1493_v60, %v7074_v16  ;;  %v3915_v60 = vld [vmem:[#allocation2 + $0x10] sm:$0x8] }
  0xea   : > { %v775_v41 = vpop.f32.mrf.mxu3  ;;  %v7146_v48 = vld [vmem:[#allocation2 + $0x88] sm:$0xff]  ;;  %1588 = vmatmul.bf16.gmra.mxu1 %v1380_v44  ;;  %3390 = vmatpush.bf16.msrb.mxu0 %v6270_v29  ;;  %v3934_v62 = vunpack.c.l.b16 %v3915_v60  ;;  %v3664_v60 = vshll.u32 %v7060_v12, 16 }
  0xeb   : > { %v6334_v28 = vpack.c.bf16 %v1081_v20, %v1080_v25  ;;  %v776_v52 = vadd.f32 %v6935_v55, %v775_v41  ;;  %v1497_v61 = vshll.u32 %v7146_v48, 16  ;;  %v7163_v14 = vld [vmem:[#allocation2 + $0x88] sm:$0xff]  ;;  %v1110_v25 = vmul.f32 %v7082_v6, %v823_v49  ;;  %v7176_v6 = vld [vmem:[#allocation2 + $0x14] sm:$0xf]  ;;  %v7179_v49 = vpop.permute.xlu2 %1006 }
  0xec   : > { %v703_v59 = vpop.f32.mrf.mxu0  ;;  %v7169_v41 = vld [vmem:[#allocation2 + $0x88] sm:$0xff]  ;;  %v3229_v36 = vunpack.c.l.b16 %v7176_v6 }
  0xed   : > { %6422 = vst [vmem:[#allocation2 + $0x18] sm:$0xff] %v6334_v28   ;;  %v824_v5 = vmax.f32 %v776_v52, 0.0  ;;  %v7161_v2 = vrot.slane %v1497_v61, 1  ;;  %v704_v16 = vadd.f32 %v6935_v55, %v703_v59  ;;  %v7174_v52 = vpop.permute.xlu1 %1001  ;;  %v9368_v61 = vrot.slane %v7169_v41, 3  ;;  %v7185_v59 = vpop.permute.xlu0 %1011  ;;  %v6267_v6 = vld [vmem:[%s9353_s3 + $0x188] sm:$0xff] }
  0xee   : > { %3391 = vmatpush.bf16.msrb.mxu0 %v6269_v38  ;;  %v3673_v38 = vshll.u32 %v7069_v10, 16  ;;  %v3935_v45 = vpack.c.b16 %v3229_v36, %v3934_v62 }
  0xef   : > { %v1111_v20 = vmul.f32 %v1057_v3, %v824_v5  ;;  %742 = vmatmul.bf16.gmra.mxu0 %v6151_v22  ;;  %v1500_v44 = vsel %vm1360_vm0, %v1495_v15, %v7161_v2  ;;  %v9369_v3 = vrot.slane %v7163_v14, 2  ;;  %v6268_v22 = vld [vmem:[%s9353_s3 + $0x190] sm:$0xff]  ;;  %v7207_v1 = vsel %vm3936_vm2, %v3964_v42, %v9368_v61 }
  0xf0   : > { %1663 = vmatmul.bf16.gmra.mxu3 %v1500_v44  ;;  %v795_v44 = vmax.f32 %v704_v16, 0.0  ;;  %9409 = vst [vmem:[#allocation8_spill] sm:$0xff] %v7207_v1  ;;  %v3661_v42 = vshrl.u32 %v7060_v12, 16 }
  0xf1   : > { %v6409_v28 = vpack.c.bf16 %v1111_v20, %v1110_v25  ;;  %v7194_v25 = vsel %vm2898_vm1, %v2928_v35, %v9369_v3  ;;  %v3670_v20 = vshrl.u32 %v7069_v10, 16  ;;  %v1381_v35 = vshrl.u32 %v7111_v26, 16  ;;  %v3137_v10 = vld [vmem:[#allocation2 + $0x10] sm:$0xc] }
  0xf2   : > { %v778_v29 = vpop.f32.mrf.mxu3  ;;  %9408 = vst [vmem:[#allocation7_spill] sm:$0xff] %v7194_v25  ;;  %3392 = vmatpush.bf16.msrb.mxu0 %v6268_v22  ;;  %v3228_v26 = vunpack.c.l.b16 %v3137_v10  ;;  %v6230_v10 = vld [vmem:[%s9353_s3 + $0xe8] sm:$0xff] }
  0xf3   : > { %6437 = vst [vmem:[#allocation2 + $0x90] sm:$0xff] %v6409_v28   ;;  %v779_v22 = vadd.f32 %v6935_v55, %v778_v29  ;;  %v1383_v61 = vor.u32 %v1381_v35, %v7128_v17  ;;  %v3672_v17 = vrot.slane %v3670_v20, 2  ;;  %2351 = vmatpush.bf16.msrb.mxu1 %v6230_v10 }
  0xf4   : > { %v705_v5 = vpop.f32.mrf.mxu0  ;;  %v7187_v15 = vld [vmem:[#allocation2 + $0x18] sm:$0xff] }
  0xf5   : > { %v706_v28 = vadd.f32 %v6935_v55, %v705_v5  ;;  %v7200_v32 = vld [vmem:[#allocation2 + $0x18] sm:$0xff]  ;;  %v1385_v33 = vshll.u32 %v7187_v15, 16  ;;  %v9371_v16 = vrot.slane %v7187_v15, 1  ;;  %1763 = vmatmul.bf16.gmra.mxu2 %v7187_v15  ;;  %v7241_v20 = vpop.permute.xlu1 %1016 }
  0xf6   : > { %v7221_v51 = vld [vmem:[#allocation2 + $0x18] sm:$0xff]  ;;  %3393 = vmatpush.bf16.msrb.mxu0 %v6267_v6  ;;  %v6238_v6 = vld [vmem:[%s9353_s3 + $0x128] sm:$0xff] }
  0xf7   : > { %v796_v5 = vmax.f32 %v706_v28, 0.0  ;;  %v7219_v3 = vrot.slane %v1385_v33, 1  ;;  %v7228_v29 = vsel %vm1860_vm3, %v1864_v31, %v9371_v16  ;;  %v1082_v28 = vmul.f32 %v6857_v27, %v795_v44  ;;  %v6152_v27 = vld [vmem:[%s6667_s23 + $0x68] sm:$0xff]  ;;  %2744 = vmatpush.bf16.msrb.mxu2 %v6238_v6 }
  0xf8   : > { %v9373_v33 = vrot.slane %v7200_v32, 2  ;;  %v3675_v31 = vrot.slane %v3673_v38, 3  ;;  %v825_v16 = vmax.f32 %v779_v22, 0.0 }
  0xf9   : > { %v1083_v1 = vmul.f32 %v6867_v30, %v796_v5  ;;  %v1388_v50 = vsel %vm1360_vm0, %v1383_v61, %v7219_v3  ;;  %v6266_v30 = vld [vmem:[%s9353_s3 + $0x180] sm:$0xff]  ;;  %v9410_v61 = vrot.slane %v7114_v54, 2  ;;  %v1062_v54 = vpop.permute.xlu2 %1061 }
  0xfa   : > { %v780_v35 = vpop.f32.mrf.mxu3  ;;  %v1249_v25 = vld [vmem:[#allocation2 + $0x90] sm:$0x1]  ;;  %1593 = vmatmul.bf16.gmra.mxu1 %v1388_v50  ;;  %v3666_v50 = vrot.slane %v3664_v60, 3  ;;  %3394 = vmatpush.bf16.msrb.mxu0 %v6266_v30  ;;  %v7267_v38 = vor.u32 %v3675_v31, %v3672_v17  ;;  %v9413_v30 = vrot.slane %v7221_v51, 3 }
  0xfb   : > { %v6339_v7 = vpack.c.bf16 %v1083_v1, %v1082_v28  ;;  %v781_v57 = vadd.f32 %v6935_v55, %v780_v35  ;;  %v1340_v44 = vunpack.c.l.b16 %v1249_v25  ;;  %v7248_v62 = vsel %vm2898_vm1, %v9410_v61, %v9373_v33  ;;  %v1067_v28 = vpop.permute.xlu0 %1066  ;;  %v7265_v33 = vld [vmem:[#allocation2 + $0x90] sm:$0xff] }
  0xfc   : > { %v708_v5 = vpop.f32.mrf.mxu0  ;;  %9411 = vst [vmem:[#allocation9_spill] sm:$0xff] %v7248_v62  ;;  %v3663_v1 = vrot.slane %v3661_v42, 2  ;;  %v1501_v35 = vshrl.u32 %v7146_v48, 16  ;;  %v7260_v61 = vpack.c.b16 %v3229_v36, %v3228_v26  ;;  %v7262_v42 = vld [vmem:[#allocation2 + $0x90] sm:$0xff] }
  0xfd   : > { %6423 = vst [vmem:[#allocation2 + $0x20] sm:$0xff] %v6339_v7   ;;  %v826_v25 = vmax.f32 %v781_v57, 0.0  ;;  %v7251_v22 = vpack.c.b16 %v1340_v44, %v1340_v44  ;;  %v3937_v57 = vrot.slane %v3935_v45, 3  ;;  %v1112_v7 = vmul.f32 %v1062_v54, %v825_v16 }
  0xfe   : > { %v7274_v36 = vor.u32 %v3666_v50, %v3663_v1  ;;  %v709_v16 = vadd.f32 %v6935_v55, %v708_v5  ;;  %v1503_v26 = vor.u32 %v1501_v35, %v7161_v2  ;;  %v3545_v6 = vshrl.u32 %v7260_v61, 16  ;;  %v6207_v35 = vld [vmem:[%s9353_s3 + $0xb8] sm:$0xff] }
  0xff   : > { %9412 = vst [vmem:[#allocation10_spill] sm:$0xff] %v7251_v22  ;;  %v1113_v60 = vmul.f32 %v1067_v28, %v826_v25  ;;  %747 = vmatmul.bf16.gmra.mxu0 %v6152_v27  ;;  %v1505_v44 = vshll.u32 %v7251_v22, 16  ;;  %v7272_v62 = vsel %vm3936_vm2, %v3937_v57, %v9413_v30  ;;  %v3548_v17 = vshll.u32 %v7260_v61, 16  ;;  %1964 = vmatpush.bf16.msrb.mxu3 %v6207_v35 }
 0x100   : > { %9414 = vst [vmem:[#allocation11_spill] sm:$0xff] %v7272_v62  ;;  %v9374_v31 = vrot.slane %v7262_v42, 2  ;;  %v7286_v1 = vsel %vm3543_vm4, %v7274_v36, %v7267_v38  ;;  %v9375_v2 = vrot.slane %v7265_v33, 3  ;;  %v1389_v28 = vshrl.u32 %v7187_v15, 16 }
 0x101   : > { %v6414_v45 = vpack.c.bf16 %v1113_v60, %v1112_v7  ;;  %v1507_v27 = vrot.slane %v1505_v44, 1  ;;  %9415 = vst [vmem:[#allocation12_spill] sm:$0xff] %v7286_v1  ;;  %v3553_v57 = vshrl.u32 %v7221_v51, 16  ;;  %v3556_v7 = vshll.u32 %v7221_v51, 16 }
 0x102   : > { %v783_v25 = vpop.f32.mrf.mxu3  ;;  %v9416_v60 = vrot.slane %v7163_v14, 2  ;;  %v797_v30 = vmax.f32 %v709_v16, 0.0  ;;  %v9420_v35 = vrot.slane %v7187_v15, 1  ;;  %v3679_v15 = vshrl.u32 %v7169_v41, 16 }
 0x103   : > { %6438 = vst [vmem:[#allocation2 + $0x98] sm:$0xff] %v6414_v45   ;;  %v784_v10 = vadd.f32 %v6935_v55, %v783_v25  ;;  %v1508_v54 = vsel %vm1360_vm0, %v1503_v26, %v1507_v27  ;;  %v9418_v27 = vrot.slane %v7169_v41, 3 }
 0x104   : > { %v710_v5 = vpop.f32.mrf.mxu0  ;;  %1668 = vmatmul.bf16.gmra.mxu3 %v1508_v54  ;;  %v7289_v50 = vld [vmem:[#allocation2 + $0x20] sm:$0xff]  ;;  %v7302_v44 = vsel %vm2898_vm1, %v9416_v60, %v9374_v31  ;;  %v1072_v54 = vpop.permute.xlu1 %1071  ;;  %v3547_v60 = vrot.slane %v3545_v6, 2  ;;  %v3550_v31 = vrot.slane %v3548_v17, 3 }
 0x105   : > { %9417 = vst [vmem:[#allocation13_spill] sm:$0xff] %v7302_v44  ;;  %v827_v45 = vmax.f32 %v784_v10, 0.0  ;;  %v711_v26 = vadd.f32 %v6935_v55, %v710_v5  ;;  %v7310_v25 = vsel %vm3936_vm2, %v9418_v27, %v9375_v2  ;;  %v1393_v1 = vshll.u32 %v7289_v50, 16  ;;  %v7314_v62 = vld [vmem:[#allocation2 + $0x20] sm:$0xff]  ;;  %1768 = vmatmul.bf16.gmra.mxu2 %v7289_v50  ;;  %v6206_v27 = vld [vmem:[%s9353_s3 + $0xb0] sm:$0xff] }
 0x106   : > { %9419 = vst [vmem:[#allocation14_spill] sm:$0xff] %v7310_v25  ;;  %v9377_v14 = vrot.slane %v7289_v50, 1  ;;  %v1391_v5 = vor.u32 %v1389_v28, %v7219_v3  ;;  %v7323_v2 = vld [vmem:[#allocation2 + $0x20] sm:$0xff]  ;;  %v1084_v3 = vmul.f32 %v6896_v40, %v797_v30  ;;  %1965 = vmatpush.bf16.msrb.mxu3 %v6206_v27  ;;  %v9380_v25 = vrot.slane %v7314_v62, 2 }
 0x107   : > { %v1114_v16 = vmul.f32 %v1072_v54, %v827_v45  ;;  %v798_v10 = vmax.f32 %v711_v26, 0.0  ;;  %v7318_v44 = vrot.slane %v1393_v1, 1  ;;  %v3555_v45 = vrot.slane %v3553_v57, 2  ;;  %v6153_v57 = vld [vmem:[%s6667_s23 + $0x70] sm:$0xff] }
 0x108   : > { %v7330_v6 = vsel %vm1860_vm3, %v9420_v35, %v9377_v14  ;;  %v3558_v26 = vrot.slane %v3556_v7, 3  ;;  %v3551_v14 = vor.u32 %v3550_v31, %v3547_v60  ;;  %v9421_v30 = vrot.slane %v7200_v32, 2 }
 0x109   : > { %v1155_v17 = vpack.c.bf16 %v1114_v16, %v1114_v16  ;;  %v1085_v1 = vmul.f32 %v6889_v37, %v798_v10  ;;  %v1396_v28 = vsel %vm1360_vm0, %v1391_v5, %v7318_v44  ;;  %v6205_v37 = vld [vmem:[%s9353_s3 + $0xa8] sm:$0xff]  ;;  %v9378_v10 = vrot.slane %v7323_v2, 3 }
 0x10a   : > { %v785_v54 = vpop.f32.mrf.mxu3  ;;  %v2484_v22 = vld [vmem:[#allocation2 + $0x98] sm:$0x3]  ;;  %1598 = vmatmul.bf16.gmra.mxu1 %v1396_v28  ;;  %v7347_v16 = vsel %vm2898_vm1, %v9421_v30, %v9380_v25  ;;  %v3559_v5 = vor.u32 %v3558_v26, %v3555_v45  ;;  %v3682_v27 = vshll.u32 %v7169_v41, 16  ;;  %1966 = vmatpush.bf16.msrb.mxu3 %v6205_v37  ;;  %v9425_v60 = vrot.slane %v7221_v51, 3  ;;  %v6204_v45 = vld [vmem:[%s9353_s3 + $0xa0] sm:$0xff] }
 0x10b   : > { %1196 = vst [vmem:[#allocation2 + $0xa0] sm:$0xf] %v1155_v17  ;;  %v6344_v35 = vpack.c.bf16 %v1085_v1, %v1084_v3  ;;  %v2503_v7 = vunpack.c.l.b16 %v2484_v22  ;;  %v7353_v31 = vld [vmem:[#allocation2 + $0x98] sm:$0xff]  ;;  %v3681_v17 = vrot.slane %v3679_v15, 2  ;;  %v3562_v41 = vshrl.u32 %v7323_v2, 16 }
 0x10c   : > { %v713_v40 = vpop.f32.mrf.mxu0  ;;  %9422 = vst [vmem:[#allocation15_spill] sm:$0xff] %v7347_v16  ;;  %v7360_v32 = vsel %vm3936_vm2, %v9425_v60, %v9378_v10  ;;  %v7363_v3 = vsel %vm3543_vm4, %v3551_v14, %v3559_v5  ;;  %v3565_v26 = vshll.u32 %v7323_v2, 16  ;;  %v3684_v28 = vrot.slane %v3682_v27, 3  ;;  %v6237_v14 = vld [vmem:[%s9353_s3 + $0x120] sm:$0xff]  ;;  %v6203_v27 = vld [vmem:[%s9353_s3 + $0x98] sm:$0xff] }
 0x10d   : > { %6424 = vst [vmem:[#allocation2 + $0x28] sm:$0xff] %v6344_v35   ;;  %v7351_v22 = vpack.c.b16 %v2503_v7, %v2503_v7  ;;  %v714_v54 = vadd.f32 %v6935_v55, %v713_v40  ;;  %v9428_v15 = vrot.slane %v7262_v42, 2  ;;  %v9379_v7 = vrot.slane %v7353_v31, 3  ;;  %2745 = vmatpush.bf16.msrb.mxu2 %v6237_v14 }
 0x10e   : > { %9424 = vst [vmem:[#allocation17_spill] sm:$0xff] %v7353_v31  ;;  %1967 = vmatpush.bf16.msrb.mxu3 %v6204_v45  ;;  %v3564_v37 = vrot.slane %v3562_v41, 2  ;;  %v3567_v30 = vrot.slane %v3565_v26, 3  ;;  %v1397_v26 = vshrl.u32 %v7289_v50, 16 }
 0x10f   : > { %9423 = vst [vmem:[#allocation16_spill] sm:$0xff] %v7351_v22  ;;  %752 = vmatmul.bf16.gmra.mxu0 %v6153_v57  ;;  %v2934_v1 = vrot.slane %v7351_v22, 2  ;;  %v3685_v57 = vor.u32 %v3684_v28, %v3681_v17  ;;  %v9431_v17 = vrot.slane %v7265_v33, 3  ;;  %v799_v45 = vmax.f32 %v714_v54, 0.0 }
 0x110   : > { %9426 = vst [vmem:[#allocation18_spill] sm:$0xff] %v7360_v32  ;;  %v1399_v54 = vor.u32 %v1397_v26, %v7318_v44  ;;  %v3284_v44 = vrot.slane %v7260_v61, 2  ;;  %v9382_v26 = vrot.slane %v7221_v51, 2  ;;  %v6201_v61 = vld [vmem:[%s9353_s3 + $0x88] sm:$0xff] }
 0x111   : > { %9427 = vst [vmem:[#allocation19_spill] sm:$0xff] %v7363_v3  ;;  %v7378_v35 = vsel %vm2898_vm1, %v9428_v15, %v2934_v1  ;;  %v7389_v42 = vsel %vm3543_vm4, %v7267_v38, %v3685_v57  ;;  %v7396_v41 = vsel %vm3936_vm2, %v9431_v17, %v9379_v7  ;;  %v3688_v38 = vshrl.u32 %v7265_v33, 16  ;;  %v6202_v7 = vld [vmem:[%s9353_s3 + $0x90] sm:$0xff] }
 0x112   : > { %9429 = vst [vmem:[#allocation20_spill] sm:$0xff] %v7378_v35  ;;  %1968 = vmatpush.bf16.msrb.mxu3 %v6203_v27  ;;  %v3568_v17 = vor.u32 %v3567_v30, %v3564_v37  ;;  %v9433_v27 = vrot.slane %v7289_v50, 1 }
 0x113   : > { %9430 = vst [vmem:[#allocation21_spill] sm:$0xff] %v7389_v42  ;;  %v3690_v42 = vrot.slane %v3688_v38, 2 }
 0x114   : > { %v715_v60 = vpop.f32.mrf.mxu0  ;;  %1823 = vmatmul.bf16.vlgmr.msra.gmra.mxu3 %v7024_v13  ;;  %v7382_v40 = vld [vmem:[#allocation2 + $0x28] sm:$0xff]  ;;  %9432 = vst [vmem:[#allocation22_spill] sm:$0xff] %v7396_v41  ;;  %v1086_v41 = vmul.f32 %v6894_v39, %v799_v45  ;;  %v3697_v39 = vshrl.u32 %v7353_v31, 16  ;;  %v9435_v45 = vrot.slane %v7314_v62, 2  ;;  %v3286_v62 = vsel %vm2898_vm1, %v3284_v44, %v9382_v26 }
 0x115   : > { %v716_v13 = vadd.f32 %v6935_v55, %v715_v60  ;;  %v1401_v1 = vshll.u32 %v7382_v40, 16  ;;  %v9381_v28 = vrot.slane %v7382_v40, 1  ;;  %v7402_v14 = vld [vmem:[#allocation2 + $0x28] sm:$0xff]  ;;  %1773 = vmatmul.bf16.gmra.mxu2 %v7382_v40  ;;  %v3287_v26 = vrot.slane %v7323_v2, 2 }
 0x116   : > { %v7406_v10 = vld [vmem:[#allocation2 + $0x28] sm:$0xff]  ;;  %1969 = vmatpush.bf16.msrb.mxu3 %v6202_v7 }
 0x117   : > { %v800_v15 = vmax.f32 %v716_v13, 0.0  ;;  %v1403_v60 = vrot.slane %v1401_v1, 1  ;;  %v7417_v25 = vsel %vm1860_vm3, %v9433_v27, %v9381_v28  ;;  %v3691_v13 = vshll.u32 %v7265_v33, 16  ;;  %v6200_v28 = vld [vmem:[%s9353_s3 + $0x80] sm:$0xff] }
 0x118   : > { %v2906_v1 = vrot.slane %v7402_v14, 2  ;;  %v3942_v27 = vrot.slane %v7406_v10, 3  ;;  %v7428_v33 = vsel %vm3543_vm4, %v3559_v5, %v3568_v17  ;;  %v3574_v14 = vshll.u32 %v7406_v10, 16  ;;  %v6229_v5 = vld [vmem:[%s9353_s3 + $0xe0] sm:$0xff] }
 0x119   : > { %v1087_v37 = vmul.f32 %v6930_v53, %v800_v15  ;;  %v1404_v30 = vsel %vm1360_vm0, %v1399_v54, %v1403_v60  ;;  %9434 = vst [vmem:[#allocation23_spill] sm:$0xff] %v7428_v33  ;;  %v3693_v38 = vrot.slane %v3691_v13, 3  ;;  %v9437_v15 = vrot.slane %v7323_v2, 3  ;;  %2352 = vmatpush.bf16.msrb.mxu1 %v6229_v5 }
 0x11a   : > { %1603 = vmatmul.bf16.gmra.mxu1 %v1404_v30  ;;  %v7437_v7 = vsel %vm2898_vm1, %v9435_v45, %v2906_v1  ;;  %1970 = vmatpush.bf16.msrb.mxu3 %v6201_v61  ;;  %v3576_v30 = vrot.slane %v3574_v14, 3  ;;  %v3699_v13 = vrot.slane %v3697_v39, 2  ;;  %v9446_v2 = vrot.slane %v7221_v51, 2 }
 0x11b   : > { %v6349_v50 = vpack.c.bf16 %v1087_v37, %v1086_v41  ;;  %9436 = vst [vmem:[#allocation24_spill] sm:$0xff] %v7437_v7  ;;  %v3571_v41 = vshrl.u32 %v7406_v10, 16  ;;  %v7447_v54 = vsel %vm3936_vm2, %v9437_v15, %v3942_v27  ;;  %v3694_v45 = vor.u32 %v3693_v38, %v3690_v42 }
 0x11c   : > { %v718_v53 = vpop.f32.mrf.mxu0  ;;  %9438 = vst [vmem:[#allocation25_spill] sm:$0xff] %v7447_v54 }
 0x11d   : > { %6425 = vst [vmem:[#allocation2 + $0x30] sm:$0xff] %v6349_v50   ;;  %v3573_v37 = vrot.slane %v3571_v41, 2  ;;  %v3700_v50 = vshll.u32 %v7353_v31, 16  ;;  %v7457_v15 = vsel %vm3543_vm4, %v3685_v57, %v3694_v45  ;;  %v719_v33 = vadd.f32 %v6935_v55, %v718_v53  ;;  %v6440_v31 = vld [vmem:[#allocation2] sm:$0xe] }
 0x11e   : > { %9439 = vst [vmem:[#allocation26_spill] sm:$0xff] %v7457_v15  ;;  %1971 = vmatpush.bf16.msrb.mxu3 %v6200_v28  ;;  %v1405_v28 = vshrl.u32 %v7382_v40, 16 }
 0x11f   : > { %3395 = vmatmul.bf16.vlgmr.msrb.gmra.mxu0 %v3286_v62  ;;  %v3577_v35 = vor.u32 %v3576_v30, %v3573_v37  ;;  %v3702_v44 = vrot.slane %v3700_v50, 3  ;;  %v801_v38 = vmax.f32 %v719_v33, 0.0 }
 0x120   : > { %v1407_v30 = vor.u32 %v1405_v28, %v1403_v60 }
 0x121   : > { %v7461_v61 = vsel %vm3543_vm4, %v3568_v17, %v3577_v35  ;;  %v7463_v42 = vor.u32 %v3702_v44, %v3699_v13  ;;  %v9443_v13 = vrot.slane %v7382_v40, 1 }
 0x122   : > { %9440 = vst [vmem:[#allocation27_spill] sm:$0xff] %v7461_v61 }
 0x123   : > { %9441 = vst [vmem:[#allocation28_spill] sm:$0xff] %v7463_v42  ;;  %v7471_v57 = vsel %vm3543_vm4, %v3694_v45, %v7463_v42  ;;  %v1088_v45 = vmul.f32 %v6913_v46, %v801_v38 }
 0x124   : > { %v720_v39 = vpop.f32.mrf.mxu0  ;;  %1828 = vmatmul.bf16.gmra.mxu3 %v7050_v56  ;;  %v6172_v41 = vld [vmem:[#allocation2 + $0x30] sm:$0xff]  ;;  %9442 = vst [vmem:[#allocation29_spill] sm:$0xff] %v7471_v57  ;;  %v6439_v57 = vld [vmem:[#allocation2] sm:$0xf0] }
 0x125   : > { %v7466_v14 = vld [vmem:[#allocation2 + $0x30] sm:$0xff]  ;;  %v721_v5 = vadd.f32 %v6935_v55, %v720_v39  ;;  %v1409_v53 = vshll.u32 %v6172_v41, 16  ;;  %v1872_v62 = vrot.slane %v6172_v41, 1  ;;  %1778 = vmatmul.bf16.gmra.mxu2 %v6172_v41 }
 0x126   : > { %v7474_v17 = vld [vmem:[#allocation2 + $0x30] sm:$0xff]  ;;  %v2908_v50 = vrot.slane %v7466_v14, 2 }
 0x127   : > { %v802_v37 = vmax.f32 %v721_v5, 0.0  ;;  %v1411_v56 = vrot.slane %v1409_v53, 1  ;;  %v7479_v33 = vsel %vm1860_vm3, %v9443_v13, %v1872_v62  ;;  %v3944_v60 = vrot.slane %v7474_v17, 3 }
 0x128   : > { %v7487_v5 = vsel %vm2898_vm1, %v2906_v1, %v2908_v50  ;;  %v3580_v40 = vshrl.u32 %v7474_v17, 16  ;;  %v3583_v53 = vshll.u32 %v7474_v17, 16  ;;  %v3288_v1 = vsel %vm2898_vm1, %v9446_v2, %v3287_v26 }
 0x129   : > { %v1089_v44 = vmul.f32 %v6915_v47, %v802_v37  ;;  %v1412_v39 = vsel %vm1360_vm0, %v1407_v30, %v1411_v56  ;;  %9444 = vst [vmem:[#allocation30_spill] sm:$0xff] %v7487_v5  ;;  %v7493_v46 = vsel %vm3936_vm2, %v3942_v27, %v3944_v60 }
 0x12a   : > { %1608 = vmatmul.bf16.gmra.mxu1 %v1412_v39  ;;  %9445 = vst [vmem:[#allocation31_spill] sm:$0xff] %v7493_v46  ;;  %v3582_v47 = vrot.slane %v3580_v40, 2  ;;  %v3585_v38 = vrot.slane %v3583_v53, 3  ;;  %v7511_v40 = vld [vmem:[%s9352_s2] ss:$0 sm:$0xff]  ;;  %v1413_v53 = vshrl.u32 %v6172_v41, 16 }
 0x12b   : > { %v6354_v28 = vpack.c.bf16 %v1089_v44, %v1088_v45  ;;  %v6236_v45 = vld [vmem:[%s9353_s3 + $0x118] sm:$0xff]  ;;  %v3289_v41 = vrot.slane %v7406_v10, 2 }
 0x12c   : > { %v723_v13 = vpop.f32.mrf.mxu0  ;;  %v3586_v37 = vor.u32 %v3585_v38, %v3582_v47  ;;  %2746 = vmatpush.bf16.msrb.mxu2 %v6236_v45  ;;  %v1415_v2 = vor.u32 %v1413_v53, %v1411_v56  ;;  %v6228_v10 = vld [vmem:[%s9353_s3 + $0xd8] sm:$0xff] }
 0x12d   : > { %6426 = vst [vmem:[#allocation2 + $0x38] sm:$0xff] %v6354_v28   ;;  %v724_v30 = vadd.f32 %v6935_v55, %v723_v13  ;;  %2353 = vmatpush.bf16.msrb.mxu1 %v6228_v10 }
 0x12e   : > { %v7503_v44 = vsel %vm3543_vm4, %v3577_v35, %v3586_v37 }
 0x12f   : > { %3400 = vmatmul.bf16.gmra.mxu0 %v3288_v1  ;;  %9447 = vst [vmem:[#allocation32_spill] sm:$0xff] %v7503_v44  ;;  %v803_v51 = vmax.f32 %v724_v30, 0.0 }
 0x131   : > { %v1090_v45 = vmul.f32 %v6959_v9, %v803_v51  ;;  %v6441_v51 = vor.u32 %v6440_v31, %v6439_v57 }
 0x134   : > { %v725_v27 = vpop.f32.mrf.mxu0  ;;  %1833 = vmatmul.bf16.gmra.mxu3 %v7146_v48  ;;  %v6173_v39 = vld [vmem:[#allocation2 + $0x38] sm:$0xff] }
 0x135   : > { %v7506_v28 = vld [vmem:[#allocation2 + $0x38] sm:$0xff]  ;;  %v726_v55 = vadd.f32 %v7511_v40, %v725_v27  ;;  %v1417_v13 = vshll.u32 %v6173_v39, 16  ;;  %v1874_v35 = vrot.slane %v6173_v39, 1  ;;  %1783 = vmatmul.bf16.gmra.mxu2 %v6173_v39  ;;  %v1421_v10 = vshrl.u32 %v6173_v39, 16 }
 0x136   : > { %v7514_v47 = vld [vmem:[#allocation2 + $0x38] sm:$0xff]  ;;  %v2910_v30 = vrot.slane %v7506_v28, 2 }
 0x137   : > { %v804_v38 = vmax.f32 %v726_v55, 0.0  ;;  %v1419_v48 = vrot.slane %v1417_v13, 1  ;;  %v7517_v1 = vsel %vm1860_vm3, %v1872_v62, %v1874_v35  ;;  %v3946_v56 = vrot.slane %v7514_v47, 3 }
 0x138   : > { %v7525_v55 = vsel %vm2898_vm1, %v2908_v50, %v2910_v30  ;;  %v3589_v62 = vshrl.u32 %v7514_v47, 16  ;;  %v3592_v13 = vshll.u32 %v7514_v47, 16 }
 0x139   : > { %v1091_v42 = vmul.f32 %v6941_v58, %v804_v38  ;;  %v1420_v27 = vsel %vm1360_vm0, %v1415_v2, %v1419_v48  ;;  %9448 = vst [vmem:[#allocation33_spill] sm:$0xff] %v7525_v55  ;;  %v7531_v58 = vsel %vm3936_vm2, %v3944_v60, %v3946_v56  ;;  %v3290_v2 = vsel %vm2898_vm1, %v3287_v26, %v3289_v41 }
 0x13a   : > { %1613 = vmatmul.bf16.gmra.mxu1 %v1420_v27  ;;  %9449 = vst [vmem:[#allocation34_spill] sm:$0xff] %v7531_v58  ;;  %v3591_v50 = vrot.slane %v3589_v62, 2  ;;  %v3594_v38 = vrot.slane %v3592_v13, 3  ;;  %v1861_v27 = vrot.slane %v6441_v51, 1  ;;  %v9451_v60 = vrot.slane %v7034_v23, 1 }
 0x13b   : > { %v6359_v53 = vpack.c.bf16 %v1091_v42, %v1090_v45  ;;  %v3293_v58 = vrot.slane %v7514_v47, 2 }
 0x13c   : > { %v728_v9 = vpop.f32.mrf.mxu0  ;;  %v3595_v42 = vor.u32 %v3594_v38, %v3591_v50  ;;  %v1863_v31 = vsel %vm1860_vm3, %v1861_v27, %v9451_v60 }
 0x13d   : > { %6427 = vst [vmem:[#allocation2 + $0x40] sm:$0xff] %v6359_v53   ;;  %v729_v45 = vadd.f32 %v7511_v40, %v728_v9 }
 0x13e   : > { %v7539_v15 = vsel %vm3543_vm4, %v3586_v37, %v3595_v42 }
 0x13f   : > { %3405 = vmatmul.bf16.gmra.mxu0 %v3290_v2  ;;  %9450 = vst [vmem:[#allocation35_spill] sm:$0xff] %v7539_v15  ;;  %v805_v13 = vmax.f32 %v729_v45, 0.0  ;;  %v1423_v2 = vor.u32 %v1421_v10, %v1419_v48 }
 0x140   : > { %v1749_v37 = vpop.f32.mrf.mxu2 }
 0x144   : > { %v730_v57 = vpop.f32.mrf.mxu0  ;;  %1972 = vmatmul.bf16.vlgmr.msrb.gmra.mxu3 %v1863_v31  ;;  %v6174_v53 = vld [vmem:[#allocation2 + $0x40] sm:$0xff]  ;;  %v1092_v31 = vmul.f32 %v6955_v0, %v805_v13 }
 0x145   : > { %v7544_v62 = vld [vmem:[#allocation2 + $0x40] sm:$0xff]  ;;  %v731_v26 = vadd.f32 %v7511_v40, %v730_v57  ;;  %v1425_v50 = vshll.u32 %v6174_v53, 16  ;;  %v1876_v9 = vrot.slane %v6174_v53, 1  ;;  %1788 = vmatmul.bf16.gmra.mxu2 %v6174_v53  ;;  %v3291_v57 = vrot.slane %v7474_v17, 2 }
 0x146   : > { %v7547_v38 = vld [vmem:[#allocation2 + $0x40] sm:$0xff]  ;;  %v2912_v60 = vrot.slane %v7544_v62, 2 }
 0x147   : > { %v806_v51 = vmax.f32 %v731_v26, 0.0  ;;  %v1427_v23 = vrot.slane %v1425_v50, 1  ;;  %v7550_v27 = vsel %vm1860_vm3, %v1874_v35, %v1876_v9  ;;  %v3948_v26 = vrot.slane %v7547_v38, 3 }
 0x148   : > { %v7558_v15 = vsel %vm2898_vm1, %v2910_v30, %v2912_v60  ;;  %v3598_v35 = vshrl.u32 %v7547_v38, 16  ;;  %v3601_v10 = vshll.u32 %v7547_v38, 16  ;;  %v3292_v17 = vsel %vm2898_vm1, %v3289_v41, %v3291_v57 }
 0x149   : > { %v1093_v45 = vmul.f32 %v6985_v43, %v806_v51  ;;  %v1428_v39 = vsel %vm1360_vm0, %v1423_v2, %v1427_v23  ;;  %9452 = vst [vmem:[#allocation36_spill] sm:$0xff] %v7558_v15  ;;  %v7564_v0 = vsel %vm3936_vm2, %v3946_v56, %v3948_v26  ;;  %v6235_v2 = vld [vmem:[%s9353_s3 + $0x110] sm:$0xff]  ;;  %v3295_v54 = vrot.slane %v7547_v38, 2 }
 0x14a   : > { %1618 = vmatmul.bf16.gmra.mxu1 %v1428_v39  ;;  %9453 = vst [vmem:[#allocation37_spill] sm:$0xff] %v7564_v0  ;;  %v3600_v43 = vrot.slane %v3598_v35, 2  ;;  %v3603_v13 = vrot.slane %v3601_v10, 3  ;;  %v6227_v56 = vld [vmem:[%s9353_s3 + $0xd0] sm:$0xff]  ;;  %2747 = vmatpush.bf16.msrb.mxu2 %v6235_v2 }
 0x14b   : > { %v6364_v48 = vpack.c.bf16 %v1093_v45, %v1092_v31  ;;  %v1751_v45 = vpop.f32.mrf.mxu2  ;;  %2354 = vmatpush.bf16.msrb.mxu1 %v6227_v56  ;;  %v3296_v38 = vsel %vm2898_vm1, %v3293_v58, %v3295_v54 }
 0x14c   : > { %v733_v50 = vpop.f32.mrf.mxu0  ;;  %v3604_v30 = vor.u32 %v3603_v13, %v3600_v43 }
 0x14d   : > { %6428 = vst [vmem:[#allocation2 + $0x48] sm:$0xff] %v6364_v48   ;;  %v734_v51 = vadd.f32 %v7511_v40, %v733_v50  ;;  %v1429_v50 = vshrl.u32 %v6174_v53, 16 }
 0x14e   : > { %v7572_v31 = vsel %vm3543_vm4, %v3595_v42, %v3604_v30 }
 0x14f   : > { %3410 = vmatmul.bf16.gmra.mxu0 %v3292_v17  ;;  %9454 = vst [vmem:[#allocation38_spill] sm:$0xff] %v7572_v31  ;;  %v807_v35 = vmax.f32 %v734_v51, 0.0  ;;  %v1431_v0 = vor.u32 %v1429_v50, %v1427_v23 }
 0x151   : > { %v1094_v56 = vmul.f32 %v7018_v21, %v807_v35 }
 0x154   : > { %v735_v39 = vpop.f32.mrf.mxu0  ;;  %1977 = vmatmul.bf16.gmra.mxu3 %v7135_v19  ;;  %v6175_v41 = vld [vmem:[#allocation2 + $0x48] sm:$0xff] }
 0x155   : > { %v7578_v48 = vld [vmem:[#allocation2 + $0x48] sm:$0xff]  ;;  %v736_v10 = vadd.f32 %v7511_v40, %v735_v39  ;;  %v1433_v43 = vshll.u32 %v6175_v41, 16  ;;  %v1878_v42 = vrot.slane %v6175_v41, 1  ;;  %1793 = vmatmul.bf16.gmra.mxu2 %v6175_v41 }
 0x156   : > { %v7581_v17 = vld [vmem:[#allocation2 + $0x48] sm:$0xff]  ;;  %v2914_v19 = vrot.slane %v7578_v48, 2 }
 0x157   : > { %v808_v13 = vmax.f32 %v736_v10, 0.0  ;;  %v1584_v31 = vpop.f32.mrf.mxu1  ;;  %v1435_v2 = vrot.slane %v1433_v43, 1  ;;  %v7584_v44 = vsel %vm1860_vm3, %v1876_v9, %v1878_v42  ;;  %v3950_v9 = vrot.slane %v7581_v17, 3 }
 0x158   : > { %v7589_v39 = vadd.f32 %v1749_v37, %v1584_v31  ;;  %v1754_v53 = vpop.f32.mrf.mxu2  ;;  %v7594_v61 = vsel %vm2898_vm1, %v2912_v60, %v2914_v19  ;;  %v3607_v50 = vshrl.u32 %v7581_v17, 16  ;;  %v3610_v21 = vshll.u32 %v7581_v17, 16 }
 0x159   : > { %v1095_v51 = vmul.f32 %v7032_v34, %v808_v13  ;;  %v1436_v10 = vsel %vm1360_vm0, %v1431_v0, %v1435_v2  ;;  %9455 = vst [vmem:[#allocation39_spill] sm:$0xff] %v7594_v61  ;;  %v7600_v34 = vsel %vm3936_vm2, %v3948_v26, %v3950_v9  ;;  %v3294_v0 = vsel %vm2898_vm1, %v3291_v57, %v3293_v58 }
 0x15a   : > { %1623 = vmatmul.bf16.gmra.mxu1 %v1436_v10  ;;  %9456 = vst [vmem:[#allocation40_spill] sm:$0xff] %v7600_v34  ;;  %v3609_v37 = vrot.slane %v3607_v50, 2  ;;  %v3612_v47 = vrot.slane %v3610_v21, 3  ;;  %v3297_v61 = vrot.slane %v7581_v17, 2 }
 0x15b   : > { %v6369_v23 = vpack.c.bf16 %v1095_v51, %v1094_v56 }
 0x15c   : > { %v738_v43 = vpop.f32.mrf.mxu0  ;;  %v3613_v31 = vor.u32 %v3612_v47, %v3609_v37  ;;  %v1437_v37 = vshrl.u32 %v6175_v41, 16 }
 0x15d   : > { %6429 = vst [vmem:[#allocation2 + $0x50] sm:$0xff] %v6369_v23   ;;  %v739_v35 = vadd.f32 %v7511_v40, %v738_v43 }
 0x15e   : > { %v7607_v51 = vsel %vm3543_vm4, %v3604_v30, %v3613_v31  ;;  %v1439_v47 = vor.u32 %v1437_v37, %v1435_v2 }
 0x15f   : > { %3415 = vmatmul.bf16.gmra.mxu0 %v3294_v0  ;;  %v1586_v60 = vpop.f32.mrf.mxu1  ;;  %9457 = vst [vmem:[#allocation41_spill] sm:$0xff] %v7607_v51  ;;  %v809_v50 = vmax.f32 %v739_v35, 0.0 }
 0x160   : > { %v7604_v13 = vadd.f32 %v1751_v45, %v1586_v60  ;;  %v1756_v56 = vpop.f32.mrf.mxu2 }
 0x163   : > { %v7610_v26 = vpop.f32.mrf.mxu3 }
 0x164   : > { %v740_v10 = vpop.f32.mrf.mxu0  ;;  %1982 = vmatmul.bf16.gmra.mxu3 %v7228_v29  ;;  %v7612_v23 = vld [vmem:[#allocation2 + $0x50] sm:$0xff] }
 0x165   : > { %v7614_v57 = vld [vmem:[#allocation2 + $0x50] sm:$0xff]  ;;  %v741_v21 = vadd.f32 %v7511_v40, %v740_v10  ;;  %v1441_v45 = vshll.u32 %v7612_v23, 16  ;;  %v1880_v43 = vrot.slane %v7612_v23, 1  ;;  %1798 = vmatmul.bf16.gmra.mxu2 %v7612_v23  ;;  %v1096_v10 = vmul.f32 %v7071_v11, %v809_v50 }
 0x166   : > { %v7620_v30 = vld [vmem:[#allocation2 + $0x50] sm:$0xff]  ;;  %v2916_v35 = vrot.slane %v7614_v57, 2 }
 0x167   : > { %v810_v0 = vmax.f32 %v741_v21, 0.0  ;;  %v1589_v29 = vpop.f32.mrf.mxu1  ;;  %v1443_v60 = vrot.slane %v1441_v45, 1  ;;  %v7623_v51 = vsel %vm1860_vm3, %v1878_v42, %v1880_v43  ;;  %v3952_v42 = vrot.slane %v7620_v30, 3 }
 0x168   : > { %v7628_v34 = vadd.f32 %v1754_v53, %v1589_v29  ;;  %v1759_v46 = vpop.f32.mrf.mxu2  ;;  %v7633_v3 = vsel %vm2898_vm1, %v2914_v19, %v2916_v35  ;;  %v3616_v37 = vshrl.u32 %v7620_v30, 16  ;;  %v3299_v55 = vrot.slane %v7620_v30, 2 }
 0x169   : > { %v1097_v41 = vmul.f32 %v7076_v18, %v810_v0  ;;  %v1444_v21 = vsel %vm1360_vm0, %v1439_v47, %v1443_v60  ;;  %9458 = vst [vmem:[#allocation42_spill] sm:$0xff] %v7633_v3  ;;  %v3619_v18 = vshll.u32 %v7620_v30, 16  ;;  %v7641_v53 = vsel %vm3936_vm2, %v3950_v9, %v3952_v42  ;;  %v6226_v9 = vld [vmem:[%s9353_s3 + $0xc8] sm:$0xff] }
 0x16a   : > { %1628 = vmatmul.bf16.gmra.mxu1 %v1444_v21  ;;  %9459 = vst [vmem:[#allocation43_spill] sm:$0xff] %v7641_v53  ;;  %v3618_v50 = vrot.slane %v3616_v37, 2 }
 0x16b   : > { %v6374_v2 = vpack.c.bf16 %v1097_v41, %v1096_v10  ;;  %v7637_v11 = vpop.f32.mrf.mxu3  ;;  %v3621_v19 = vrot.slane %v3619_v18, 3  ;;  %v6234_v41 = vld [vmem:[%s9353_s3 + $0x108] sm:$0xff]  ;;  %2355 = vmatpush.bf16.msrb.mxu1 %v6226_v9 }
 0x16c   : > { %v743_v45 = vpop.f32.mrf.mxu0  ;;  %2748 = vmatpush.bf16.msrb.mxu2 %v6234_v41 }
 0x16d   : > { %6430 = vst [vmem:[#allocation2 + $0x58] sm:$0xff] %v6374_v2   ;;  %v3622_v29 = vor.u32 %v3621_v19, %v3618_v50  ;;  %v744_v47 = vadd.f32 %v7511_v40, %v743_v45 }
 0x16f   : > { %3420 = vmatmul.bf16.gmra.mxu0 %v3296_v38  ;;  %v1591_v0 = vpop.f32.mrf.mxu1  ;;  %v7654_v2 = vsel %vm3543_vm4, %v3613_v31, %v3622_v29  ;;  %v811_v45 = vmax.f32 %v744_v47, 0.0  ;;  %v1445_v38 = vshrl.u32 %v7612_v23, 16 }
 0x170   : > { %v7645_v10 = vadd.f32 %v1756_v56, %v1591_v0  ;;  %v1761_v21 = vpop.f32.mrf.mxu2  ;;  %9460 = vst [vmem:[#allocation44_spill] sm:$0xff] %v7654_v2 }
 0x171   : > { %v1447_v9 = vor.u32 %v1445_v38, %v1443_v60 }
 0x173   : > { %v7660_v50 = vpop.f32.mrf.mxu3 }
 0x174   : > { %v745_v58 = vpop.f32.mrf.mxu0  ;;  %1987 = vmatmul.bf16.gmra.mxu3 %v7330_v6  ;;  %v6177_v37 = vld [vmem:[#allocation2 + $0x58] sm:$0xff] }
 0x175   : > { %v7657_v56 = vld [vmem:[#allocation2 + $0x58] sm:$0xff]  ;;  %v746_v18 = vadd.f32 %v7511_v40, %v745_v58  ;;  %v1449_v19 = vshll.u32 %v6177_v37, 16  ;;  %v1882_v0 = vrot.slane %v6177_v37, 1  ;;  %1803 = vmatmul.bf16.gmra.mxu2 %v6177_v37  ;;  %v1098_v58 = vmul.f32 %v7137_v24, %v811_v45 }
 0x176   : > { %v7663_v31 = vld [vmem:[#allocation2 + $0x58] sm:$0xff]  ;;  %v2918_v47 = vrot.slane %v7657_v56, 2 }
 0x177   : > { %v812_v53 = vmax.f32 %v746_v18, 0.0  ;;  %v1594_v41 = vpop.f32.mrf.mxu1  ;;  %v1451_v2 = vrot.slane %v1449_v19, 1  ;;  %v7666_v6 = vsel %vm1860_vm3, %v1880_v43, %v1882_v0  ;;  %v3954_v43 = vrot.slane %v7663_v31, 3 }
 0x178   : > { %v7671_v3 = vadd.f32 %v1759_v46, %v1594_v41  ;;  %v1764_v23 = vpop.f32.mrf.mxu2  ;;  %v7676_v15 = vsel %vm2898_vm1, %v2916_v35, %v2918_v47  ;;  %v3625_v38 = vshrl.u32 %v7663_v31, 16  ;;  %v3628_v24 = vshll.u32 %v7663_v31, 16 }
 0x179   : > { %v1099_v32 = vmul.f32 %v7142_v4, %v812_v53  ;;  %v1452_v18 = vsel %vm1360_vm0, %v1447_v9, %v1451_v2  ;;  %9461 = vst [vmem:[#allocation45_spill] sm:$0xff] %v7676_v15  ;;  %v7682_v4 = vsel %vm3936_vm2, %v3952_v42, %v3954_v43  ;;  %v3298_v53 = vsel %vm2898_vm1, %v3295_v54, %v3297_v61 }
 0x17a   : > { %1633 = vmatmul.bf16.gmra.mxu1 %v1452_v18  ;;  %9462 = vst [vmem:[#allocation46_spill] sm:$0xff] %v7682_v4  ;;  %v3627_v46 = vrot.slane %v3625_v38, 2  ;;  %v3630_v17 = vrot.slane %v3628_v24, 3  ;;  %v9387_v7 = vrot.slane %v7663_v31, 2 }
 0x17b   : > { %v6379_v60 = vpack.c.bf16 %v1099_v32, %v1098_v58  ;;  %v7685_v45 = vpop.f32.mrf.mxu3 }
 0x17c   : > { %v748_v19 = vpop.f32.mrf.mxu0  ;;  %v3631_v35 = vor.u32 %v3630_v17, %v3627_v46 }
 0x17d   : > { %6431 = vst [vmem:[#allocation2 + $0x60] sm:$0xff] %v6379_v60   ;;  %v749_v41 = vadd.f32 %v7511_v40, %v748_v19 }
 0x17e   : > { %v7691_v18 = vsel %vm3543_vm4, %v3622_v29, %v3631_v35 }
 0x17f   : > { %3425 = vmatmul.bf16.gmra.mxu0 %v3298_v53  ;;  %v1596_v32 = vpop.f32.mrf.mxu1  ;;  %9463 = vst [vmem:[#allocation47_spill] sm:$0xff] %v7691_v18  ;;  %v813_v38 = vmax.f32 %v749_v41, 0.0  ;;  %v1453_v53 = vshrl.u32 %v6177_v37, 16 }
 0x180   : > { %v7688_v9 = vadd.f32 %v1761_v21, %v1596_v32  ;;  %v1766_v58 = vpop.f32.mrf.mxu2 }
 0x181   : > { %v1455_v32 = vor.u32 %v1453_v53, %v1451_v2  ;;  %v1100_v37 = vmul.f32 %v7174_v52, %v813_v38  ;;  %v6233_v2 = vld [vmem:[%s9353_s3 + $0x100] sm:$0xff] }
 0x182   : > { %2749 = vmatpush.bf16.msrb.mxu2 %v6233_v2  ;;  %v6225_v38 = vld [vmem:[%s9353_s3 + $0xc0] sm:$0xff] }
 0x183   : > { %2356 = vmatpush.bf16.msrb.mxu1 %v6225_v38 }
 0x184   : > { %v750_v60 = vpop.f32.mrf.mxu0  ;;  %1992 = vmatmul.bf16.gmra.mxu3 %v7417_v25  ;;  %v7694_v42 = vld [vmem:[#allocation2 + $0x60] sm:$0xff] }
 0x185   : > { %v7696_v54 = vld [vmem:[#allocation2 + $0x60] sm:$0xff]  ;;  %v751_v24 = vadd.f32 %v7511_v40, %v750_v60  ;;  %v1457_v46 = vshll.u32 %v7694_v42, 16  ;;  %v1884_v21 = vrot.slane %v7694_v42, 1  ;;  %1808 = vmatmul.bf16.gmra.mxu2 %v7694_v42 }
 0x186   : > { %v7704_v29 = vld [vmem:[#allocation2 + $0x60] sm:$0xff]  ;;  %v2920_v41 = vrot.slane %v7696_v54, 2 }
 0x187   : > { %v814_v19 = vmax.f32 %v751_v24, 0.0  ;;  %v7701_v17 = vpop.f32.mrf.mxu3  ;;  %v1599_v25 = vpop.f32.mrf.mxu1  ;;  %v1459_v18 = vrot.slane %v1457_v46, 1  ;;  %v7707_v4 = vsel %vm1860_vm3, %v1882_v0, %v1884_v21  ;;  %v3956_v52 = vrot.slane %v7704_v29, 3 }
 0x188   : > { %v7712_v15 = vadd.f32 %v1764_v23, %v1599_v25  ;;  %v1769_v24 = vpop.f32.mrf.mxu2  ;;  %v7720_v0 = vsel %vm2898_vm1, %v2918_v47, %v2920_v41  ;;  %v3637_v30 = vshll.u32 %v7704_v29, 16 }
 0x189   : > { %v1101_v60 = vmul.f32 %v7179_v49, %v814_v19  ;;  %v1460_v22 = vsel %vm1360_vm0, %v1455_v32, %v1459_v18  ;;  %9464 = vst [vmem:[#allocation48_spill] sm:$0xff] %v7720_v0  ;;  %v3634_v49 = vshrl.u32 %v7704_v29, 16  ;;  %v7729_v46 = vsel %vm3936_vm2, %v3954_v43, %v3956_v52 }
 0x18a   : > { %1638 = vmatmul.bf16.gmra.mxu1 %v1460_v22  ;;  %9465 = vst [vmem:[#allocation49_spill] sm:$0xff] %v7729_v46  ;;  %v3300_v19 = vsel %vm2898_vm1, %v3297_v61, %v3299_v55  ;;  %v3639_v22 = vrot.slane %v3637_v30, 3  ;;  %v1461_v30 = vshrl.u32 %v7694_v42, 16 }
 0x18b   : > { %v6384_v53 = vpack.c.bf16 %v1101_v60, %v1100_v37  ;;  %v3636_v47 = vrot.slane %v3634_v49, 2 }
 0x18c   : > { %v753_v23 = vpop.f32.mrf.mxu0 }
 0x18d   : > { %6432 = vst [vmem:[#allocation2 + $0x68] sm:$0xff] %v6384_v53   ;;  %v3640_v37 = vor.u32 %v3639_v22, %v3636_v47  ;;  %v754_v60 = vadd.f32 %v7511_v40, %v753_v23 }
 0x18f   : > { %v7732_v25 = vpop.f32.mrf.mxu3  ;;  %3430 = vmatmul.bf16.gmra.mxu0 %v3300_v19  ;;  %v1601_v32 = vpop.f32.mrf.mxu1  ;;  %v7738_v53 = vsel %vm3543_vm4, %v3631_v35, %v3640_v37  ;;  %v815_v61 = vmax.f32 %v754_v60, 0.0  ;;  %v1463_v60 = vor.u32 %v1461_v30, %v1459_v18 }
 0x190   : > { %v7735_v2 = vadd.f32 %v1766_v58, %v1601_v32  ;;  %v1771_v0 = vpop.f32.mrf.mxu2  ;;  %9466 = vst [vmem:[#allocation50_spill] sm:$0xff] %v7738_v53 }
 0x194   : > { %v755_v43 = vpop.f32.mrf.mxu0  ;;  %1997 = vmatmul.bf16.gmra.mxu3 %v7479_v33  ;;  %v7741_v49 = vld [vmem:[#allocation2 + $0x68] sm:$0xff] }
 0x195   : > { %v756_v38 = vadd.f32 %v7511_v40, %v755_v43  ;;  %v1465_v47 = vshll.u32 %v7741_v49, 16  ;;  %v1886_v23 = vrot.slane %v7741_v49, 1  ;;  %v7747_v58 = vld [vmem:[#allocation2 + $0x68] sm:$0xff]  ;;  %1813 = vmatmul.bf16.gmra.mxu2 %v7741_v49  ;;  %v1102_v43 = vmul.f32 %v7185_v59, %v815_v61 }
 0x196   : > { %v7750_v22 = vld [vmem:[#allocation2 + $0x68] sm:$0xff]  ;;  %v3302_v61 = vsel %vm2898_vm1, %v3299_v55, %v9387_v7  ;;  %v6289_v7 = vld [vmem:[%s9353_s3 + $0x238] sm:$0xff] }
 0x197   : > { %v816_v19 = vmax.f32 %v756_v38, 0.0  ;;  %v1824_v35 = vpop.f32.mrf.mxu3  ;;  %v1604_v32 = vpop.f32.mrf.mxu1  ;;  %v1467_v40 = vrot.slane %v1465_v47, 1  ;;  %v7756_v42 = vsel %vm1860_vm3, %v1884_v21, %v1886_v23  ;;  %v3958_v18 = vrot.slane %v7750_v22, 3  ;;  %4040 = vmatpush.bf16.msra.mxu2 %v6289_v7 }
 0x198   : > { %v7753_v33 = vadd.f32 %v1824_v35, %v7610_v26  ;;  %v7760_v46 = vadd.f32 %v1769_v24, %v1604_v32  ;;  %v1774_v38 = vpop.f32.mrf.mxu2  ;;  %v2922_v26 = vrot.slane %v7747_v58, 2  ;;  %v3643_v21 = vshrl.u32 %v7750_v22, 16 }
 0x199   : > { %v1103_v53 = vmul.f32 %v7241_v20, %v816_v19  ;;  %v1468_v5 = vsel %vm1360_vm0, %v1463_v60, %v1467_v40  ;;  %v3646_v59 = vshll.u32 %v7750_v22, 16  ;;  %v7772_v20 = vsel %vm3936_vm2, %v3956_v52, %v3958_v18  ;;  %v2099_v60 = vld [vmem:[#allocation2 + $0x8] sm:$0xe]  ;;  %v6248_v52 = vld [vmem:[%s9353_s3 + $0x178] sm:$0xff] }
 0x19a   : > { %9467 = vst [vmem:[#allocation51_spill] sm:$0xff] %v7753_v33  ;;  %1643 = vmatmul.bf16.gmra.mxu1 %v1468_v5  ;;  %v7768_v30 = vsel %vm2898_vm1, %v2920_v41, %v2922_v26  ;;  %v3645_v24 = vrot.slane %v3643_v21, 2  ;;  %v2190_v21 = vunpack.c.l.b16 %v2099_v60  ;;  %3002 = vmatpush.bf16.msra.mxu3 %v6248_v52  ;;  %v9473_v52 = vunpack.c.l.b16 %v7067_v8 }
 0x19b   : > { %v6389_v35 = vpack.c.bf16 %v1103_v53, %v1102_v43  ;;  %9468 = vst [vmem:[#allocation52_spill] sm:$0xff] %v7768_v30  ;;  %v3648_v53 = vrot.slane %v3646_v59, 3 }
 0x19c   : > { %9469 = vst [vmem:[#allocation53_spill] sm:$0xff] %v7772_v20 }
 0x19d   : > { %6433 = vst [vmem:[#allocation2 + $0x70] sm:$0xff] %v6389_v35   ;;  %v3649_v41 = vor.u32 %v3648_v53, %v3645_v24 }
 0x19f   : > { %v1826_v5 = vpop.f32.mrf.mxu3  ;;  %3435 = vmatmul.bf16.gmra.mxu0 %v3302_v61  ;;  %v1606_v19 = vpop.f32.mrf.mxu1  ;;  %v7786_v35 = vsel %vm3543_vm4, %v3640_v37, %v3649_v41 }
 0x1a0   : > { %v7778_v47 = vadd.f32 %v1826_v5, %v7637_v11  ;;  %v7780_v32 = vadd.f32 %v1771_v0, %v1606_v19  ;;  %v1776_v43 = vpop.f32.mrf.mxu2  ;;  %9471 = vst [vmem:[#allocation55_spill] sm:$0xff] %v7786_v35  ;;  %v1469_v0 = vshrl.u32 %v7741_v49, 16  ;;  %v7805_v49 = vpack.c.b16 %v9473_v52, %v2190_v21  ;;  %v7812_v35 = vld [vmem:[#allocation2 + $0x10] sm:$0xff] }
 0x1a1   : > { %v2515_v20 = vshrl.u32 %v7812_v35, 16  ;;  %v3303_v21 = vrot.slane %v7704_v29, 2  ;;  %v6281_v29 = vld [vmem:[%s9353_s3 + $0x1f8] sm:$0xff] }
 0x1a2   : > { %9470 = vst [vmem:[#allocation54_spill] sm:$0xff] %v7778_v47  ;;  %v1471_v19 = vor.u32 %v1469_v0, %v1467_v40  ;;  %v2518_v0 = vshll.u32 %v7812_v35, 16  ;;  %v2507_v52 = vshrl.u32 %v7805_v49, 16  ;;  %3780 = vmatpush.bf16.msra.mxu1 %v6281_v29 }
 0x1a4   : > { %2002 = vmatmul.bf16.gmra.mxu3 %v7517_v1  ;;  %v7789_v55 = vld [vmem:[#allocation2 + $0x70] sm:$0xff] }
 0x1a5   : > { %v7791_v11 = vld [vmem:[#allocation2 + $0x70] sm:$0xff]  ;;  %v1473_v59 = vshll.u32 %v7789_v55, 16  ;;  %1818 = vmatmul.bf16.gmra.mxu2 %v7789_v55 }
 0x1a6   : > { %v7797_v53 = vld [vmem:[#allocation2 + $0x70] sm:$0xff]  ;;  %v2924_v37 = vrot.slane %v7791_v11, 2 }
 0x1a7   : > { %v1829_v61 = vpop.f32.mrf.mxu3  ;;  %v1609_v5 = vpop.f32.mrf.mxu1  ;;  %v1475_v60 = vrot.slane %v1473_v59, 1  ;;  %v9476_v59 = vrot.slane %v7057_v63, 2  ;;  %v3652_v7 = vshrl.u32 %v7797_v53, 16 }
 0x1a8   : > { %v7801_v1 = vadd.f32 %v1829_v61, %v7660_v50  ;;  %v7810_v24 = vadd.f32 %v1774_v38, %v1609_v5  ;;  %v9474_v50 = vrot.slane %v7789_v55, 1  ;;  %v1779_v40 = vpop.f32.mrf.mxu2  ;;  %v7824_v38 = vsel %vm2898_vm1, %v2922_v26, %v2924_v37 }
 0x1a9   : > { %v1476_v8 = vsel %vm1360_vm0, %v1471_v19, %v1475_v60  ;;  %9475 = vst [vmem:[#allocation57_spill] sm:$0xff] %v7824_v38  ;;  %v7829_v5 = vsel %vm2898_vm1, %v2924_v37, %v9476_v59  ;;  %v2510_v19 = vshll.u32 %v7805_v49, 16  ;;  %v3655_v26 = vshll.u32 %v7797_v53, 16 }
 0x1aa   : > { %9472 = vst [vmem:[#allocation56_spill] sm:$0xff] %v7801_v1  ;;  %v7818_v61 = vsel %vm1860_vm3, %v1886_v23, %v9474_v50  ;;  %1648 = vmatmul.bf16.gmra.mxu1 %v1476_v8  ;;  %v3960_v23 = vrot.slane %v7797_v53, 3  ;;  %v2517_v50 = vrot.slane %v2515_v20, 1  ;;  %v9479_v37 = vrot.slane %v7060_v12, 3 }
 0x1ab   : > { %9477 = vst [vmem:[#allocation58_spill] sm:$0xff] %v7829_v5  ;;  %v9481_v59 = vrot.slane %v7663_v31, 2  ;;  %v2520_v38 = vrot.slane %v2518_v0, 2  ;;  %v3654_v30 = vrot.slane %v3652_v7, 2  ;;  %v3657_v1 = vrot.slane %v3655_v26, 3 }
 0x1ac   : > { %v7840_v63 = vsel %vm3936_vm2, %v3958_v18, %v3960_v23  ;;  %v7845_v8 = vsel %vm3936_vm2, %v3960_v23, %v9479_v37  ;;  %v2512_v33 = vrot.slane %v2510_v19, 2 }
 0x1ad   : > { %9478 = vst [vmem:[#allocation59_spill] sm:$0xff] %v7840_v63  ;;  %v3304_v5 = vsel %vm2898_vm1, %v9481_v59, %v3303_v21  ;;  %v2509_v63 = vrot.slane %v2507_v52, 1  ;;  %v3658_v12 = vor.u32 %v3657_v1, %v3654_v30  ;;  %v2521_v37 = vor.u32 %v2520_v38, %v2517_v50  ;;  %v7881_v59 = vpop.f32.mrf.mxu0 }
 0x1ae   : > { %9480 = vst [vmem:[#allocation60_spill] sm:$0xff] %v7845_v8 }
 0x1af   : > { %v1831_v47 = vpop.f32.mrf.mxu3  ;;  %3440 = vmatmul.bf16.gmra.mxu0 %v3304_v5  ;;  %v1611_v18 = vpop.f32.mrf.mxu1  ;;  %v7856_v31 = vsel %vm3543_vm4, %v3649_v41, %v3658_v12  ;;  %v7860_v0 = vsel %vm3543_vm4, %v3658_v12, %v7274_v36  ;;  %v2513_v5 = vor.u32 %v2512_v33, %v2509_v63  ;;  %v9484_v36 = vld [vmem:[#allocation3_spill] sm:$0xff]  ;;  %v7873_v33 = vld [vmem:[#allocation2 + $0x18] sm:$0xff] }
 0x1b0   : > { %v7851_v20 = vadd.f32 %v1831_v47, %v7685_v45  ;;  %v7853_v16 = vadd.f32 %v1776_v43, %v1611_v18  ;;  %v1781_v23 = vpop.f32.mrf.mxu2  ;;  %9482 = vst [vmem:[#allocation61_spill] sm:$0xff] %v7856_v31  ;;  %v1477_v45 = vshrl.u32 %v7789_v55, 16  ;;  %v2524_v29 = vshrl.u32 %v7873_v33, 16 }
 0x1b1   : > { %9483 = vst [vmem:[#allocation62_spill] sm:$0xff] %v7860_v0  ;;  %v2522_v47 = vsel %vm2505_vm5, %v2513_v5, %v2521_v37 }
 0x1b2   : > { %v1479_v30 = vor.u32 %v1477_v45, %v1475_v60  ;;  %v2527_v60 = vshll.u32 %v7873_v33, 16  ;;  %v2247_v45 = vrot.slane %v7812_v35, 1 }
 0x1b4   : > { %2007 = vmatmul.bf16.gmra.mxu3 %v7550_v27  ;;  %v1484_v19 = vsel %vm1360_vm0, %v1479_v30, %v9484_v36  ;;  %v3305_v27 = vrot.slane %v7750_v22, 2  ;;  %v2529_v26 = vrot.slane %v2527_v60, 2  ;;  %v2246_v30 = vrot.slane %v7805_v49, 1 }
 0x1b5   : > { %2750 = vmatmul.bf16.vlgmr.msrb.gmra.mxu2 %v2522_v47  ;;  %v3307_v36 = vrot.slane %v7797_v53, 2 }
 0x1b6   : > { %v3306_v7 = vsel %vm2898_vm1, %v3303_v21, %v3305_v27  ;;  %v6247_v21 = vld [vmem:[%s9353_s3 + $0x170] sm:$0xff] }
 0x1b7   : > { %v1834_v43 = vpop.f32.mrf.mxu3  ;;  %v1614_v41 = vpop.f32.mrf.mxu1  ;;  %3003 = vmatpush.bf16.msra.mxu3 %v6247_v21  ;;  %v3308_v49 = vsel %vm2898_vm1, %v3305_v27, %v3307_v36 }
 0x1b8   : > { %v7866_v1 = vadd.f32 %v1834_v43, %v7701_v17  ;;  %v7868_v38 = vadd.f32 %v1779_v40, %v1614_v41  ;;  %v1784_v52 = vpop.f32.mrf.mxu2  ;;  %v2526_v17 = vrot.slane %v2524_v29, 1  ;;  %v2248_v41 = vsel %vm1860_vm3, %v2246_v30, %v2247_v45  ;;  %v7903_v29 = vpop.f32.mrf.mxu0 }
 0x1ba   : > { %1653 = vmatmul.bf16.gmra.mxu1 %v1484_v19  ;;  %v2530_v12 = vor.u32 %v2529_v26, %v2526_v17  ;;  %v7899_v19 = vld [vmem:[#allocation2 + $0x20] sm:$0xff]  ;;  %v6280_v26 = vld [vmem:[%s9353_s3 + $0x1f0] sm:$0xff] }
 0x1bb   : > { %v2533_v35 = vshrl.u32 %v7899_v19, 16  ;;  %3781 = vmatpush.bf16.msra.mxu1 %v6280_v26 }
 0x1bc   : > { %v2531_v5 = vsel %vm2505_vm5, %v2521_v37, %v2530_v12  ;;  %v2536_v37 = vshll.u32 %v7899_v19, 16 }
 0x1be   : > { %v2538_v60 = vrot.slane %v2536_v37, 2  ;;  %v7928_v37 = vld [vmem:[#allocation2 + $0x28] sm:$0xff] }
 0x1bf   : > { %v1836_v50 = vpop.f32.mrf.mxu3  ;;  %3445 = vmatmul.bf16.gmra.mxu0 %v3306_v7  ;;  %v1616_v63 = vpop.f32.mrf.mxu1 }
 0x1c0   : > { %v7879_v40 = vadd.f32 %v1836_v50, %v7732_v25  ;;  %v7883_v22 = vadd.f32 %v1781_v23, %v1616_v63  ;;  %v1786_v18 = vpop.f32.mrf.mxu2  ;;  %v7918_v27 = vpop.f32.mrf.mxu0 }
 0x1c4   : > { %2012 = vmatmul.bf16.gmra.mxu3 %v7584_v44 }
 0x1c5   : > { %2755 = vmatmul.bf16.gmra.mxu2 %v2531_v5 }
 0x1c7   : > { %v1973_v25 = vpop.f32.mrf.mxu3  ;;  %v1619_v23 = vpop.f32.mrf.mxu1 }
 0x1c8   : > { %v7892_v47 = vadd.f32 %v1973_v25, %v7589_v39  ;;  %v7895_v43 = vadd.f32 %v1784_v52, %v1619_v23  ;;  %v1789_v44 = vpop.f32.mrf.mxu2  ;;  %v6288_v39 = vld [vmem:[%s9353_s3 + $0x230] sm:$0xff]  ;;  %v2535_v52 = vrot.slane %v2533_v35, 1  ;;  %v2249_v25 = vrot.slane %v7873_v33, 1 }
 0x1c9   : > { %4041 = vmatpush.bf16.msra.mxu2 %v6288_v39  ;;  %v2545_v39 = vshll.u32 %v7928_v37, 16 }
 0x1ca   : > { %2357 = vmatmul.bf16.vlgmr.msrb.gmra.mxu1 %v2248_v41  ;;  %v2539_v21 = vor.u32 %v2538_v60, %v2535_v52  ;;  %v2250_v35 = vsel %vm1860_vm3, %v2247_v45, %v2249_v25  ;;  %v7933_v60 = vpop.f32.mrf.mxu0 }
 0x1cc   : > { %v2540_v5 = vsel %vm2505_vm5, %v2530_v12, %v2539_v21  ;;  %v6494_v12 = vld [vmem:[#allocation2 + $0x78] sm:$0xff] }
 0x1cd   : > { %v3309_v33 = vrot.slane %v6494_v12, 2 }
 0x1cf   : > { %v1975_v7 = vpop.f32.mrf.mxu3  ;;  %3450 = vmatmul.bf16.gmra.mxu0 %v3308_v49  ;;  %v1621_v17 = vpop.f32.mrf.mxu1  ;;  %v3310_v49 = vsel %vm2898_vm1, %v3307_v36, %v3309_v33  ;;  %v2251_v36 = vrot.slane %v7899_v19, 1  ;;  %v6246_v19 = vld [vmem:[%s9353_s3 + $0x168] sm:$0xff] }
 0x1d0   : > { %v7910_v53 = vadd.f32 %v1975_v7, %v7604_v13  ;;  %v7915_v50 = vadd.f32 %v1786_v18, %v1621_v17  ;;  %v1791_v63 = vpop.f32.mrf.mxu2  ;;  %3004 = vmatpush.bf16.msra.mxu3 %v6246_v19 }
 0x1d1   : > { %v2252_v12 = vsel %vm1860_vm3, %v2249_v25, %v2251_v36 }
 0x1d4   : > { %2017 = vmatmul.bf16.gmra.mxu3 %v7623_v51  ;;  %v2542_v51 = vshrl.u32 %v7928_v37, 16 }
 0x1d5   : > { %2760 = vmatmul.bf16.gmra.mxu2 %v2540_v5 }
 0x1d6   : > { %v2544_v52 = vrot.slane %v2542_v51, 1 }
 0x1d7   : > { %v1978_v13 = vpop.f32.mrf.mxu3  ;;  %v1624_v30 = vpop.f32.mrf.mxu1 }
 0x1d8   : > { %v7923_v23 = vadd.f32 %v1978_v13, %v7628_v34  ;;  %v7925_v41 = vadd.f32 %v1789_v44, %v1624_v30  ;;  %v1794_v18 = vpop.f32.mrf.mxu2  ;;  %v2547_v34 = vrot.slane %v2545_v39, 2  ;;  %v7946_v39 = vpop.f32.mrf.mxu0 }
 0x1da   : > { %2362 = vmatmul.bf16.gmra.mxu1 %v2250_v35  ;;  %v2548_v5 = vor.u32 %v2547_v34, %v2544_v52 }
 0x1dc   : > { %v2549_v13 = vsel %vm2505_vm5, %v2539_v21, %v2548_v5  ;;  %v2554_v21 = vshll.u32 %v7466_v14, 16 }
 0x1df   : > { %v1980_v44 = vpop.f32.mrf.mxu3  ;;  %3455 = vmatmul.bf16.gmra.mxu0 %v3310_v49  ;;  %v1626_v45 = vpop.f32.mrf.mxu1  ;;  %v6495_v49 = vld [vmem:[#allocation2 + $0x80] sm:$0xff] }
 0x1e0   : > { %v7936_v7 = vadd.f32 %v1980_v44, %v7645_v10  ;;  %v7938_v17 = vadd.f32 %v1791_v63, %v1626_v45  ;;  %v1796_v26 = vpop.f32.mrf.mxu2  ;;  %v3311_v52 = vrot.slane %v6495_v49, 2  ;;  %v2253_v49 = vrot.slane %v7928_v37, 1 }
 0x1e4   : > { %2022 = vmatmul.bf16.gmra.mxu3 %v7666_v6  ;;  %v2551_v6 = vshrl.u32 %v7466_v14, 16  ;;  %v6287_v14 = vld [vmem:[%s9353_s3 + $0x228] sm:$0xff] }
 0x1e5   : > { %2765 = vmatmul.bf16.gmra.mxu2 %v2549_v13 }
 0x1e6   : > { %v2553_v34 = vrot.slane %v2551_v6, 1  ;;  %4042 = vmatpush.bf16.msra.mxu2 %v6287_v14 }
 0x1e7   : > { %v1983_v30 = vpop.f32.mrf.mxu3  ;;  %v1629_v51 = vpop.f32.mrf.mxu1 }
 0x1e8   : > { %v7944_v35 = vadd.f32 %v1983_v30, %v7671_v3  ;;  %v7948_v10 = vadd.f32 %v1794_v18, %v1629_v51  ;;  %v1799_v63 = vpop.f32.mrf.mxu2  ;;  %v3312_v3 = vsel %vm2898_vm1, %v3309_v33, %v3311_v52  ;;  %v2556_v18 = vrot.slane %v2554_v21, 2  ;;  %v6279_v33 = vld [vmem:[%s9353_s3 + $0x1e8] sm:$0xff] }
 0x1e9   : > { %3782 = vmatpush.bf16.msra.mxu1 %v6279_v33 }
 0x1ea   : > { %2367 = vmatmul.bf16.gmra.mxu1 %v2252_v12  ;;  %v2557_v51 = vor.u32 %v2556_v18, %v2553_v34  ;;  %v7965_v12 = vpop.f32.mrf.mxu0  ;;  %v6496_v34 = vld [vmem:[#allocation2 + $0x88] sm:$0xff] }
 0x1eb   : > { %9485 = vst [vmem:[#allocation3_spill] sm:$0xff] %v7965_v12  ;;  %v3313_v18 = vrot.slane %v6496_v34, 2 }
 0x1ef   : > { %v1985_v44 = vpop.f32.mrf.mxu3  ;;  %3460 = vmatmul.bf16.gmra.mxu0 %v3312_v3  ;;  %v1631_v45 = vpop.f32.mrf.mxu1 }
 0x1f0   : > { %v7958_v25 = vadd.f32 %v1985_v44, %v7688_v9  ;;  %v7963_v13 = vadd.f32 %v1796_v26, %v1631_v45  ;;  %v1801_v30 = vpop.f32.mrf.mxu2  ;;  %v2558_v9 = vsel %vm2505_vm5, %v2548_v5, %v2557_v51  ;;  %v2560_v44 = vshrl.u32 %v7506_v28, 16 }
 0x1f1   : > { %v2563_v5 = vshll.u32 %v7506_v28, 16  ;;  %v3314_v45 = vsel %vm2898_vm1, %v3311_v52, %v3313_v18 }
 0x1f2   : > { %v7981_v37 = vpop.f32.mrf.mxu0  ;;  %v2562_v14 = vrot.slane %v2560_v44, 1 }
 0x1f3   : > { %9486 = vst [vmem:[#allocation63_spill] sm:$0xff] %v7981_v37 }
 0x1f4   : > { %2027 = vmatmul.bf16.gmra.mxu3 %v7707_v4  ;;  %v2254_v4 = vsel %vm1860_vm3, %v2251_v36, %v2253_v49 }
 0x1f5   : > { %2770 = vmatmul.bf16.gmra.mxu2 %v2558_v9 }
 0x1f7   : > { %v1988_v6 = vpop.f32.mrf.mxu3  ;;  %v1634_v21 = vpop.f32.mrf.mxu1 }
 0x1f8   : > { %v7974_v26 = vadd.f32 %v1988_v6, %v7712_v15  ;;  %v7976_v19 = vadd.f32 %v1799_v63, %v1634_v21  ;;  %v1804_v3 = vpop.f32.mrf.mxu2  ;;  %v2565_v15 = vrot.slane %v2563_v5, 2 }
 0x1fa   : > { %2372 = vmatmul.bf16.gmra.mxu1 %v2254_v4  ;;  %v2566_v21 = vor.u32 %v2565_v15, %v2562_v14  ;;  %v6497_v4 = vld [vmem:[#allocation2 + $0x30] sm:$0xff]  ;;  %v7991_v0 = vpop.f32.mrf.mxu0 }
 0x1fb   : > { %v2255_v34 = vrot.slane %v6497_v4, 1  ;;  %9487 = vst [vmem:[#allocation64_spill] sm:$0xff] %v7991_v0  ;;  %v6498_v14 = vld [vmem:[#allocation2 + $0x90] sm:$0xff]  ;;  %v6501_v0 = vld [vmem:[#allocation2 + $0x78] sm:$0xff] }
 0x1fc   : > { %v2567_v28 = vsel %vm2505_vm5, %v2557_v51, %v2566_v21  ;;  %v3315_v15 = vrot.slane %v6498_v14, 2  ;;  %v2572_v51 = vshll.u32 %v7544_v62, 16  ;;  %v1890_v31 = vrot.slane %v6501_v0, 1 }
 0x1ff   : > { %v1990_v33 = vpop.f32.mrf.mxu3  ;;  %3465 = vmatmul.bf16.gmra.mxu0 %v3314_v45  ;;  %v1636_v9 = vpop.f32.mrf.mxu1  ;;  %v2256_v45 = vsel %vm1860_vm3, %v2253_v49, %v2255_v34 }
 0x200   : > { %v7985_v63 = vadd.f32 %v1990_v33, %v7735_v2  ;;  %v7987_v36 = vadd.f32 %v1801_v30, %v1636_v9  ;;  %v1806_v6 = vpop.f32.mrf.mxu2  ;;  %v6245_v33 = vld [vmem:[%s9353_s3 + $0x160] sm:$0xff] }
 0x201   : > { %3005 = vmatpush.bf16.msra.mxu3 %v6245_v33 }
 0x204   : > { %2032 = vmatmul.bf16.gmra.mxu3 %v7756_v42  ;;  %v2569_v42 = vshrl.u32 %v7544_v62, 16 }
 0x205   : > { %2775 = vmatmul.bf16.gmra.mxu2 %v2567_v28  ;;  %v2574_v28 = vrot.slane %v2572_v51, 2 }
 0x206   : > { %v2571_v9 = vrot.slane %v2569_v42, 1  ;;  %v6499_v42 = vld [vmem:[#allocation2 + $0x38] sm:$0xff] }
 0x207   : > { %v1993_v52 = vpop.f32.mrf.mxu3  ;;  %v1639_v2 = vpop.f32.mrf.mxu1  ;;  %v2257_v51 = vrot.slane %v6499_v42, 1 }
 0x208   : > { %v7994_v44 = vadd.f32 %v1993_v52, %v7760_v46  ;;  %v7996_v5 = vadd.f32 %v1804_v3, %v1639_v2  ;;  %v1809_v30 = vpop.f32.mrf.mxu2  ;;  %v3316_v46 = vsel %vm2898_vm1, %v3313_v18, %v3315_v15  ;;  %v8008_v52 = vpop.f32.mrf.mxu0  ;;  %v6286_v18 = vld [vmem:[%s9353_s3 + $0x220] sm:$0xff] }
 0x209   : > { %9488 = vst [vmem:[#allocation65_spill] sm:$0xff] %v8008_v52  ;;  %4043 = vmatpush.bf16.msra.mxu2 %v6286_v18  ;;  %v2581_v18 = vshll.u32 %v7578_v48, 16 }
 0x20a   : > { %2377 = vmatmul.bf16.gmra.mxu1 %v2256_v45  ;;  %v2575_v45 = vor.u32 %v2574_v28, %v2571_v9  ;;  %v2258_v28 = vsel %vm1860_vm3, %v2255_v34, %v2257_v51 }
 0x20c   : > { %v2576_v14 = vsel %vm2505_vm5, %v2566_v21, %v2575_v45 }
 0x20f   : > { %v1995_v3 = vpop.f32.mrf.mxu3  ;;  %3470 = vmatmul.bf16.gmra.mxu0 %v3316_v46  ;;  %v1641_v4 = vpop.f32.mrf.mxu1  ;;  %v6278_v46 = vld [vmem:[%s9353_s3 + $0x1e0] sm:$0xff] }
 0x210   : > { %v8006_v49 = vadd.f32 %v1995_v3, %v7780_v32  ;;  %v8010_v2 = vadd.f32 %v1806_v6, %v1641_v4  ;;  %v1811_v62 = vpop.f32.mrf.mxu2  ;;  %v6500_v3 = vld [vmem:[#allocation2 + $0x98] sm:$0xff]  ;;  %v2578_v4 = vshrl.u32 %v7578_v48, 16  ;;  %3783 = vmatpush.bf16.msra.mxu1 %v6278_v46 }
 0x211   : > { %v3317_v21 = vrot.slane %v6500_v3, 2 }
 0x212   : > { %v2580_v42 = vrot.slane %v2578_v4, 1 }
 0x214   : > { %2037 = vmatmul.bf16.gmra.mxu3 %v7818_v61 }
 0x215   : > { %2780 = vmatmul.bf16.gmra.mxu2 %v2576_v14  ;;  %v8028_v14 = vpop.f32.mrf.mxu0 }
 0x216   : > { %9489 = vst [vmem:[#allocation66_spill] sm:$0xff] %v8028_v14 }
 0x217   : > { %v1998_v32 = vpop.f32.mrf.mxu3  ;;  %v1644_v6 = vpop.f32.mrf.mxu1 }
 0x218   : > { %v8018_v33 = vadd.f32 %v1998_v32, %v7810_v24  ;;  %v8023_v61 = vadd.f32 %v1809_v30, %v1644_v6  ;;  %v1814_v9 = vpop.f32.mrf.mxu2  ;;  %v3318_v24 = vsel %vm2898_vm1, %v3315_v15, %v3317_v21  ;;  %v2583_v32 = vrot.slane %v2581_v18, 2  ;;  %v3173_v30 = vld [vmem:[#allocation2 + $0xa0] sm:$0x3] }
 0x219   : > { %v3264_v37 = vunpack.c.l.b16 %v3173_v30 }
 0x21a   : > { %2382 = vmatmul.bf16.gmra.mxu1 %v2258_v28  ;;  %v2584_v46 = vor.u32 %v2583_v32, %v2580_v42  ;;  %v9490_v28 = vrot.slane %v7789_v55, 1 }
 0x21c   : > { %v1891_v15 = vsel %vm1860_vm3, %v9490_v28, %v1890_v31  ;;  %v2585_v18 = vsel %vm2505_vm5, %v2575_v45, %v2584_v46  ;;  %v2590_v28 = vshll.u32 %v7614_v57, 16 }
 0x21d   : > { %v8039_v4 = vpop.f32.mrf.mxu0 }
 0x21e   : > { %9491 = vst [vmem:[#allocation67_spill] sm:$0xff] %v8039_v4 }
 0x21f   : > { %v2000_v52 = vpop.f32.mrf.mxu3  ;;  %3475 = vmatmul.bf16.gmra.mxu0 %v3318_v24  ;;  %v1646_v34 = vpop.f32.mrf.mxu1  ;;  %v6502_v24 = vld [vmem:[#allocation2 + $0x40] sm:$0xff] }
 0x220   : > { %v8032_v6 = vadd.f32 %v2000_v52, %v7853_v16  ;;  %v8034_v3 = vadd.f32 %v1811_v62, %v1646_v34  ;;  %v1816_v48 = vpop.f32.mrf.mxu2  ;;  %v2259_v16 = vrot.slane %v6502_v24, 1  ;;  %v3283_v52 = vpack.c.b16 %v3264_v37, %v3264_v37 }
 0x221   : > { %v2587_v34 = vshrl.u32 %v7614_v57, 16 }
 0x222   : > { %v2260_v55 = vsel %vm1860_vm3, %v2257_v51, %v2259_v16  ;;  %v3319_v30 = vrot.slane %v3283_v52, 2 }
 0x223   : > { %v2589_v37 = vrot.slane %v2587_v34, 1  ;;  %v6504_v34 = vld [vmem:[#allocation2 + $0x48] sm:$0xff] }
 0x224   : > { %2042 = vmatmul.bf16.gmra.mxu3 %v1891_v15  ;;  %v3320_v45 = vsel %vm2898_vm1, %v3317_v21, %v3319_v30  ;;  %v2592_v15 = vrot.slane %v2590_v28, 2  ;;  %v6244_v21 = vld [vmem:[%s9353_s3 + $0x158] sm:$0xff]  ;;  %v2261_v28 = vrot.slane %v6504_v34, 1 }
 0x225   : > { %2785 = vmatmul.bf16.gmra.mxu2 %v2585_v18  ;;  %v8051_v18 = vpop.f32.mrf.mxu0  ;;  %3006 = vmatpush.bf16.msra.mxu3 %v6244_v21 }
 0x226   : > { %9492 = vst [vmem:[#allocation68_spill] sm:$0xff] %v8051_v18  ;;  %v2593_v4 = vor.u32 %v2592_v15, %v2589_v37  ;;  %v6285_v37 = vld [vmem:[%s9353_s3 + $0x218] sm:$0xff] }
 0x227   : > { %v2003_v14 = vpop.f32.mrf.mxu3  ;;  %v1649_v0 = vpop.f32.mrf.mxu1  ;;  %4044 = vmatpush.bf16.msra.mxu2 %v6285_v37 }
 0x228   : > { %v8043_v62 = vadd.f32 %v2003_v14, %v7868_v38  ;;  %v8045_v42 = vadd.f32 %v1814_v9, %v1649_v0  ;;  %v1819_v32 = vpop.f32.mrf.mxu2  ;;  %v6503_v14 = vld [vmem:[#allocation2 + $0x80] sm:$0xff]  ;;  %v2594_v30 = vsel %vm2505_vm5, %v2584_v46, %v2593_v4  ;;  %v2262_v46 = vsel %vm1860_vm3, %v2259_v16, %v2261_v28  ;;  %v6505_v16 = vld [vmem:[#allocation2 + $0x88] sm:$0xff] }
 0x229   : > { %v1892_v9 = vrot.slane %v6503_v14, 1  ;;  %v2596_v14 = vshrl.u32 %v7657_v56, 16  ;;  %v1894_v34 = vrot.slane %v6505_v16, 1 }
 0x22a   : > { %2387 = vmatmul.bf16.gmra.mxu1 %v2260_v55 }
 0x22b   : > { %v1893_v55 = vsel %vm1860_vm3, %v1890_v31, %v1892_v9  ;;  %v6243_v31 = vld [vmem:[%s9353_s3 + $0x150] sm:$0xff]  ;;  %v2598_v21 = vrot.slane %v2596_v14, 1  ;;  %v1895_v14 = vsel %vm1860_vm3, %v1892_v9, %v1894_v34  ;;  %v2608_v9 = vshll.u32 %v7696_v54, 16 }
 0x22c   : > { %3007 = vmatpush.bf16.msra.mxu3 %v6243_v31  ;;  %v6241_v31 = vld [vmem:[%s9353_s3 + $0x140] sm:$0xff] }
 0x22f   : > { %v2005_v38 = vpop.f32.mrf.mxu3  ;;  %3480 = vmatmul.bf16.gmra.mxu0 %v3320_v45  ;;  %v1651_v51 = vpop.f32.mrf.mxu1 }
 0x230   : > { %v8054_v24 = vadd.f32 %v2005_v38, %v7883_v22  ;;  %v8056_v52 = vadd.f32 %v1816_v48, %v1651_v51  ;;  %v1821_v0 = vpop.f32.mrf.mxu2  ;;  %v2599_v51 = vshll.u32 %v7657_v56, 16 }
 0x234   : > { %2047 = vmatmul.bf16.gmra.mxu3 %v1893_v55  ;;  %v2601_v55 = vrot.slane %v2599_v51, 2 }
 0x235   : > { %2790 = vmatmul.bf16.gmra.mxu2 %v2594_v30 }
 0x236   : > { %v2602_v18 = vor.u32 %v2601_v55, %v2598_v21  ;;  %v2605_v21 = vshrl.u32 %v7696_v54, 16 }
 0x237   : > { %v2008_v45 = vpop.f32.mrf.mxu3  ;;  %v1654_v48 = vpop.f32.mrf.mxu1 }
 0x238   : > { %v8064_v22 = vadd.f32 %v2008_v45, %v7895_v43  ;;  %v8069_v15 = vadd.f32 %v1819_v32, %v1654_v48  ;;  %v2751_v38 = vpop.f32.mrf.mxu2  ;;  %v6277_v43 = vld [vmem:[%s9353_s3 + $0x1d8] sm:$0xff]  ;;  %v6242_v32 = vld [vmem:[%s9353_s3 + $0x148] sm:$0xff]  ;;  %v2603_v51 = vsel %vm2505_vm5, %v2593_v4, %v2602_v18  ;;  %v2607_v4 = vrot.slane %v2605_v21, 1 }
 0x239   : > { %3784 = vmatpush.bf16.msra.mxu1 %v6277_v43  ;;  %3008 = vmatpush.bf16.msra.mxu3 %v6242_v32  ;;  %v2263_v43 = vrot.slane %v7614_v57, 1  ;;  %v2610_v57 = vrot.slane %v2608_v9, 2 }
 0x23a   : > { %2392 = vmatmul.bf16.gmra.mxu1 %v2262_v46 }
 0x23d   : > { %3009 = vmatpush.bf16.msra.mxu3 %v6241_v31 }
 0x23f   : > { %v2010_v30 = vpop.f32.mrf.mxu3  ;;  %v1656_v48 = vpop.f32.mrf.mxu1 }
 0x240   : > { %v8084_v45 = vadd.f32 %v2010_v30, %v7915_v50  ;;  %v8086_v37 = vadd.f32 %v1821_v0, %v1656_v48  ;;  %v2753_v46 = vpop.f32.mrf.mxu2  ;;  %v2264_v48 = vsel %vm1860_vm3, %v2261_v28, %v2263_v43  ;;  %v2611_v28 = vor.u32 %v2610_v57, %v2607_v4 }
 0x244   : > { %2052 = vmatmul.bf16.gmra.mxu3 %v1895_v14  ;;  %v9493_v14 = vld [vmem:[#allocation10_spill] sm:$0xff] }
 0x245   : > { %2795 = vmatmul.bf16.gmra.mxu2 %v2603_v51  ;;  %v1896_v51 = vrot.slane %v9493_v14, 1 }
 0x247   : > { %v2013_v32 = vpop.f32.mrf.mxu3  ;;  %v2358_v0 = vpop.f32.mrf.mxu1  ;;  %v1897_v8 = vsel %vm1860_vm3, %v1894_v34, %v1896_v51  ;;  %v2614_v34 = vshrl.u32 %v7747_v58, 16 }
 0x248   : > { %v8095_v50 = vadd.f32 %v2013_v32, %v7925_v41  ;;  %v2448_v30 = vadd.f32 %v2358_v0, %v7892_v47  ;;  %v2756_v16 = vpop.f32.mrf.mxu2 }
 0x24a   : > { %2397 = vmatmul.bf16.gmra.mxu1 %v2264_v48  ;;  %v8101_v55 = vadd.f32 %v2751_v38, %v2448_v30  ;;  %v2612_v38 = vsel %vm2505_vm5, %v2602_v18, %v2611_v28  ;;  %v2265_v30 = vrot.slane %v7657_v56, 1  ;;  %v6284_v56 = vld [vmem:[%s9353_s3 + $0x210] sm:$0xff]  ;;  %v2616_v18 = vrot.slane %v2614_v34, 1 }
 0x24b   : > { %4045 = vmatpush.bf16.msra.mxu2 %v6284_v56 }
 0x24c   : > { %v2266_v4 = vsel %vm1860_vm3, %v2263_v43, %v2265_v30  ;;  %v6276_v43 = vld [vmem:[%s9353_s3 + $0x1d0] sm:$0xff] }
 0x24d   : > { %3785 = vmatpush.bf16.msra.mxu1 %v6276_v43 }
 0x24f   : > { %v2015_v31 = vpop.f32.mrf.mxu3  ;;  %v2360_v32 = vpop.f32.mrf.mxu1 }
 0x250   : > { %v8105_v41 = vadd.f32 %v2015_v31, %v7938_v17  ;;  %v2449_v47 = vadd.f32 %v2360_v32, %v7910_v53  ;;  %v2758_v0 = vpop.f32.mrf.mxu2 }
 0x252   : > { %v8109_v12 = vadd.f32 %v2753_v46, %v2449_v47  ;;  %v2617_v46 = vshll.u32 %v7747_v58, 16  ;;  %v9494_v47 = vld [vmem:[#allocation6_spill] sm:$0xff] }
 0x254   : > { %2057 = vmatmul.bf16.gmra.mxu3 %v1897_v8 }
 0x255   : > { %2800 = vmatmul.bf16.gmra.mxu2 %v2612_v38 }
 0x257   : > { %v2018_v48 = vpop.f32.mrf.mxu3  ;;  %v2363_v17 = vpop.f32.mrf.mxu1 }
 0x258   : > { %v8114_v21 = vadd.f32 %v2018_v48, %v7948_v10  ;;  %v2450_v9 = vadd.f32 %v2363_v17, %v7923_v23  ;;  %v2761_v53 = vpop.f32.mrf.mxu2  ;;  %v2619_v10 = vrot.slane %v2617_v46, 2  ;;  %v2267_v48 = vrot.slane %v7696_v54, 1 }
 0x259   : > { %v2626_v46 = vshll.u32 %v7791_v11, 16 }
 0x25a   : > { %2402 = vmatmul.bf16.gmra.mxu1 %v2266_v4  ;;  %v8120_v8 = vadd.f32 %v2756_v16, %v2450_v9  ;;  %v2620_v51 = vor.u32 %v2619_v10, %v2616_v18  ;;  %v2268_v34 = vsel %vm1860_vm3, %v2265_v30, %v2267_v48  ;;  %v9495_v30 = vld [vmem:[#allocation9_spill] sm:$0xff] }
 0x25b   : > { %v2628_v54 = vrot.slane %v2626_v46, 2 }
 0x25c   : > { %v2621_v38 = vsel %vm2505_vm5, %v2611_v28, %v2620_v51 }
 0x25f   : > { %v2020_v57 = vpop.f32.mrf.mxu3  ;;  %v2365_v31 = vpop.f32.mrf.mxu1 }
 0x260   : > { %v8126_v23 = vadd.f32 %v2020_v57, %v7963_v13  ;;  %v2451_v14 = vadd.f32 %v2365_v31, %v7936_v7  ;;  %v2763_v16 = vpop.f32.mrf.mxu2 }
 0x262   : > { %v8132_v32 = vadd.f32 %v2758_v0, %v2451_v14  ;;  %v2623_v0 = vshrl.u32 %v7791_v11, 16 }
 0x264   : > { %3010 = vmatmul.bf16.vlgmr.msra.gmra.mxu3 %v9494_v47  ;;  %v2625_v28 = vrot.slane %v2623_v0, 1 }
 0x265   : > { %2805 = vmatmul.bf16.gmra.mxu2 %v2621_v38 }
 0x266   : > { %v2629_v31 = vor.u32 %v2628_v54, %v2625_v28 }
 0x267   : > { %v2023_v13 = vpop.f32.mrf.mxu3  ;;  %v2368_v9 = vpop.f32.mrf.mxu1 }
 0x268   : > { %v8138_v17 = vadd.f32 %v2023_v13, %v7976_v19  ;;  %v2452_v4 = vadd.f32 %v2368_v9, %v7944_v35  ;;  %v2766_v7 = vpop.f32.mrf.mxu2  ;;  %v2630_v14 = vsel %vm2505_vm5, %v2620_v51, %v2629_v31 }
 0x26a   : > { %2407 = vmatmul.bf16.gmra.mxu1 %v2268_v34  ;;  %v8144_v56 = vadd.f32 %v2761_v53, %v2452_v4  ;;  %v2269_v53 = vrot.slane %v7747_v58, 1  ;;  %v8162_v4 = vld [vmem:[#allocation2 + $0x78] sm:$0xff] }
 0x26b   : > { %v2632_v51 = vshrl.u32 %v8162_v4, 16  ;;  %v2635_v58 = vshll.u32 %v8162_v4, 16 }
 0x26d   : > { %v2634_v46 = vrot.slane %v2632_v51, 1  ;;  %v2637_v28 = vrot.slane %v2635_v58, 2 }
 0x26f   : > { %v2025_v18 = vpop.f32.mrf.mxu3  ;;  %v2370_v19 = vpop.f32.mrf.mxu1 }
 0x270   : > { %v8147_v10 = vadd.f32 %v2025_v18, %v7987_v36  ;;  %v2453_v57 = vadd.f32 %v2370_v19, %v7958_v25  ;;  %v2768_v35 = vpop.f32.mrf.mxu2  ;;  %v2270_v25 = vsel %vm1860_vm3, %v2267_v48, %v2269_v53  ;;  %v9496_v18 = vld [vmem:[#allocation15_spill] sm:$0xff]  ;;  %v2638_v19 = vor.u32 %v2637_v28, %v2634_v46 }
 0x272   : > { %v8150_v43 = vadd.f32 %v2763_v16, %v2453_v57  ;;  %v2639_v57 = vsel %vm2505_vm5, %v2629_v31, %v2638_v19 }
 0x274   : > { %3015 = vmatmul.bf16.gmra.mxu3 %v9495_v30  ;;  %v2271_v30 = vrot.slane %v7791_v11, 1 }
 0x275   : > { %2810 = vmatmul.bf16.gmra.mxu2 %v2630_v14 }
 0x277   : > { %v2028_v47 = vpop.f32.mrf.mxu3  ;;  %v2373_v36 = vpop.f32.mrf.mxu1 }
 0x278   : > { %v8156_v38 = vadd.f32 %v2028_v47, %v7996_v5  ;;  %v2454_v13 = vadd.f32 %v2373_v36, %v7974_v26  ;;  %v2771_v9 = vpop.f32.mrf.mxu2  ;;  %v6283_v26 = vld [vmem:[%s9353_s3 + $0x208] sm:$0xff] }
 0x279   : > { %4046 = vmatpush.bf16.msra.mxu2 %v6283_v26 }
 0x27a   : > { %2412 = vmatmul.bf16.gmra.mxu1 %v2270_v25  ;;  %v8160_v16 = vadd.f32 %v2766_v7, %v2454_v13  ;;  %v2272_v13 = vsel %vm1860_vm3, %v2269_v53, %v2271_v30  ;;  %v8186_v25 = vld [vmem:[#allocation2 + $0x80] sm:$0xff] }
 0x27b   : > { %v2641_v51 = vshrl.u32 %v8186_v25, 16  ;;  %v2644_v31 = vshll.u32 %v8186_v25, 16 }
 0x27d   : > { %v2643_v58 = vrot.slane %v2641_v51, 1 }
 0x27f   : > { %v2030_v34 = vpop.f32.mrf.mxu3  ;;  %v2375_v5 = vpop.f32.mrf.mxu1 }
 0x280   : > { %v8167_v0 = vadd.f32 %v2030_v34, %v8010_v2  ;;  %v2455_v48 = vadd.f32 %v2375_v5, %v7985_v63  ;;  %v2773_v7 = vpop.f32.mrf.mxu2  ;;  %v6275_v2 = vld [vmem:[%s9353_s3 + $0x1c8] sm:$0xff]  ;;  %v2646_v34 = vrot.slane %v2644_v31, 2 }
 0x281   : > { %3786 = vmatpush.bf16.msra.mxu1 %v6275_v2 }
 0x282   : > { %v8173_v54 = vadd.f32 %v2768_v35, %v2455_v48  ;;  %v2647_v53 = vor.u32 %v2646_v34, %v2643_v58  ;;  %v9497_v48 = vld [vmem:[#allocation24_spill] sm:$0xff] }
 0x284   : > { %3020 = vmatmul.bf16.gmra.mxu3 %v9496_v18  ;;  %v2648_v18 = vsel %vm2505_vm5, %v2638_v19, %v2647_v53 }
 0x285   : > { %2815 = vmatmul.bf16.gmra.mxu2 %v2639_v57 }
 0x287   : > { %v2033_v14 = vpop.f32.mrf.mxu3  ;;  %v2378_v47 = vpop.f32.mrf.mxu1 }
 0x288   : > { %v8182_v63 = vadd.f32 %v2033_v14, %v8023_v61  ;;  %v2456_v35 = vadd.f32 %v2378_v47, %v7994_v44  ;;  %v2776_v36 = vpop.f32.mrf.mxu2 }
 0x28a   : > { %2417 = vmatmul.bf16.gmra.mxu1 %v2272_v13  ;;  %v8190_v11 = vadd.f32 %v2771_v9, %v2456_v35  ;;  %v8206_v35 = vld [vmem:[#allocation2 + $0x88] sm:$0xff] }
 0x28b   : > { %v2653_v13 = vshll.u32 %v8206_v35, 16 }
 0x28f   : > { %v2035_v5 = vpop.f32.mrf.mxu3  ;;  %v2380_v46 = vpop.f32.mrf.mxu1 }
 0x290   : > { %v8193_v61 = vadd.f32 %v2035_v5, %v8034_v3  ;;  %v2457_v44 = vadd.f32 %v2380_v46, %v8006_v49  ;;  %v2778_v28 = vpop.f32.mrf.mxu2  ;;  %v2273_v3 = vrot.slane %v8162_v4, 1  ;;  %v9498_v46 = vld [vmem:[#allocation30_spill] sm:$0xff] }
 0x292   : > { %v8196_v26 = vadd.f32 %v2773_v7, %v2457_v44  ;;  %v2274_v49 = vsel %vm1860_vm3, %v2271_v30, %v2273_v3  ;;  %v2650_v7 = vshrl.u32 %v8206_v35, 16 }
 0x294   : > { %3025 = vmatmul.bf16.gmra.mxu3 %v9497_v48  ;;  %v2652_v51 = vrot.slane %v2650_v7, 1  ;;  %v2275_v48 = vrot.slane %v8186_v25, 1 }
 0x295   : > { %2820 = vmatmul.bf16.gmra.mxu2 %v2648_v18 }
 0x297   : > { %v2038_v2 = vpop.f32.mrf.mxu3  ;;  %v2383_v57 = vpop.f32.mrf.mxu1 }
 0x298   : > { %v8201_v9 = vadd.f32 %v2038_v2, %v8045_v42  ;;  %v2458_v14 = vadd.f32 %v2383_v57, %v8018_v33  ;;  %v2781_v47 = vpop.f32.mrf.mxu2  ;;  %v2655_v42 = vrot.slane %v2653_v13, 2 }
 0x29a   : > { %2422 = vmatmul.bf16.gmra.mxu1 %v2274_v49  ;;  %v8210_v19 = vadd.f32 %v2776_v36, %v2458_v14  ;;  %v2656_v30 = vor.u32 %v2655_v42, %v2652_v51  ;;  %v6282_v36 = vld [vmem:[%s9353_s3 + $0x200] sm:$0xff]  ;;  %v2276_v14 = vsel %vm1860_vm3, %v2273_v3, %v2275_v48  ;;  %v8232_v49 = vld [vmem:[#allocation2 + $0x90] sm:$0xff] }
 0x29b   : > { %4047 = vmatpush.bf16.msra.mxu2 %v6282_v36  ;;  %v2659_v25 = vshrl.u32 %v8232_v49, 16 }
 0x29c   : > { %v2657_v44 = vsel %vm2505_vm5, %v2647_v53, %v2656_v30  ;;  %v2662_v53 = vshll.u32 %v8232_v49, 16 }
 0x29e   : > { %v2664_v13 = vrot.slane %v2662_v53, 2 }
 0x29f   : > { %v2040_v31 = vpop.f32.mrf.mxu3  ;;  %v2385_v4 = vpop.f32.mrf.mxu1 }
 0x2a0   : > { %v8213_v58 = vadd.f32 %v2040_v31, %v8056_v52  ;;  %v2459_v33 = vadd.f32 %v2385_v4, %v8032_v6  ;;  %v2783_v34 = vpop.f32.mrf.mxu2 }
 0x2a2   : > { %v8216_v5 = vadd.f32 %v2778_v28, %v2459_v33  ;;  %v6274_v28 = vld [vmem:[%s9353_s3 + $0x1c0] sm:$0xff] }
 0x2a3   : > { %3787 = vmatpush.bf16.msra.mxu1 %v6274_v28 }
 0x2a4   : > { %3030 = vmatmul.bf16.gmra.mxu3 %v9498_v46  ;;  %v9499_v46 = vld [vmem:[#allocation33_spill] sm:$0xff] }
 0x2a5   : > { %2825 = vmatmul.bf16.gmra.mxu2 %v2657_v44 }
 0x2a7   : > { %v2043_v52 = vpop.f32.mrf.mxu3  ;;  %v2388_v6 = vpop.f32.mrf.mxu1 }
 0x2a8   : > { %v8225_v18 = vadd.f32 %v2043_v52, %v8069_v15  ;;  %v2460_v2 = vadd.f32 %v2388_v6, %v8043_v62  ;;  %v2786_v57 = vpop.f32.mrf.mxu2  ;;  %v2661_v15 = vrot.slane %v2659_v25, 1  ;;  %v9500_v52 = vld [vmem:[#allocation51_spill] sm:$0xff] }
 0x2aa   : > { %v8236_v7 = vadd.f32 %v2781_v47, %v2460_v2  ;;  %2427 = vmatmul.bf16.gmra.mxu1 %v2276_v14  ;;  %v2665_v4 = vor.u32 %v2664_v13, %v2661_v15  ;;  %v2277_v47 = vrot.slane %v8206_v35, 1  ;;  %v9501_v14 = vld [vmem:[#allocation16_spill] sm:$0xff]  ;;  %v9502_v13 = vld [vmem:[#allocation54_spill] sm:$0xff] }
 0x2ab   : > { %v2671_v25 = vshll.u32 %v9501_v14, 16 }
 0x2ac   : > { %v2666_v36 = vsel %vm2505_vm5, %v2656_v30, %v2665_v4 }
 0x2ad   : > { %v2673_v35 = vrot.slane %v2671_v25, 2 }
 0x2af   : > { %v2045_v51 = vpop.f32.mrf.mxu3  ;;  %v2390_v62 = vpop.f32.mrf.mxu1 }
 0x2b0   : > { %v8239_v42 = vadd.f32 %v2045_v51, %v8086_v37  ;;  %v2461_v31 = vadd.f32 %v2390_v62, %v8054_v24  ;;  %v2788_v3 = vpop.f32.mrf.mxu2  ;;  %v2278_v24 = vsel %vm1860_vm3, %v2275_v48, %v2277_v47  ;;  %v9503_v48 = vld [vmem:[#allocation36_spill] sm:$0xff] }
 0x2b2   : > { %v8242_v33 = vadd.f32 %v2783_v34, %v2461_v31  ;;  %v2668_v34 = vshrl.u32 %v9501_v14, 16 }
 0x2b4   : > { %3035 = vmatmul.bf16.gmra.mxu3 %v9499_v46  ;;  %v2670_v30 = vrot.slane %v2668_v34, 1 }
 0x2b5   : > { %2830 = vmatmul.bf16.gmra.mxu2 %v2666_v36 }
 0x2b6   : > { %v2674_v46 = vor.u32 %v2673_v35, %v2670_v30 }
 0x2b7   : > { %v2048_v44 = vpop.f32.mrf.mxu3  ;;  %v2393_v37 = vpop.f32.mrf.mxu1 }
 0x2b8   : > { %v8248_v6 = vadd.f32 %v2048_v44, %v9500_v52  ;;  %v2462_v28 = vadd.f32 %v2393_v37, %v8064_v22  ;;  %v2791_v2 = vpop.f32.mrf.mxu2  ;;  %v2675_v44 = vsel %vm2505_vm5, %v2665_v4, %v2674_v46  ;;  %v9504_v37 = vld [vmem:[#allocation56_spill] sm:$0xff] }
 0x2ba   : > { %2432 = vmatmul.bf16.gmra.mxu1 %v2278_v24  ;;  %v8254_v53 = vadd.f32 %v2786_v57, %v2462_v28  ;;  %v2279_v57 = vrot.slane %v8232_v49, 1 }
 0x2bf   : > { %v2050_v15 = vpop.f32.mrf.mxu3  ;;  %v2395_v62 = vpop.f32.mrf.mxu1 }
 0x2c0   : > { %v8257_v51 = vadd.f32 %v2050_v15, %v9502_v13  ;;  %v2463_v31 = vadd.f32 %v2395_v62, %v8084_v45  ;;  %v2793_v22 = vpop.f32.mrf.mxu2  ;;  %v2280_v45 = vsel %vm1860_vm3, %v2277_v47, %v2279_v57 }
 0x2c2   : > { %v8260_v36 = vadd.f32 %v2788_v3, %v2463_v31  ;;  %v2135_v3 = vld [vmem:[#allocation2 + $0x98] sm:$0x1] }
 0x2c3   : > { %v2226_v30 = vunpack.c.l.b16 %v2135_v3 }
 0x2c4   : > { %3040 = vmatmul.bf16.gmra.mxu3 %v9503_v48  ;;  %v9506_v48 = vld [vmem:[#allocation11_spill] sm:$0xff] }
 0x2c5   : > { %2835 = vmatmul.bf16.gmra.mxu2 %v2675_v44  ;;  %v2245_v62 = vpack.c.b16 %v2226_v30, %v2226_v30 }
 0x2c7   : > { %v2053_v52 = vpop.f32.mrf.mxu3  ;;  %v2398_v24 = vpop.f32.mrf.mxu1  ;;  %v2281_v46 = vrot.slane %v2245_v62, 1 }
 0x2c8   : > { %v8266_v28 = vadd.f32 %v2053_v52, %v9504_v37  ;;  %v2464_v14 = vadd.f32 %v2398_v24, %v8095_v50  ;;  %v2796_v34 = vpop.f32.mrf.mxu2  ;;  %v9505_v50 = vld [vmem:[#allocation39_spill] sm:$0xff] }
 0x2c9   : > { %v2282_v37 = vsel %vm1860_vm3, %v2279_v57, %v2281_v46 }
 0x2ca   : > { %2437 = vmatmul.bf16.gmra.mxu1 %v2280_v45  ;;  %v8270_v25 = vadd.f32 %v2791_v2, %v2464_v14 }
 0x2cf   : > { %v2055_v35 = vpop.f32.mrf.mxu3  ;;  %v2400_v49 = vpop.f32.mrf.mxu1 }
 0x2d0   : > { %v8273_v4 = vadd.f32 %v2055_v35, %v7851_v20  ;;  %v2465_v15 = vadd.f32 %v2400_v49, %v8105_v41  ;;  %v2798_v13 = vpop.f32.mrf.mxu2 }
 0x2d2   : > { %v8276_v31 = vadd.f32 %v2793_v22, %v2465_v15 }
 0x2d4   : > { %3045 = vmatmul.bf16.gmra.mxu3 %v9505_v50 }
 0x2d5   : > { %4048 = vmatmul.bf16.vlgmr.msra.gmra.mxu2 %v9506_v48 }
 0x2d7   : > { %v2058_v47 = vpop.f32.mrf.mxu3  ;;  %v2403_v44 = vpop.f32.mrf.mxu1 }
 0x2d8   : > { %v8281_v2 = vadd.f32 %v2058_v47, %v7866_v1  ;;  %v2466_v20 = vadd.f32 %v2403_v44, %v8114_v21  ;;  %v2801_v52 = vpop.f32.mrf.mxu2  ;;  %v9507_v1 = vld [vmem:[#allocation42_spill] sm:$0xff] }
 0x2d9   : > { %v9508_v21 = vld [vmem:[#allocation18_spill] sm:$0xff] }
 0x2da   : > { %2442 = vmatmul.bf16.gmra.mxu1 %v2282_v37  ;;  %v8285_v41 = vadd.f32 %v2796_v34, %v2466_v20  ;;  %v9511_v20 = vld [vmem:[#allocation25_spill] sm:$0xff] }
 0x2df   : > { %v2060_v22 = vpop.f32.mrf.mxu3  ;;  %v2405_v14 = vpop.f32.mrf.mxu1 }
 0x2e0   : > { %v8288_v24 = vadd.f32 %v2060_v22, %v7879_v40  ;;  %v2467_v45 = vadd.f32 %v2405_v14, %v8126_v23  ;;  %v2803_v3 = vpop.f32.mrf.mxu2  ;;  %v9509_v40 = vld [vmem:[#allocation19_spill] sm:$0xff] }
 0x2e1   : > { %v9512_v22 = vld [vmem:[#allocation23_spill] sm:$0xff] }
 0x2e2   : > { %v8291_v30 = vadd.f32 %v2798_v13, %v2467_v45 }
 0x2e4   : > { %3050 = vmatmul.bf16.gmra.mxu3 %v9507_v1 }
 0x2e5   : > { %4053 = vmatmul.bf16.gmra.mxu2 %v9508_v21 }
 0x2e7   : > { %v3011_v35 = vpop.f32.mrf.mxu3  ;;  %v2408_v34 = vpop.f32.mrf.mxu1 }
 0x2e8   : > { %v8296_v57 = vadd.f32 %v3011_v35, %v8101_v55  ;;  %v2468_v49 = vadd.f32 %v2408_v34, %v8138_v17  ;;  %v2806_v15 = vpop.f32.mrf.mxu2  ;;  %v6315_v55 = vld [vmem:[%s9361_s11 + $0x38] sm:$0xff] }
 0x2e9   : > { %v9510_v17 = vld [vmem:[#allocation45_spill] sm:$0xff]  ;;  %4995 = vmatpush.bf16.msra.mxu0 %v6315_v55 }
 0x2ea   : > { %3788 = vmatmul.bf16.vlgmr.msra.gmra.mxu1 %v9509_v40  ;;  %v8300_v62 = vadd.f32 %v2801_v52, %v2468_v49  ;;  %v9514_v40 = vld [vmem:[#allocation31_spill] sm:$0xff] }
 0x2ef   : > { %v3013_v23 = vpop.f32.mrf.mxu3  ;;  %v2410_v50 = vpop.f32.mrf.mxu1 }
 0x2f0   : > { %v8303_v13 = vadd.f32 %v3013_v23, %v8109_v12  ;;  %v2469_v46 = vadd.f32 %v2410_v50, %v8147_v10  ;;  %v2808_v47 = vpop.f32.mrf.mxu2 }
 0x2f2   : > { %v8309_v48 = vadd.f32 %v2803_v3, %v2469_v46 }
 0x2f4   : > { %3055 = vmatmul.bf16.gmra.mxu3 %v9510_v17 }
 0x2f5   : > { %4058 = vmatmul.bf16.gmra.mxu2 %v9511_v20 }
 0x2f7   : > { %v3016_v44 = vpop.f32.mrf.mxu3  ;;  %v2413_v12 = vpop.f32.mrf.mxu1 }
 0x2f8   : > { %v8314_v52 = vadd.f32 %v3016_v44, %v8120_v8  ;;  %v2470_v37 = vadd.f32 %v2413_v12, %v8156_v38  ;;  %v2811_v10 = vpop.f32.mrf.mxu2  ;;  %v9513_v8 = vld [vmem:[#allocation48_spill] sm:$0xff] }
 0x2fa   : > { %3793 = vmatmul.bf16.gmra.mxu1 %v9512_v22  ;;  %v8318_v14 = vadd.f32 %v2806_v15, %v2470_v37  ;;  %v9517_v37 = vld [vmem:[#allocation34_spill] sm:$0xff] }
 0x2ff   : > { %v3018_v45 = vpop.f32.mrf.mxu3  ;;  %v2415_v1 = vpop.f32.mrf.mxu1 }
 0x300   : > { %v8321_v3 = vadd.f32 %v3018_v45, %v8132_v32  ;;  %v2471_v35 = vadd.f32 %v2415_v1, %v8167_v0  ;;  %v2813_v21 = vpop.f32.mrf.mxu2  ;;  %v9515_v32 = vld [vmem:[#allocation27_spill] sm:$0xff]  ;;  %v9518_v45 = vld [vmem:[#allocation32_spill] sm:$0xff] }
 0x302   : > { %v8324_v34 = vadd.f32 %v2808_v47, %v2471_v35 }
 0x304   : > { %3060 = vmatmul.bf16.gmra.mxu3 %v9513_v8 }
 0x305   : > { %4063 = vmatmul.bf16.gmra.mxu2 %v9514_v40 }
 0x307   : > { %v3021_v49 = vpop.f32.mrf.mxu3  ;;  %v2418_v15 = vpop.f32.mrf.mxu1 }
 0x308   : > { %v8329_v38 = vadd.f32 %v3021_v49, %v8144_v56  ;;  %v2472_v23 = vadd.f32 %v2418_v15, %v8182_v63  ;;  %v2816_v50 = vpop.f32.mrf.mxu2  ;;  %v9516_v56 = vld [vmem:[#allocation52_spill] sm:$0xff]  ;;  %v9519_v15 = vld [vmem:[#allocation57_spill] sm:$0xff] }
 0x309   : > { %v6314_v63 = vld [vmem:[%s9361_s11 + $0x30] sm:$0xff] }
 0x30a   : > { %3798 = vmatmul.bf16.gmra.mxu1 %v9515_v32  ;;  %v8333_v46 = vadd.f32 %v2811_v10, %v2472_v23  ;;  %4996 = vmatpush.bf16.msra.mxu0 %v6314_v63  ;;  %v9520_v32 = vld [vmem:[#allocation37_spill] sm:$0xff] }
 0x30f   : > { %v3023_v0 = vpop.f32.mrf.mxu3  ;;  %v2420_v55 = vpop.f32.mrf.mxu1 }
 0x310   : > { %v8336_v47 = vadd.f32 %v3023_v0, %v8150_v43  ;;  %v2473_v17 = vadd.f32 %v2420_v55, %v8193_v61  ;;  %v2818_v44 = vpop.f32.mrf.mxu2 }
 0x312   : > { %v8339_v20 = vadd.f32 %v2813_v21, %v2473_v17 }
 0x314   : > { %3065 = vmatmul.bf16.gmra.mxu3 %v9516_v56 }
 0x315   : > { %4068 = vmatmul.bf16.gmra.mxu2 %v9517_v37  ;;  %v8372_v37 = vpop.f32.mrf.mxu0 }
 0x317   : > { %v3026_v12 = vpop.f32.mrf.mxu3  ;;  %v2423_v43 = vpop.f32.mrf.mxu1 }
 0x318   : > { %v8347_v10 = vadd.f32 %v3026_v12, %v8160_v16  ;;  %v2474_v22 = vadd.f32 %v2423_v43, %v8201_v9  ;;  %v2821_v61 = vpop.f32.mrf.mxu2 }
 0x31a   : > { %3803 = vmatmul.bf16.gmra.mxu1 %v9518_v45  ;;  %v8351_v1 = vadd.f32 %v2816_v50, %v2474_v22  ;;  %v9523_v22 = vld [vmem:[#allocation40_spill] sm:$0xff] }
 0x31f   : > { %v3028_v35 = vpop.f32.mrf.mxu3  ;;  %v2425_v8 = vpop.f32.mrf.mxu1 }
 0x320   : > { %v8354_v21 = vadd.f32 %v3028_v35, %v8173_v54  ;;  %v2475_v49 = vadd.f32 %v2425_v8, %v8213_v58  ;;  %v2823_v40 = vpop.f32.mrf.mxu2  ;;  %v9521_v54 = vld [vmem:[#allocation35_spill] sm:$0xff]  ;;  %v9524_v8 = vld [vmem:[#allocation38_spill] sm:$0xff] }
 0x322   : > { %v8358_v16 = vadd.f32 %v2818_v44, %v2475_v49  ;;  %v8386_v49 = vpop.f32.mrf.mxu0 }
 0x324   : > { %3070 = vmatmul.bf16.gmra.mxu3 %v9519_v15 }
 0x325   : > { %4073 = vmatmul.bf16.gmra.mxu2 %v9520_v32 }
 0x327   : > { %v3031_v23 = vpop.f32.mrf.mxu3  ;;  %v2428_v50 = vpop.f32.mrf.mxu1 }
 0x328   : > { %v8362_v9 = vadd.f32 %v3031_v23, %v8190_v11  ;;  %v2476_v0 = vadd.f32 %v2428_v50, %v8225_v18  ;;  %v2826_v55 = vpop.f32.mrf.mxu2  ;;  %v9522_v11 = vld [vmem:[#allocation58_spill] sm:$0xff]  ;;  %v9526_v50 = vld [vmem:[#allocation4_spill] sm:$0xff] }
 0x32a   : > { %3808 = vmatmul.bf16.gmra.mxu1 %v9521_v54  ;;  %v8366_v17 = vadd.f32 %v2821_v61, %v2476_v0  ;;  %v8397_v54 = vpop.f32.mrf.mxu0 }
 0x32f   : > { %v3033_v58 = vpop.f32.mrf.mxu3  ;;  %v2430_v44 = vpop.f32.mrf.mxu1 }
 0x330   : > { %v8369_v56 = vadd.f32 %v3033_v58, %v8196_v26  ;;  %v2477_v63 = vadd.f32 %v2430_v44, %v8239_v42  ;;  %v2828_v12 = vpop.f32.mrf.mxu2  ;;  %v6313_v42 = vld [vmem:[%s9361_s11 + $0x28] sm:$0xff] }
 0x331   : > { %4997 = vmatpush.bf16.msra.mxu0 %v6313_v42  ;;  %v9528_v44 = vld [vmem:[#allocation43_spill] sm:$0xff] }
 0x332   : > { %v8375_v43 = vadd.f32 %v2823_v40, %v2477_v63  ;;  %v9531_v42 = vld [vmem:[#allocation7_spill] sm:$0xff] }
 0x334   : > { %3075 = vmatmul.bf16.gmra.mxu3 %v9522_v11 }
 0x335   : > { %4078 = vmatmul.bf16.gmra.mxu2 %v9523_v22 }
 0x337   : > { %v3036_v18 = vpop.f32.mrf.mxu3  ;;  %v2433_v45 = vpop.f32.mrf.mxu1 }
 0x338   : > { %v8379_v61 = vadd.f32 %v3036_v18, %v8210_v19  ;;  %v2478_v26 = vadd.f32 %v2433_v45, %v8248_v6  ;;  %v2831_v35 = vpop.f32.mrf.mxu2  ;;  %v8408_v45 = vpop.f32.mrf.mxu0 }
 0x33a   : > { %3813 = vmatmul.bf16.gmra.mxu1 %v9524_v8  ;;  %v8388_v40 = vadd.f32 %v2826_v55, %v2478_v26 }
 0x33c   : > { %9525 = vst [vmem:[#allocation10_spill] sm:$0xff] %v8388_v40 }
 0x33f   : > { %v3038_v15 = vpop.f32.mrf.mxu3  ;;  %v2435_v19 = vpop.f32.mrf.mxu1 }
 0x340   : > { %v8391_v23 = vadd.f32 %v3038_v15, %v8216_v5  ;;  %v2479_v32 = vadd.f32 %v2435_v19, %v8257_v51  ;;  %v2833_v6 = vpop.f32.mrf.mxu2  ;;  %v9529_v5 = vld [vmem:[#allocation41_spill] sm:$0xff]  ;;  %v9533_v19 = vld [vmem:[#allocation46_spill] sm:$0xff] }
 0x342   : > { %v8395_v0 = vadd.f32 %v2828_v12, %v2479_v32 }
 0x344   : > { %3080 = vmatmul.bf16.gmra.mxu3 %v9526_v50  ;;  %9527 = vst [vmem:[#allocation6_spill] sm:$0xff] %v8395_v0 }
 0x345   : > { %4083 = vmatmul.bf16.gmra.mxu2 %v9528_v44  ;;  %v8419_v44 = vpop.f32.mrf.mxu0 }
 0x347   : > { %v8399_v58 = vpop.f32.mrf.mxu3  ;;  %v2438_v55 = vpop.f32.mrf.mxu1 }
 0x348   : > { %v2480_v63 = vadd.f32 %v2438_v55, %v8266_v28  ;;  %v2836_v11 = vpop.f32.mrf.mxu2  ;;  %v9534_v55 = vld [vmem:[#allocation44_spill] sm:$0xff] }
 0x34a   : > { %3818 = vmatmul.bf16.gmra.mxu1 %v9529_v5  ;;  %v8404_v18 = vadd.f32 %v2831_v35, %v2480_v63 }
 0x34c   : > { %9530 = vst [vmem:[#allocation9_spill] sm:$0xff] %v8404_v18  ;;  %v8705_v18 = vld [vmem:[%s9354_s4] ss:$0 sm:$0xff] }
 0x34f   : > { %v8406_v51 = vpop.f32.mrf.mxu3  ;;  %v2440_v22 = vpop.f32.mrf.mxu1 }
 0x350   : > { %v2481_v12 = vadd.f32 %v2440_v22, %v8273_v4  ;;  %v2838_v26 = vpop.f32.mrf.mxu2 }
 0x352   : > { %v8412_v8 = vadd.f32 %v2833_v6, %v2481_v12 }
 0x354   : > { %3085 = vmatmul.bf16.gmra.mxu3 %v9531_v42  ;;  %9532 = vst [vmem:[#allocation15_spill] sm:$0xff] %v8412_v8  ;;  %v8435_v42 = vpop.f32.mrf.mxu0 }
 0x355   : > { %4088 = vmatmul.bf16.gmra.mxu2 %v9533_v19  ;;  %v9538_v19 = vld [vmem:[#allocation49_spill] sm:$0xff] }
 0x357   : > { %v3046_v15 = vpop.f32.mrf.mxu3  ;;  %v2443_v35 = vpop.f32.mrf.mxu1 }
 0x358   : > { %v8416_v28 = vadd.f32 %v3046_v15, %v8254_v53  ;;  %v2482_v32 = vadd.f32 %v2443_v35, %v8281_v2  ;;  %v4049_v50 = vpop.f32.mrf.mxu2  ;;  %v4524_v53 = vld [vmem:[%s9357_s7 + $0x78] sm:$0xff]  ;;  %v6312_v2 = vld [vmem:[%s9361_s11 + $0x20] sm:$0xff] }
 0x359   : > { %4529 = vmatpush.msrb.mxu3 %v4524_v53  ;;  %4998 = vmatpush.bf16.msra.mxu0 %v6312_v2  ;;  %v9539_v53 = vld [vmem:[#allocation47_spill] sm:$0xff] }
 0x35a   : > { %3823 = vmatmul.bf16.gmra.mxu1 %v9534_v55  ;;  %v8422_v4 = vadd.f32 %v2836_v11, %v2482_v32  ;;  %v9536_v11 = vld [vmem:[#allocation13_spill] sm:$0xff] }
 0x35c   : > { %9535 = vst [vmem:[#allocation24_spill] sm:$0xff] %v8422_v4  ;;  %v8448_v2 = vpop.f32.mrf.mxu0 }
 0x35f   : > { %v3048_v63 = vpop.f32.mrf.mxu3  ;;  %v2445_v5 = vpop.f32.mrf.mxu1 }
 0x360   : > { %v8425_v6 = vadd.f32 %v3048_v63, %v8260_v36  ;;  %v2483_v22 = vadd.f32 %v2445_v5, %v8288_v24  ;;  %v4051_v12 = vpop.f32.mrf.mxu2  ;;  %v3486_v24 = vadd.f32 %v7881_v59, %v8296_v57 }
 0x362   : > { %v8437_v36 = vadd.f32 %v2838_v26, %v2483_v22  ;;  %v3487_v22 = vadd.f32 %v7903_v29, %v8303_v13  ;;  %v3488_v29 = vadd.f32 %v7918_v27, %v8314_v52 }
 0x364   : > { %3090 = vmatmul.bf16.gmra.mxu3 %v9536_v11  ;;  %9537 = vst [vmem:[#allocation30_spill] sm:$0xff] %v8437_v36 }
 0x365   : > { %4093 = vmatmul.bf16.gmra.mxu2 %v9538_v19  ;;  %v9540_v19 = vld [vmem:[#allocation20_spill] sm:$0xff] }
 0x367   : > { %v3051_v15 = vpop.f32.mrf.mxu3  ;;  %v3789_v32 = vpop.f32.mrf.mxu1 }
 0x368   : > { %v8443_v35 = vadd.f32 %v3051_v15, %v8270_v25  ;;  %v3879_v55 = vadd.f32 %v3789_v32, %v3486_v24  ;;  %v4054_v63 = vpop.f32.mrf.mxu2  ;;  %v4523_v25 = vld [vmem:[%s9357_s7 + $0x70] sm:$0xff] }
 0x369   : > { %4530 = vmatpush.msrb.mxu3 %v4523_v25  ;;  %v9541_v32 = vld [vmem:[#allocation53_spill] sm:$0xff] }
 0x36a   : > { %v8445_v5 = vadd.f32 %v4049_v50, %v3879_v55  ;;  %3828 = vmatmul.bf16.gmra.mxu1 %v9539_v53  ;;  %v8467_v55 = vpop.f32.mrf.mxu0 }
 0x36f   : > { %v3053_v26 = vpop.f32.mrf.mxu3  ;;  %v3791_v59 = vpop.f32.mrf.mxu1 }
 0x370   : > { %v8453_v11 = vadd.f32 %v3053_v26, %v8276_v31  ;;  %v3880_v57 = vadd.f32 %v3791_v59, %v3487_v22  ;;  %v4056_v15 = vpop.f32.mrf.mxu2 }
 0x372   : > { %v8458_v50 = vadd.f32 %v4051_v12, %v3880_v57  ;;  %v9542_v12 = vld [vmem:[#allocation50_spill] sm:$0xff]  ;;  %v3489_v57 = vadd.f32 %v7933_v60, %v8321_v3  ;;  %v3490_v60 = vadd.f32 %v7946_v39, %v8329_v38  ;;  %v9545_v39 = vld [vmem:[#allocation3_spill] sm:$0xff] }
 0x373   : > { %v3491_v38 = vadd.f32 %v9545_v39, %v8336_v47  ;;  %v9547_v47 = vld [vmem:[#allocation63_spill] sm:$0xff] }
 0x374   : > { %3095 = vmatmul.bf16.gmra.mxu3 %v9540_v19 }
 0x375   : > { %4098 = vmatmul.bf16.gmra.mxu2 %v9541_v32 }
 0x377   : > { %v3056_v24 = vpop.f32.mrf.mxu3  ;;  %v3794_v13 = vpop.f32.mrf.mxu1 }
 0x378   : > { %v8465_v31 = vadd.f32 %v3056_v24, %v8285_v41  ;;  %v3881_v53 = vadd.f32 %v3794_v13, %v3488_v29  ;;  %v4059_v26 = vpop.f32.mrf.mxu2  ;;  %v4522_v41 = vld [vmem:[%s9357_s7 + $0x68] sm:$0xff]  ;;  %v8480_v24 = vpop.f32.mrf.mxu0 }
 0x379   : > { %4531 = vmatpush.msrb.mxu3 %v4522_v41  ;;  %v9543_v29 = vld [vmem:[#allocation59_spill] sm:$0xff] }
 0x37a   : > { %v8469_v22 = vadd.f32 %v4054_v63, %v3881_v53  ;;  %3833 = vmatmul.bf16.gmra.mxu1 %v9542_v12  ;;  %v6311_v53 = vld [vmem:[%s9361_s11 + $0x18] sm:$0xff] }
 0x37b   : > { %4999 = vmatpush.bf16.msra.mxu0 %v6311_v53  ;;  %v3492_v53 = vadd.f32 %v9547_v47, %v8347_v10 }
 0x37f   : > { %v3058_v59 = vpop.f32.mrf.mxu3  ;;  %v3796_v27 = vpop.f32.mrf.mxu1 }
 0x380   : > { %v8475_v25 = vadd.f32 %v3058_v59, %v8291_v30  ;;  %v3882_v52 = vadd.f32 %v3796_v27, %v3489_v57  ;;  %v4061_v19 = vpop.f32.mrf.mxu2  ;;  %v8496_v57 = vpop.f32.mrf.mxu0 }
 0x382   : > { %v8482_v63 = vadd.f32 %v4056_v15, %v3882_v52  ;;  %v9544_v15 = vld [vmem:[#allocation55_spill] sm:$0xff] }
 0x385   : > { %4103 = vmatmul.bf16.gmra.mxu2 %v9543_v29 }
 0x387   : > { %v3061_v32 = vpop.f32.mrf.mxu3  ;;  %v3799_v3 = vpop.f32.mrf.mxu1 }
 0x388   : > { %v8488_v30 = vadd.f32 %v3061_v32, %v8300_v62  ;;  %v3883_v13 = vadd.f32 %v3799_v3, %v3490_v60  ;;  %v4064_v12 = vpop.f32.mrf.mxu2  ;;  %v4521_v32 = vld [vmem:[%s9357_s7 + $0x60] sm:$0xff]  ;;  %v8508_v60 = vpop.f32.mrf.mxu0 }
 0x389   : > { %4532 = vmatpush.msrb.mxu3 %v4521_v32 }
 0x38a   : > { %v8493_v59 = vadd.f32 %v4059_v26, %v3883_v13  ;;  %3838 = vmatmul.bf16.gmra.mxu1 %v9544_v15  ;;  %v9546_v13 = vld [vmem:[#allocation60_spill] sm:$0xff] }
 0x38f   : > { %v3063_v27 = vpop.f32.mrf.mxu3  ;;  %v3801_v52 = vpop.f32.mrf.mxu1 }
 0x390   : > { %v8501_v62 = vadd.f32 %v3063_v27, %v8309_v48  ;;  %v3884_v41 = vadd.f32 %v3801_v52, %v3491_v38  ;;  %v4066_v26 = vpop.f32.mrf.mxu2  ;;  %v9548_v52 = vld [vmem:[#allocation61_spill] sm:$0xff]  ;;  %v8524_v4 = vpop.f32.mrf.mxu0 }
 0x392   : > { %v8506_v29 = vadd.f32 %v4061_v19, %v3884_v41  ;;  %v9549_v41 = vld [vmem:[#allocation64_spill] sm:$0xff] }
 0x393   : > { %v3493_v32 = vadd.f32 %v9549_v41, %v8354_v21 }
 0x395   : > { %4108 = vmatmul.bf16.gmra.mxu2 %v9546_v13 }
 0x397   : > { %v3066_v3 = vpop.f32.mrf.mxu3  ;;  %v3804_v15 = vpop.f32.mrf.mxu1 }
 0x398   : > { %v8514_v48 = vadd.f32 %v3066_v3, %v8318_v14  ;;  %v3885_v27 = vadd.f32 %v3804_v15, %v3492_v53  ;;  %v4069_v39 = vpop.f32.mrf.mxu2  ;;  %v9550_v53 = vld [vmem:[#allocation5_spill] sm:$0xff]  ;;  %v3456_v41 = vpop.f32.mrf.mxu0 }
 0x39a   : > { %v8516_v38 = vadd.f32 %v4064_v12, %v3885_v27  ;;  %3843 = vmatmul.bf16.gmra.mxu1 %v9548_v52  ;;  %v9551_v12 = vld [vmem:[#allocation65_spill] sm:$0xff] }
 0x39b   : > { %v3494_v15 = vadd.f32 %v9551_v12, %v8362_v9 }
 0x39f   : > { %v3068_v19 = vpop.f32.mrf.mxu3  ;;  %v3806_v13 = vpop.f32.mrf.mxu1 }
 0x3a0   : > { %v8522_v36 = vadd.f32 %v3068_v19, %v8324_v34  ;;  %v3886_v10 = vadd.f32 %v3806_v13, %v3493_v32  ;;  %v4071_v14 = vpop.f32.mrf.mxu2  ;;  %v4520_v34 = vld [vmem:[%s9357_s7 + $0x58] sm:$0xff]  ;;  %v6310_v19 = vld [vmem:[%s9361_s11 + $0x10] sm:$0xff] }
 0x3a1   : > { %4533 = vmatpush.msrb.mxu3 %v4520_v34  ;;  %v9552_v13 = vld [vmem:[#allocation62_spill] sm:$0xff]  ;;  %5000 = vmatpush.bf16.msra.mxu0 %v6310_v19  ;;  %v9555_v34 = vld [vmem:[#allocation67_spill] sm:$0xff] }
 0x3a2   : > { %v8526_v3 = vadd.f32 %v4066_v26, %v3886_v10  ;;  %v3496_v8 = vadd.f32 %v9555_v34, %v8379_v61  ;;  %v3113_v61 = vadd.f32 %v8399_v58, %v8236_v7  ;;  %v9559_v7 = vld [vmem:[#allocation21_spill] sm:$0xff] }
 0x3a5   : > { %4113 = vmatmul.bf16.gmra.mxu2 %v9550_v53 }
 0x3a7   : > { %v3071_v47 = vpop.f32.mrf.mxu3  ;;  %v3809_v52 = vpop.f32.mrf.mxu1 }
 0x3a8   : > { %v3125_v27 = vadd.f32 %v3071_v47, %v8333_v46  ;;  %v3887_v21 = vadd.f32 %v3809_v52, %v3494_v15  ;;  %v4074_v26 = vpop.f32.mrf.mxu2  ;;  %v9553_v46 = vld [vmem:[#allocation66_spill] sm:$0xff]  ;;  %v9554_v52 = vld [vmem:[#allocation8_spill] sm:$0xff] }
 0x3a9   : > { %v3495_v10 = vadd.f32 %v9553_v46, %v8369_v56  ;;  %v9556_v56 = vld [vmem:[#allocation12_spill] sm:$0xff] }
 0x3aa   : > { %v8538_v32 = vadd.f32 %v4069_v39, %v3887_v21  ;;  %3848 = vmatmul.bf16.gmra.mxu1 %v9552_v13  ;;  %v8541_v9 = vadd.f32 %v3456_v41, %v3125_v27  ;;  %v4519_v27 = vld [vmem:[%s9357_s7 + $0x50] sm:$0xff] }
 0x3ab   : > { %4534 = vmatpush.msrb.mxu3 %v4519_v27 }
 0x3af   : > { %v3811_v47 = vpop.f32.mrf.mxu1 }
 0x3b0   : > { %v3888_v53 = vadd.f32 %v3811_v47, %v3495_v10  ;;  %v4076_v12 = vpop.f32.mrf.mxu2 }
 0x3b2   : > { %v8545_v15 = vadd.f32 %v4071_v14, %v3888_v53  ;;  %v9557_v14 = vld [vmem:[#allocation68_spill] sm:$0xff]  ;;  %v9558_v53 = vld [vmem:[#allocation14_spill] sm:$0xff] }
 0x3b3   : > { %v3497_v13 = vadd.f32 %v9557_v14, %v8391_v23  ;;  %v3114_v23 = vadd.f32 %v8406_v51, %v8242_v33  ;;  %v3500_v33 = vadd.f32 %v8397_v54, %v8416_v28  ;;  %v3522_v51 = vld [vmem:[#allocation2 + $0xa0] sm:$0x7] }
 0x3b5   : > { %4118 = vmatmul.bf16.gmra.mxu2 %v9554_v52  ;;  %v3498_v52 = vadd.f32 %v8372_v37, %v3113_v61  ;;  %v3499_v58 = vadd.f32 %v8386_v49, %v3114_v23  ;;  %v6309_v37 = vld [vmem:[%s9361_s11 + $0x8] sm:$0xff]  ;;  %v4517_v49 = vld [vmem:[%s9357_s7 + $0x40] sm:$0xff] }
 0x3b6   : > { %5001 = vmatpush.bf16.msra.mxu0 %v6309_v37 }
 0x3b7   : > { %v3814_v39 = vpop.f32.mrf.mxu1 }
 0x3b8   : > { %v3889_v21 = vadd.f32 %v3814_v39, %v3496_v8  ;;  %v4079_v19 = vpop.f32.mrf.mxu2  ;;  %v4518_v39 = vld [vmem:[%s9357_s7 + $0x48] sm:$0xff] }
 0x3b9   : > { %4535 = vmatpush.msrb.mxu3 %v4518_v39 }
 0x3ba   : > { %v8553_v41 = vadd.f32 %v4074_v26, %v3889_v21  ;;  %3853 = vmatmul.bf16.gmra.mxu1 %v9556_v56 }
 0x3bb   : > { %4536 = vmatpush.msrb.mxu3 %v4517_v49 }
 0x3bf   : > { %v3816_v46 = vpop.f32.mrf.mxu1 }
 0x3c0   : > { %v3890_v10 = vadd.f32 %v3816_v46, %v3497_v13  ;;  %v4081_v47 = vpop.f32.mrf.mxu2  ;;  %v9560_v46 = vld [vmem:[#allocation22_spill] sm:$0xff] }
 0x3c2   : > { %v8560_v8 = vadd.f32 %v4076_v12, %v3890_v10 }
 0x3c5   : > { %4123 = vmatmul.bf16.gmra.mxu2 %v9558_v53  ;;  %v3541_v53 = vunpack.c.l.b16 %v3522_v51 }
 0x3c7   : > { %v3819_v34 = vpop.f32.mrf.mxu1 }
 0x3c8   : > { %v3891_v26 = vadd.f32 %v3819_v34, %v3498_v52  ;;  %v4084_v21 = vpop.f32.mrf.mxu2  ;;  %v3542_v34 = vpack.c.b16 %v3541_v53, %v3541_v53  ;;  %v4516_v53 = vld [vmem:[%s9357_s7 + $0x38] sm:$0xff] }
 0x3c9   : > { %4537 = vmatpush.msrb.mxu3 %v4516_v53  ;;  %v6291_v53 = vld [vmem:[%s6667_s23 + $0x10] sm:$0xff] }
 0x3ca   : > { %v8569_v27 = vadd.f32 %v4079_v19, %v3891_v26  ;;  %3858 = vmatmul.bf16.gmra.mxu1 %v9559_v7  ;;  %v3501_v26 = vadd.f32 %v8408_v45, %v8425_v6  ;;  %v3972_v23 = vrot.slane %v3542_v34, 3  ;;  %v9564_v45 = vld [vmem:[#allocation29_spill] sm:$0xff]  ;;  %v3706_v6 = vshrl.u32 %v3542_v34, 16 }
 0x3cf   : > { %v3821_v12 = vpop.f32.mrf.mxu1 }
 0x3d0   : > { %v3892_v56 = vadd.f32 %v3821_v12, %v3499_v58  ;;  %v4086_v14 = vpop.f32.mrf.mxu2  ;;  %v9562_v58 = vld [vmem:[#allocation17_spill] sm:$0xff] }
 0x3d1   : > { %v9563_v12 = vrot.slane %v9562_v58, 3 }
 0x3d2   : > { %v8576_v13 = vadd.f32 %v4081_v47, %v3892_v56  ;;  %v9561_v47 = vld [vmem:[#allocation26_spill] sm:$0xff] }
 0x3d3   : > { %v3973_v56 = vsel %vm3936_vm2, %v9563_v12, %v3972_v23  ;;  %v9565_v23 = vld [vmem:[#allocation28_spill] sm:$0xff] }
 0x3d5   : > { %4128 = vmatmul.bf16.gmra.mxu2 %v9560_v46 }
 0x3d7   : > { %v3824_v19 = vpop.f32.mrf.mxu1 }
 0x3d8   : > { %v3893_v10 = vadd.f32 %v3824_v19, %v3500_v33  ;;  %v4089_v61 = vpop.f32.mrf.mxu2  ;;  %v3709_v19 = vshll.u32 %v3542_v34, 16 }
 0x3da   : > { %v8584_v52 = vadd.f32 %v4084_v21, %v3893_v10  ;;  %3863 = vmatmul.bf16.gmra.mxu1 %v9561_v47  ;;  %v3502_v21 = vadd.f32 %v8419_v44, %v8443_v35  ;;  %v6308_v44 = vld [vmem:[%s9361_s11] sm:$0xff]  ;;  %v3711_v47 = vrot.slane %v3709_v19, 3 }
 0x3db   : > { %5002 = vmatpush.bf16.msra.mxu0 %v6308_v44  ;;  %v8631_v44 = vpop.permute.xlu2 %4253 }
 0x3df   : > { %v3826_v39 = vpop.f32.mrf.mxu1 }
 0x3e0   : > { %v3894_v54 = vadd.f32 %v3826_v39, %v3501_v26  ;;  %v4091_v28 = vpop.f32.mrf.mxu2 }
 0x3e2   : > { %v8589_v7 = vadd.f32 %v4086_v14, %v3894_v54  ;;  %v3503_v14 = vadd.f32 %v8435_v42, %v8453_v11  ;;  %v3504_v42 = vadd.f32 %v8448_v2, %v8465_v31  ;;  %v4515_v2 = vld [vmem:[%s9357_s7 + $0x30] sm:$0xff] }
 0x3e3   : > { %4538 = vmatpush.msrb.mxu3 %v4515_v2 }
 0x3e5   : > { %4133 = vmatmul.bf16.gmra.mxu2 %v3973_v56  ;;  %v3505_v56 = vadd.f32 %v8467_v55, %v8475_v25  ;;  %v3507_v55 = vadd.f32 %v8496_v57, %v8501_v62  ;;  %v4768_v57 = vshrl.u32 %v6291_v53, 16  ;;  %v4771_v62 = vshll.u32 %v6291_v53, 16 }
 0x3e7   : > { %v3829_v37 = vpop.f32.mrf.mxu1 }
 0x3e8   : > { %v3895_v46 = vadd.f32 %v3829_v37, %v3502_v21  ;;  %v4094_v33 = vpop.f32.mrf.mxu2 }
 0x3ea   : > { %v8596_v51 = vadd.f32 %v4089_v61, %v3895_v46  ;;  %3868 = vmatmul.bf16.gmra.mxu1 %v9564_v45  ;;  %v3708_v61 = vrot.slane %v3706_v6, 2  ;;  %v3506_v46 = vadd.f32 %v8480_v24, %v8488_v30  ;;  %v4514_v24 = vld [vmem:[%s9357_s7 + $0x28] sm:$0xff]  ;;  %v8636_v30 = vpop.permute.xlu0 %4258 }
 0x3eb   : > { %4539 = vmatpush.msrb.mxu3 %v4514_v24  ;;  %v4513_v24 = vld [vmem:[%s9357_s7 + $0x20] sm:$0xff] }
 0x3ec   : > { %v3712_v34 = vor.u32 %v3711_v47, %v3708_v61  ;;  %v8638_v47 = vpop.f32.mrf.mxu3 }
 0x3ed   : > { %4540 = vmatpush.msrb.mxu3 %v4513_v24 }
 0x3ee   : > { %v3713_v58 = vsel %vm3543_vm4, %v9565_v23, %v3712_v34 }
 0x3ef   : > { %v3831_v10 = vpop.f32.mrf.mxu1 }
 0x3f0   : > { %v3896_v49 = vadd.f32 %v3831_v10, %v3503_v14  ;;  %v4096_v35 = vpop.f32.mrf.mxu2  ;;  %v6035_v10 = vld [vmem:[%s6667_s23 + $0x8] sm:$0xe] }
 0x3f2   : > { %v8607_v26 = vadd.f32 %v4091_v28, %v3896_v49  ;;  %v6290_v49 = vld [vmem:[%s6667_s23 + $0x8] sm:$0xf0] }
 0x3f3   : > { %v6036_v61 = vor.u32 %v6290_v49, %v6035_v10  ;;  %v8653_v10 = vpop.permute.xlu0 %4273 }
 0x3f7   : > { %v3834_v11 = vpop.f32.mrf.mxu1 }
 0x3f8   : > { %v3897_v39 = vadd.f32 %v3834_v11, %v3504_v42  ;;  %v4099_v54 = vpop.f32.mrf.mxu2  ;;  %v4760_v42 = vshrl.u32 %v6036_v61, 16  ;;  %v4763_v11 = vshll.u32 %v6036_v61, 16  ;;  %v6292_v61 = vld [vmem:[%s6667_s23 + $0x18] sm:$0xff] }
 0x3fa   : > { %v8613_v12 = vadd.f32 %v4094_v33, %v3897_v39  ;;  %3873 = vmatmul.bf16.gmra.mxu1 %v3713_v58  ;;  %v4770_v39 = vrot.slane %v4768_v57, 1  ;;  %v4762_v23 = vrot.slane %v4760_v42, 1  ;;  %v4765_v58 = vrot.slane %v4763_v11, 2 }
 0x3fb   : > { %v4777_v42 = vshrl.u32 %v6292_v61, 16  ;;  %v4780_v11 = vshll.u32 %v6292_v61, 16 }
 0x3ff   : > { %v3836_v28 = vpop.f32.mrf.mxu1 }
 0x400   : > { %v3898_v21 = vadd.f32 %v3836_v28, %v3505_v56  ;;  %v4101_v31 = vpop.f32.mrf.mxu2  ;;  %v3508_v56 = vadd.f32 %v8508_v60, %v8514_v48  ;;  %v8655_v60 = vpop.f32.mrf.mxu3  ;;  %v3509_v48 = vadd.f32 %v8524_v4, %v8522_v36  ;;  %v4782_v4 = vrot.slane %v4780_v11, 2 }
 0x402   : > { %v8620_v37 = vadd.f32 %v4096_v35, %v3898_v21  ;;  %v8644_v21 = vpop.permute.xlu1 %4263 }
 0x407   : > { %v3839_v33 = vpop.f32.mrf.mxu1 }
 0x408   : > { %v3899_v45 = vadd.f32 %v3839_v33, %v3506_v46  ;;  %v4104_v6 = vpop.f32.mrf.mxu2  ;;  %v4766_v46 = vor.u32 %v4765_v58, %v4762_v23  ;;  %v8646_v33 = vpop.f32.mrf.mxu0 }
 0x409   : > { %v8673_v23 = vpop.permute.xlu0 %4288  ;;  %v8675_v58 = vpop.f32.mrf.mxu3 }
 0x40a   : > { %v8624_v19 = vadd.f32 %v4099_v54, %v3899_v45  ;;  %v4773_v54 = vrot.slane %v4771_v62, 2  ;;  %v8663_v57 = vpop.permute.xlu1 %4278 }
 0x40c   : > { %v4774_v28 = vor.u32 %v4773_v54, %v4770_v39  ;;  %v4779_v54 = vrot.slane %v4777_v42, 1 }
 0x40f   : > { %v3841_v25 = vpop.f32.mrf.mxu1 }
 0x410   : > { %v3900_v14 = vadd.f32 %v3841_v25, %v3507_v55  ;;  %v4106_v35 = vpop.f32.mrf.mxu2  ;;  %v4775_v55 = vsel %vm2505_vm5, %v4766_v46, %v4774_v28  ;;  %v8669_v39 = vpop.f32.mrf.mxu0 }
 0x411   : > { %5003 = vmatmul.bf16.vlgmr.msra.gmra.mxu0 %v4775_v55  ;;  %v8691_v24 = vpop.permute.xlu0 %4303  ;;  %v8693_v42 = vpop.f32.mrf.mxu3 }
 0x412   : > { %v8640_v34 = vadd.f32 %v4101_v31, %v3900_v14  ;;  %v8651_v14 = vpop.permute.xlu2 %4268 }
 0x417   : > { %v3844_v2 = vpop.f32.mrf.mxu1 }
 0x418   : > { %v3901_v31 = vadd.f32 %v3844_v2, %v3508_v56  ;;  %v4109_v45 = vpop.f32.mrf.mxu2  ;;  %v4783_v56 = vor.u32 %v4782_v4, %v4779_v54 }
 0x41a   : > { %v8649_v25 = vadd.f32 %v4104_v6, %v3901_v31  ;;  %v8671_v36 = vpop.permute.xlu2 %4283 }
 0x41f   : > { %v3846_v49 = vpop.f32.mrf.mxu1 }
 0x420   : > { %v3902_v53 = vadd.f32 %v3846_v49, %v3509_v48  ;;  %v8665_v6 = vpop.f32.mrf.mxu2  ;;  %v8683_v48 = vpop.permute.xlu1 %4293 }
 0x421   : > { %9566 = vst [vmem:[#allocation33_spill] sm:$0xff] %v8665_v6  ;;  %v8685_v49 = vpop.f32.mrf.mxu0  ;;  %v8758_v6 = vadd.f32 %v8705_v18, %v8506_v29 }
 0x422   : > { %v8667_v62 = vadd.f32 %v4106_v35, %v3902_v53  ;;  %v4784_v35 = vsel %vm2505_vm5, %v4774_v28, %v4783_v56  ;;  %v8687_v53 = vpop.permute.xlu2 %4298 }
 0x423   : > { %5008 = vmatmul.bf16.gmra.mxu0 %v4784_v35 }
 0x427   : > { %v3849_v2 = vpop.f32.mrf.mxu1 }
 0x428   : > { %v3903_v46 = vadd.f32 %v3849_v2, %v8541_v9  ;;  %v8679_v31 = vpop.f32.mrf.mxu2  ;;  %v6293_v9 = vld [vmem:[%s6667_s23 + $0x20] sm:$0xff]  ;;  %v8698_v2 = vpop.permute.xlu1 %4308 }
 0x429   : > { %9567 = vst [vmem:[#allocation51_spill] sm:$0xff] %v8679_v31  ;;  %v4786_v28 = vshrl.u32 %v6293_v9, 16  ;;  %v4789_v54 = vshll.u32 %v6293_v9, 16  ;;  %v8700_v35 = vpop.f32.mrf.mxu0  ;;  %v4512_v9 = vld [vmem:[%s9357_s7 + $0x18] sm:$0xff] }
 0x42a   : > { %v8681_v55 = vadd.f32 %v4109_v45, %v3903_v46  ;;  %9570 = vst [vmem:[#allocation36_spill] sm:$0xff] %v8700_v35  ;;  %4541 = vmatpush.msrb.mxu3 %v4512_v9  ;;  %v8737_v9 = vadd.f32 %v8705_v18, %v8482_v63  ;;  %v6294_v35 = vld [vmem:[%s6667_s23 + $0x28] sm:$0xff] }
 0x42b   : > { %v4788_v45 = vrot.slane %v4786_v28, 1  ;;  %v4791_v4 = vrot.slane %v4789_v54, 2  ;;  %v8713_v28 = vpop.permute.xlu2 %4313  ;;  %v8717_v54 = vadd.f32 %v8705_v18, %v8458_v50 }
 0x42c   : > { %9568 = vst [vmem:[#allocation16_spill] sm:$0xff] %v8681_v55  ;;  %v4434_v63 = vmul.f32 %v8651_v14, %v8737_v9 }
 0x42d   : > { %v4792_v46 = vor.u32 %v4791_v4, %v4788_v45  ;;  %9571 = vst [vmem:[#allocation56_spill] sm:$0xff] %v8717_v54  ;;  %v8719_v45 = vpop.permute.xlu0 %4318  ;;  %v8721_v4 = vpop.f32.mrf.mxu3  ;;  %v4432_v50 = vmul.f32 %v8636_v30, %v8717_v54 }
 0x42e   : > { %9575 = vst [vmem:[#allocation18_spill] sm:$0xff] %v8737_v9 }
 0x42f   : > { %v8689_v61 = vpop.f32.mrf.mxu1  ;;  %v4793_v31 = vsel %vm2505_vm5, %v4783_v56, %v4792_v46  ;;  %v8725_v56 = vadd.f32 %v8705_v18, %v8445_v5 }
 0x430   : > { %v8696_v11 = vpop.f32.mrf.mxu2  ;;  %v8739_v40 = vpop.permute.xlu1 %4323 }
 0x431   : > { %9569 = vst [vmem:[#allocation54_spill] sm:$0xff] %v8696_v11  ;;  %v8729_v11 = vadd.f32 %v8705_v18, %v8469_v22  ;;  %v8747_v22 = vadd.f32 %v8705_v18, %v8493_v59  ;;  %v8752_v30 = vpop.f32.mrf.mxu0 }
 0x432   : > { %9572 = vst [vmem:[#allocation39_spill] sm:$0xff] %v8725_v56 }
 0x433   : > { %5013 = vmatmul.bf16.gmra.mxu0 %v4793_v31  ;;  %9573 = vst [vmem:[#allocation11_spill] sm:$0xff] %v8729_v11  ;;  %v4431_v31 = vmul.f32 %v8631_v44, %v8725_v56  ;;  %v4433_v5 = vmul.f32 %v8644_v21, %v8729_v11  ;;  %v4795_v44 = vshrl.u32 %v6294_v35, 16  ;;  %v4798_v56 = vshll.u32 %v6294_v35, 16  ;;  %v8760_v21 = vpop.permute.xlu2 %4328 }
 0x434   : > { %9576 = vst [vmem:[#allocation19_spill] sm:$0xff] %v8747_v22  ;;  %v4435_v59 = vmul.f32 %v8653_v10, %v8747_v22  ;;  %v4436_v35 = vmul.f32 %v8663_v57, %v8758_v6 }
 0x435   : > { %9578 = vst [vmem:[#allocation25_spill] sm:$0xff] %v8752_v30  ;;  %v4467_v54 = vadd.f32 %v4432_v50, %v4431_v31  ;;  %v8768_v50 = vpop.permute.xlu0 %4333  ;;  %v8770_v31 = vpop.f32.mrf.mxu3  ;;  %v4797_v14 = vrot.slane %v4795_v44, 1  ;;  %v4800_v9 = vrot.slane %v4798_v56, 2  ;;  %v8784_v30 = vadd.f32 %v8705_v18, %v8538_v32 }
 0x437   : > { %v8707_v0 = vpop.f32.mrf.mxu1  ;;  %v4468_v11 = vadd.f32 %v4467_v54, %v4433_v5  ;;  %v8776_v54 = vadd.f32 %v8705_v18, %v8526_v3  ;;  %v4801_v10 = vor.u32 %v4800_v9, %v4797_v14  ;;  %v4511_v3 = vld [vmem:[%s9357_s7 + $0x10] sm:$0xff] }
 0x438   : > { %v8731_v55 = vpop.f32.mrf.mxu2  ;;  %v4339_v57 = vpop.permute.xlu1 %4338  ;;  %4542 = vmatpush.msrb.mxu3 %v4511_v3 }
 0x439   : > { %9574 = vst [vmem:[#allocation42_spill] sm:$0xff] %v8731_v55  ;;  %v4469_v29 = vadd.f32 %v4468_v11, %v4434_v63  ;;  %v4802_v11 = vsel %vm2505_vm5, %v4792_v46, %v4801_v10  ;;  %v4438_v9 = vmul.f32 %v8673_v23, %v8776_v54  ;;  %v8798_v32 = vpop.f32.mrf.mxu0  ;;  %v4439_v46 = vmul.f32 %v8683_v48, %v8784_v30 }
 0x43b   : > { %v4470_v22 = vadd.f32 %v4469_v29, %v4435_v59  ;;  %v8804_v59 = vadd.f32 %v8705_v18, %v8553_v41  ;;  %v8818_v41 = vadd.f32 %v8705_v18, %v8569_v27 }
 0x43d   : > { %v4471_v63 = vadd.f32 %v4470_v22, %v4436_v35  ;;  %9580 = vst [vmem:[#allocation48_spill] sm:$0xff] %v8804_v59  ;;  %v4344_v22 = vpop.permute.xlu2 %4343  ;;  %v4349_v29 = vpop.permute.xlu0 %4348  ;;  %v4441_v48 = vmul.f32 %v8691_v24, %v8804_v59  ;;  %v4443_v27 = vmul.f32 %v8713_v28, %v8818_v41  ;;  %v8835_v59 = vadd.f32 %v8705_v18, %v8584_v52 }
 0x43e   : > { %v8812_v35 = vpop.f32.mrf.mxu3 }
 0x43f   : > { %v8749_v55 = vpop.f32.mrf.mxu1  ;;  %v4445_v52 = vmul.f32 %v8739_v40, %v8835_v59 }
 0x440   : > { %9577 = vst [vmem:[#allocation45_spill] sm:$0xff] %v8749_v55  ;;  %v8766_v55 = vadd.f32 %v8705_v18, %v8516_v38  ;;  %v8778_v5 = vpop.f32.mrf.mxu2  ;;  %v4354_v24 = vpop.permute.xlu1 %4353 }
 0x442   : > { %v4437_v38 = vmul.f32 %v8671_v36, %v8766_v55  ;;  %v8796_v36 = vadd.f32 %v8705_v18, %v8545_v15  ;;  %v8810_v15 = vadd.f32 %v8705_v18, %v8560_v8 }
 0x443   : > { %5018 = vmatmul.bf16.gmra.mxu0 %v4802_v11 }
 0x444   : > { %9579 = vst [vmem:[#allocation23_spill] sm:$0xff] %v8796_v36  ;;  %v4472_v44 = vadd.f32 %v4471_v63, %v4437_v38  ;;  %v4440_v23 = vmul.f32 %v8687_v53, %v8796_v36  ;;  %v6295_v53 = vld [vmem:[%s6667_s23 + $0x30] sm:$0xff]  ;;  %v4442_v8 = vmul.f32 %v8698_v2, %v8810_v15 }
 0x446   : > { %v4473_v14 = vadd.f32 %v4472_v44, %v4438_v9  ;;  %v8829_v9 = vadd.f32 %v8705_v18, %v8576_v13  ;;  %v4804_v44 = vshrl.u32 %v6295_v53, 16 }
 0x447   : > { %v8786_v56 = vpop.f32.mrf.mxu1 }
 0x448   : > { %v4474_v38 = vadd.f32 %v4473_v14, %v4439_v46  ;;  %v8820_v11 = vpop.f32.mrf.mxu2  ;;  %v4807_v46 = vshll.u32 %v6295_v53, 16  ;;  %v4806_v36 = vrot.slane %v4804_v44, 1  ;;  %v4444_v13 = vmul.f32 %v8719_v45, %v8829_v9  ;;  %v4510_v45 = vld [vmem:[%s9357_s7 + $0x8] sm:$0xff] }
 0x449   : > { %v8843_v53 = vadd.f32 %v8705_v18, %v8589_v7  ;;  %v8851_v44 = vadd.f32 %v8705_v18, %v8596_v51  ;;  %v8866_v51 = vadd.f32 %v8705_v18, %v8607_v26  ;;  %4543 = vmatpush.msrb.mxu3 %v4510_v45  ;;  %v8881_v45 = vadd.f32 %v8705_v18, %v8620_v37 }
 0x44a   : > { %v4475_v63 = vadd.f32 %v4474_v38, %v4440_v23  ;;  %v4809_v23 = vrot.slane %v4807_v46, 2  ;;  %v8837_v38 = vpop.f32.mrf.mxu0  ;;  %v3128_v37 = vadd.f32 %v8675_v58, %v8358_v16 }
 0x44b   : > { %9581 = vst [vmem:[#allocation31_spill] sm:$0xff] %v8851_v44  ;;  %v4446_v40 = vmul.f32 %v8760_v21, %v8843_v53  ;;  %v3126_v21 = vadd.f32 %v8638_v47, %v8339_v20  ;;  %v4448_v26 = vmul.f32 %v4339_v57, %v8866_v51  ;;  %v8892_v20 = vadd.f32 %v8705_v18, %v8624_v19  ;;  %v6296_v47 = vld [vmem:[%s6667_s23 + $0x38] sm:$0xff] }
 0x44c   : > { %v4476_v14 = vadd.f32 %v4475_v63, %v4441_v48  ;;  %v8845_v48 = vor.u32 %v4809_v23, %v4806_v36  ;;  %v4359_v63 = vpop.permute.xlu2 %4358  ;;  %9582 = vst [vmem:[#allocation27_spill] sm:$0xff] %v8866_v51  ;;  %v3129_v19 = vadd.f32 %v8693_v42, %v8366_v17  ;;  %v3513_v42 = vadd.f32 %v8685_v49, %v3128_v37 }
 0x44e   : > { %v4477_v2 = vadd.f32 %v4476_v14, %v4442_v8  ;;  %v4364_v8 = vpop.permute.xlu0 %4363  ;;  %v8855_v14 = vpop.f32.mrf.mxu3  ;;  %v4811_v7 = vsel %vm2505_vm5, %v4801_v10, %v8845_v48  ;;  %v4447_v10 = vmul.f32 %v8768_v50, %v8851_v44  ;;  %v3127_v50 = vadd.f32 %v8655_v60, %v8351_v1 }
 0x44f   : > { %v8822_v3 = vpop.f32.mrf.mxu1  ;;  %v4450_v1 = vmul.f32 %v4349_v29, %v8881_v45  ;;  %v8901_v60 = vadd.f32 %v8705_v18, %v8640_v34  ;;  %v4451_v29 = vmul.f32 %v4354_v24, %v8892_v20  ;;  %v9583_v24 = vld [vmem:[#allocation33_spill] sm:$0xff] }
 0x450   : > { %v4478_v28 = vadd.f32 %v4477_v2, %v4443_v27  ;;  %v8868_v27 = vpop.f32.mrf.mxu2  ;;  %v8874_v2 = vadd.f32 %v8705_v18, %v8613_v12 }
 0x452   : > { %v4479_v36 = vadd.f32 %v4478_v28, %v4444_v13  ;;  %v4369_v13 = vpop.permute.xlu1 %4368  ;;  %v4449_v12 = vmul.f32 %v4344_v22, %v8874_v2  ;;  %v4813_v22 = vshrl.u32 %v6296_v47, 16 }
 0x453   : > { %5023 = vmatmul.bf16.gmra.mxu0 %v4811_v7  ;;  %v8883_v7 = vpop.f32.mrf.mxu0 }
 0x454   : > { %v4480_v23 = vadd.f32 %v4479_v36, %v4445_v52  ;;  %v4374_v57 = vpop.permute.xlu2 %4373 }
 0x456   : > { %v4481_v28 = vadd.f32 %v4480_v23, %v4446_v40  ;;  %v3511_v23 = vadd.f32 %v8646_v33, %v3126_v21  ;;  %v4379_v51 = vpop.permute.xlu0 %4378  ;;  %v3093_v44 = vpop.f32.mrf.mxu3  ;;  %v3512_v33 = vadd.f32 %v8669_v39, %v3127_v50  ;;  %v8923_v50 = vadd.f32 %v8705_v18, %v8667_v62 }
 0x457   : > { %v8853_v46 = vpop.f32.mrf.mxu1 }
 0x458   : > { %v4482_v52 = vadd.f32 %v4481_v28, %v4447_v10  ;;  %v4816_v10 = vshll.u32 %v6296_v47, 16  ;;  %v3130_v28 = vadd.f32 %v8721_v4, %v8375_v43  ;;  %v3904_v16 = vadd.f32 %v8689_v61, %v3511_v23  ;;  %v8909_v58 = vpop.f32.mrf.mxu2  ;;  %v9584_v47 = vld [vmem:[#allocation45_spill] sm:$0xff] }
 0x459   : > { %v3905_v17 = vadd.f32 %v8707_v0, %v3512_v33  ;;  %v4452_v61 = vmul.f32 %v4359_v63, %v8901_v60  ;;  %v9586_v0 = vld [vmem:[#allocation10_spill] sm:$0xff] }
 0x45a   : > { %v4483_v40 = vadd.f32 %v4482_v52, %v4448_v26  ;;  %v4815_v26 = vrot.slane %v4813_v22, 1  ;;  %v4818_v34 = vrot.slane %v4816_v10, 2  ;;  %v8914_v52 = vadd.f32 %v8705_v18, %v8649_v25  ;;  %v4384_v39 = vpop.permute.xlu1 %4383  ;;  %v9585_v25 = vld [vmem:[#allocation36_spill] sm:$0xff] }
 0x45b   : > { %v3514_v23 = vadd.f32 %v9585_v25, %v3129_v19  ;;  %v3131_v49 = vadd.f32 %v8770_v31, %v9586_v0  ;;  %v3478_v33 = vpop.f32.mrf.mxu0  ;;  %v9592_v0 = vld [vmem:[#allocation9_spill] sm:$0xff] }
 0x45c   : > { %v4484_v21 = vadd.f32 %v4483_v40, %v4449_v12  ;;  %v8919_v4 = vor.u32 %v4818_v34, %v4815_v26  ;;  %v4164_v12 = vadd.f32 %v9583_v24, %v3904_v16  ;;  %v3906_v40 = vadd.f32 %v9584_v47, %v3513_v42  ;;  %v9589_v26 = vld [vmem:[#allocation51_spill] sm:$0xff]  ;;  %v9590_v42 = vld [vmem:[#allocation6_spill] sm:$0xff] }
 0x45d   : > { %v4453_v62 = vmul.f32 %v4364_v8, %v8914_v52  ;;  %v4165_v19 = vadd.f32 %v9589_v26, %v3905_v17  ;;  %v3907_v34 = vadd.f32 %v8786_v56, %v3514_v23  ;;  %v3132_v31 = vadd.f32 %v8812_v35, %v9590_v42  ;;  %v9591_v8 = vld [vmem:[#allocation54_spill] sm:$0xff]  ;;  %v9593_v56 = vld [vmem:[#allocation15_spill] sm:$0xff] }
 0x45e   : > { %v4485_v43 = vadd.f32 %v4484_v21, %v4450_v1  ;;  %v9587_v1 = vld [vmem:[#allocation25_spill] sm:$0xff]  ;;  %v4820_v10 = vsel %vm2505_vm5, %v8845_v48, %v8919_v4  ;;  %v9588_v21 = vld [vmem:[#allocation16_spill] sm:$0xff]  ;;  %v8945_v48 = vadd.f32 %v8705_v18, %v4164_v12  ;;  %v4166_v24 = vadd.f32 %v9591_v8, %v3906_v40  ;;  %v4394_v25 = vpop.permute.xlu0 %4393 }
 0x45f   : > { %v8887_v36 = vpop.f32.mrf.mxu1  ;;  %v3515_v63 = vadd.f32 %v9587_v1, %v3130_v28  ;;  %v8937_v16 = vadd.f32 %v8705_v18, %v9588_v21  ;;  %v4389_v28 = vpop.permute.xlu2 %4388  ;;  %v3133_v17 = vadd.f32 %v8855_v14, %v9592_v0  ;;  %v3134_v23 = vadd.f32 %v3093_v44, %v9593_v56 }
 0x460   : > { %v4486_v37 = vadd.f32 %v4485_v43, %v4451_v29  ;;  %v4454_v43 = vmul.f32 %v4369_v13, %v8923_v50  ;;  %v3096_v1 = vpop.f32.mrf.mxu3  ;;  %v3516_v35 = vadd.f32 %v8798_v32, %v3131_v49  ;;  %v8955_v12 = vadd.f32 %v8705_v18, %v4165_v19  ;;  %v6297_v19 = vld [vmem:[%s6667_s23 + $0x40] sm:$0xff] }
 0x461   : > { %v3908_v47 = vadd.f32 %v8822_v3, %v3515_v63  ;;  %v4455_v13 = vmul.f32 %v4374_v57, %v8937_v16  ;;  %v3517_v63 = vadd.f32 %v8837_v38, %v3132_v31  ;;  %v4456_v44 = vmul.f32 %v4379_v51, %v8945_v48 }
 0x462   : > { %v4487_v29 = vadd.f32 %v4486_v37, %v4452_v61  ;;  %v9594_v37 = vld [vmem:[#allocation42_spill] sm:$0xff]  ;;  %v3909_v3 = vadd.f32 %v8853_v46, %v3516_v35  ;;  %v8962_v21 = vadd.f32 %v8705_v18, %v4166_v24  ;;  %v3519_v26 = vadd.f32 %v3478_v33, %v3134_v23  ;;  %v4399_v38 = vpop.permute.xlu1 %4398 }
 0x463   : > { %5028 = vmatmul.bf16.gmra.mxu0 %v4820_v10  ;;  %v4167_v40 = vadd.f32 %v9594_v37, %v3907_v34  ;;  %v4131_v10 = vpop.f32.mrf.mxu2  ;;  %v4168_v32 = vadd.f32 %v8778_v5, %v3908_v47  ;;  %v3910_v57 = vadd.f32 %v8887_v36, %v3517_v63  ;;  %v4509_v46 = vld [vmem:[%s9357_s7] sm:$0xff]  ;;  %v9595_v34 = vld [vmem:[#allocation24_spill] sm:$0xff]  ;;  %v4457_v31 = vmul.f32 %v4384_v39, %v8955_v12 }
 0x464   : > { %v4488_v61 = vadd.f32 %v4487_v29, %v4453_v62  ;;  %v3518_v62 = vadd.f32 %v8883_v7, %v3133_v17  ;;  %v3135_v42 = vadd.f32 %v3096_v1, %v9595_v34  ;;  %4544 = vmatpush.msrb.mxu3 %v4509_v46  ;;  %v4169_v5 = vadd.f32 %v8820_v11, %v3909_v3 }
 0x465   : > { %v8974_v29 = vadd.f32 %v8705_v18, %v4167_v40  ;;  %v4822_v7 = vshrl.u32 %v6297_v19, 16  ;;  %v4825_v33 = vshll.u32 %v6297_v19, 16  ;;  %v4458_v24 = vmul.f32 %v4389_v28, %v8962_v21 }
 0x466   : > { %v4489_v14 = vadd.f32 %v4488_v61, %v4454_v43  ;;  %v3481_v43 = vpop.f32.mrf.mxu0  ;;  %v8979_v47 = vadd.f32 %v8705_v18, %v4168_v32  ;;  %v4170_v0 = vadd.f32 %v8868_v27, %v3910_v57  ;;  %v4409_v11 = vpop.permute.xlu0 %4408  ;;  %v9599_v57 = vld [vmem:[#allocation30_spill] sm:$0xff] }
 0x467   : > { %v3869_v22 = vpop.f32.mrf.mxu1  ;;  %v4824_v39 = vrot.slane %v4822_v7, 1  ;;  %v4827_v56 = vrot.slane %v4825_v33, 2  ;;  %v4404_v23 = vpop.permute.xlu2 %4403  ;;  %v3520_v35 = vadd.f32 %v3481_v43, %v3135_v42  ;;  %v4459_v61 = vmul.f32 %v4394_v25, %v8974_v29  ;;  %v6298_v25 = vld [vmem:[%s6667_s23 + $0x48] sm:$0xff] }
 0x468   : > { %v4490_v51 = vadd.f32 %v4489_v14, %v4455_v13  ;;  %v3911_v36 = vadd.f32 %v3869_v22, %v3518_v62  ;;  %9596 = vst [vmem:[#allocation52_spill] sm:$0xff] %v8979_v47  ;;  %v3098_v22 = vpop.f32.mrf.mxu3  ;;  %v8984_v13 = vadd.f32 %v8705_v18, %v4169_v5  ;;  %v4460_v27 = vmul.f32 %v4399_v38, %v8979_v47 }
 0x469   : > { %v4828_v37 = vor.u32 %v4827_v56, %v4824_v39  ;;  %v8989_v14 = vadd.f32 %v8705_v18, %v4170_v0  ;;  %v3136_v62 = vadd.f32 %v3098_v22, %v9599_v57  ;;  %v4831_v34 = vshrl.u32 %v6298_v25, 16 }
 0x46a   : > { %v4491_v8 = vadd.f32 %v4490_v51, %v4456_v44  ;;  %9597 = vst [vmem:[#allocation34_spill] sm:$0xff] %v8984_v13  ;;  %v4171_v28 = vadd.f32 %v8909_v58, %v3911_v36  ;;  %v4461_v58 = vmul.f32 %v4404_v23, %v8984_v13  ;;  %v4414_v38 = vpop.permute.xlu1 %4413  ;;  %v4834_v42 = vshll.u32 %v6298_v25, 16 }
 0x46b   : > { %v4134_v3 = vpop.f32.mrf.mxu2  ;;  %9598 = vst [vmem:[#allocation32_spill] sm:$0xff] %v8989_v14 }
 0x46c   : > { %v4492_v1 = vadd.f32 %v4491_v8, %v4457_v31  ;;  %v8997_v46 = vadd.f32 %v8705_v18, %v4171_v28  ;;  %v4836_v0 = vrot.slane %v4834_v42, 2 }
 0x46e   : > { %v4493_v40 = vadd.f32 %v4492_v1, %v4458_v24  ;;  %9600 = vst [vmem:[#allocation57_spill] sm:$0xff] %v8997_v46  ;;  %v4463_v36 = vmul.f32 %v4414_v38, %v8997_v46  ;;  %v4833_v24 = vrot.slane %v4831_v34, 1  ;;  %v4424_v23 = vpop.permute.xlu0 %4423 }
 0x46f   : > { %v3871_v49 = vpop.f32.mrf.mxu1  ;;  %v4419_v43 = vpop.permute.xlu2 %4418 }
 0x470   : > { %v3912_v17 = vadd.f32 %v3871_v49, %v3519_v26  ;;  %v4829_v49 = vsel %vm2505_vm5, %v8919_v4, %v4828_v37  ;;  %v4494_v26 = vadd.f32 %v4493_v40, %v4459_v61  ;;  %v3483_v4 = vpop.f32.mrf.mxu0  ;;  %v4837_v61 = vor.u32 %v4836_v0, %v4833_v24 }
 0x471   : > { %v3521_v33 = vadd.f32 %v3483_v4, %v3136_v62 }
 0x472   : > { %v4172_v44 = vadd.f32 %v4131_v10, %v3912_v17  ;;  %v4495_v51 = vadd.f32 %v4494_v26, %v4460_v27  ;;  %v4462_v10 = vmul.f32 %v4409_v11, %v8989_v14  ;;  %v4429_v27 = vpop.permute.xlu1 %4428 }
 0x473   : > { %5033 = vmatmul.bf16.gmra.mxu0 %v4829_v49  ;;  %v4136_v1 = vpop.f32.mrf.mxu2 }
 0x474   : > { %v9001_v31 = vadd.f32 %v8705_v18, %v4172_v44  ;;  %v4496_v5 = vadd.f32 %v4495_v51, %v4461_v58  ;;  %v4838_v44 = vsel %vm2505_vm5, %v4828_v37, %v4837_v61 }
 0x476   : > { %9601 = vst [vmem:[#allocation37_spill] sm:$0xff] %v9001_v31  ;;  %v4497_v17 = vadd.f32 %v4496_v5, %v4462_v10  ;;  %v4464_v39 = vmul.f32 %v4419_v43, %v9001_v31  ;;  %v6300_v5 = vld [vmem:[%s6667_s23 + $0x58] sm:$0xff] }
 0x477   : > { %v3874_v63 = vpop.f32.mrf.mxu1 }
 0x478   : > { %v3913_v32 = vadd.f32 %v3874_v63, %v3520_v35  ;;  %v4498_v35 = vadd.f32 %v4497_v17, %v4463_v36  ;;  %v4849_v36 = vshrl.u32 %v6300_v5, 16 }
 0x47a   : > { %v4173_v19 = vadd.f32 %v4134_v3, %v3913_v32  ;;  %v4499_v28 = vadd.f32 %v4498_v35, %v4464_v39  ;;  %v6299_v32 = vld [vmem:[%s6667_s23 + $0x50] sm:$0xff] }
 0x47b   : > { %v4840_v57 = vshrl.u32 %v6299_v32, 16  ;;  %v4843_v62 = vshll.u32 %v6299_v32, 16 }
 0x47c   : > { %v9005_v7 = vadd.f32 %v8705_v18, %v4173_v19 }
 0x47d   : > { %v4842_v19 = vrot.slane %v4840_v57, 1  ;;  %v4845_v38 = vrot.slane %v4843_v62, 2 }
 0x47e   : > { %9602 = vst [vmem:[#allocation35_spill] sm:$0xff] %v9005_v7  ;;  %v4465_v11 = vmul.f32 %v4424_v23, %v9005_v7 }
 0x47f   : > { %v3876_v8 = vpop.f32.mrf.mxu1  ;;  %v4846_v42 = vor.u32 %v4845_v38, %v4842_v19 }
 0x480   : > { %v3914_v56 = vadd.f32 %v3876_v8, %v3521_v33  ;;  %v4500_v3 = vadd.f32 %v4499_v28, %v4465_v11  ;;  %v4852_v33 = vshll.u32 %v6300_v5, 16  ;;  %v4851_v8 = vrot.slane %v4849_v36, 1 }
 0x481   : > { %v4847_v37 = vsel %vm2505_vm5, %v4837_v61, %v4846_v42 }
 0x482   : > { %v4174_v22 = vadd.f32 %v4136_v1, %v3914_v56  ;;  %v4854_v24 = vrot.slane %v4852_v33, 2  ;;  %v6301_v56 = vld [vmem:[%s6667_s23 + $0x60] sm:$0xff]  ;;  %v6304_v33 = vld [vmem:[%s6667_s23 + $0x78] sm:$0xff] }
 0x483   : > { %5038 = vmatmul.bf16.gmra.mxu0 %v4838_v44  ;;  %v4858_v23 = vshrl.u32 %v6301_v56, 16  ;;  %v4861_v1 = vshll.u32 %v6301_v56, 16  ;;  %v4888_v56 = vshll.u32 %v6304_v33, 16 }
 0x484   : > { %v9010_v40 = vadd.f32 %v8705_v18, %v4174_v22  ;;  %v4855_v0 = vor.u32 %v4854_v24, %v4851_v8  ;;  %v4562_v8 = vld [vmem:[%s9359_s9 + $0x60] sm:$0xff]  ;;  %v4561_v24 = vld [vmem:[%s9359_s9 + $0x58] sm:$0xff] }
 0x485   : > { %v4860_v11 = vrot.slane %v4858_v23, 1  ;;  %v4863_v22 = vrot.slane %v4861_v1, 2  ;;  %v4559_v23 = vld [vmem:[%s9359_s9 + $0x48] sm:$0xff] }
 0x486   : > { %9603 = vst [vmem:[#allocation58_spill] sm:$0xff] %v9010_v40  ;;  %v4466_v63 = vmul.f32 %v4429_v27, %v9010_v40  ;;  %v4856_v39 = vsel %vm2505_vm5, %v4846_v42, %v4855_v0  ;;  %v6302_v27 = vld [vmem:[%s6667_s23 + $0x68] sm:$0xff]  ;;  %v4565_v42 = vld [vmem:[%s9359_s9 + $0x78] sm:$0xff] }
 0x487   : > { %v4864_v61 = vor.u32 %v4863_v22, %v4860_v11  ;;  %v4870_v44 = vshll.u32 %v6302_v27, 16  ;;  %4570 = vmatpush.msra.mxu3 %v4565_v42  ;;  %v4890_v11 = vrot.slane %v4888_v56, 2 }
 0x488   : > { %v4501_v49 = vadd.f32 %v4500_v3, %v4466_v63  ;;  %v4867_v63 = vshrl.u32 %v6302_v27, 16  ;;  %v4556_v27 = vld [vmem:[%s9359_s9 + $0x30] sm:$0xff] }
 0x489   : > { %v4865_v28 = vsel %vm2505_vm5, %v4855_v0, %v4864_v61  ;;  %v4560_v0 = vld [vmem:[%s9359_s9 + $0x50] sm:$0xff] }
 0x48a   : > { %v4502_v25 = vrot.slane %v4501_v49, 4  ;;  %v4869_v32 = vrot.slane %v4867_v63, 1 }
 0x48c   : > { %v4503_v26 = vadd.f32 %v4502_v25, %v4501_v49  ;;  %v4872_v49 = vrot.slane %v4870_v44, 2  ;;  %v4555_v44 = vld [vmem:[%s9359_s9 + $0x28] sm:$0xff] }
 0x48e   : > { %v4504_v58 = vrot.slane %v4503_v26, 2  ;;  %v9015_v4 = vpop.f32.mrf.mxu0  ;;  %v4873_v57 = vor.u32 %v4872_v49, %v4869_v32  ;;  %v6305_v49 = vld [vmem:[%s6667_s23 + $0x80] sm:$0xff] }
 0x490   : > { %v4505_v34 = vadd.f32 %v4504_v58, %v4503_v26  ;;  %v4874_v62 = vsel %vm2505_vm5, %v4864_v61, %v4873_v57  ;;  %v6303_v26 = vld [vmem:[%s6667_s23 + $0x70] sm:$0xff]  ;;  %v4558_v61 = vld [vmem:[%s9359_s9 + $0x40] sm:$0xff] }
 0x491   : > { %v4876_v58 = vshrl.u32 %v6303_v26, 16  ;;  %v4879_v19 = vshll.u32 %v6303_v26, 16  ;;  %v4553_v26 = vld [vmem:[%s9359_s9 + $0x18] sm:$0xff] }
 0x492   : > { %v4506_v18 = vrot.slane %v4505_v34, 1 }
 0x493   : > { %5043 = vmatmul.bf16.gmra.mxu0 %v4847_v37 }
 0x494   : > { %v4507_v51 = vadd.f32 %v4506_v18, %v4505_v34  ;;  %v4878_v34 = vrot.slane %v4876_v58, 1  ;;  %v4881_v18 = vrot.slane %v4879_v19, 2  ;;  %v4894_v58 = vshrl.u32 %v6305_v49, 16 }
 0x495   : > { %v4897_v19 = vshll.u32 %v6305_v49, 16  ;;  %v4645_v49 = vld [vmem:[%s6667_s23 + $0x98] sm:$0x3] }
 0x496   : > { %v4508_v10 = vmul.f32 0.00390625, %v4507_v51  ;;  %v9019_v43 = vpop.f32.mrf.mxu0  ;;  %v4564_v51 = vld [vmem:[%s9359_s9 + $0x70] sm:$0xff]  ;;  %v4882_v37 = vor.u32 %v4881_v18, %v4878_v34  ;;  %v4896_v34 = vrot.slane %v4894_v58, 1  ;;  %v4739_v58 = vunpack.c.l.b16 %v4645_v49 }
 0x497   : > { %4571 = vmatpush.msra.mxu3 %v4564_v51  ;;  %v4899_v18 = vrot.slane %v4897_v19, 2 }
 0x498   : > { %4545 = vmatmul.f32.vlgmr.msrb.gmra.mxu3 %v4508_v10  ;;  %v4563_v10 = vld [vmem:[%s9359_s9 + $0x68] sm:$0xff]  ;;  %v4883_v36 = vsel %vm2505_vm5, %v4873_v57, %v4882_v37  ;;  %v4554_v57 = vld [vmem:[%s9359_s9 + $0x20] sm:$0xff] }
 0x499   : > { %4572 = vmatpush.msra.mxu3 %v4563_v10  ;;  %v4900_v42 = vor.u32 %v4899_v18, %v4896_v34  ;;  %v4758_v34 = vpack.c.b16 %v4739_v58, %v4739_v58  ;;  %v6483_v18 = vld [vmem:[%s9358_s8] ss:$0 sm:$0xff] }
 0x49b   : > { %4573 = vmatpush.msra.mxu3 %v4562_v8 }
 0x49d   : > { %4574 = vmatpush.msra.mxu3 %v4561_v24  ;;  %v4552_v24 = vld [vmem:[%s9359_s9 + $0x10] sm:$0xff] }
 0x49f   : > { %4575 = vmatpush.msra.mxu3 %v4560_v0  ;;  %v4551_v0 = vld [vmem:[%s9359_s9 + $0x8] sm:$0xff] }
 0x4a0   : > { %v9021_v17 = vpop.f32.mrf.mxu0 }
 0x4a1   : > { %4576 = vmatpush.msra.mxu3 %v4559_v23  ;;  %v4550_v23 = vld [vmem:[%s9359_s9] sm:$0xff] }
 0x4a3   : > { %5048 = vmatmul.bf16.gmra.mxu0 %v4856_v39  ;;  %v4885_v39 = vshrl.u32 %v6304_v33, 16  ;;  %4577 = vmatpush.msra.mxu3 %v4558_v61  ;;  %v6307_v61 = vld [vmem:[%s6667_s23 + $0x90] sm:$0xff] }
 0x4a5   : > { %v4887_v1 = vrot.slane %v4885_v39, 1 }
 0x4a7   : > { %v4891_v63 = vor.u32 %v4890_v11, %v4887_v1 }
 0x4a8   : > { %v9025_v35 = vpop.f32.mrf.mxu0 }
 0x4a9   : > { %v4892_v32 = vsel %vm2505_vm5, %v4882_v37, %v4891_v63  ;;  %v4901_v10 = vsel %vm2505_vm5, %v4891_v63, %v4900_v42  ;;  %v6306_v37 = vld [vmem:[%s6667_s23 + $0x88] sm:$0xff]  ;;  %v4915_v63 = vshll.u32 %v6307_v61, 16 }
 0x4aa   : > { %v4906_v33 = vshll.u32 %v6306_v37, 16 }
 0x4ac   : > { %v4908_v56 = vrot.slane %v4906_v33, 2 }
 0x4b0   : > { %v9029_v3 = vpop.f32.mrf.mxu0 }
 0x4b3   : > { %5053 = vmatmul.bf16.gmra.mxu0 %v4865_v28  ;;  %v4557_v28 = vld [vmem:[%s9359_s9 + $0x38] sm:$0xff] }
 0x4b4   : > { %4578 = vmatpush.msra.mxu3 %v4557_v28 }
 0x4b6   : > { %4579 = vmatpush.msra.mxu3 %v4556_v27  ;;  %v4912_v27 = vshrl.u32 %v6307_v61, 16 }
 0x4b8   : > { %v9031_v25 = vpop.f32.mrf.mxu0  ;;  %4580 = vmatpush.msra.mxu3 %v4555_v44  ;;  %v4914_v44 = vrot.slane %v4912_v27, 1 }
 0x4ba   : > { %4581 = vmatpush.msra.mxu3 %v4554_v57 }
 0x4bc   : > { %4582 = vmatpush.msra.mxu3 %v4553_v26 }
 0x4be   : > { %4583 = vmatpush.msra.mxu3 %v4552_v24 }
 0x4c0   : > { %v9035_v38 = vpop.f32.mrf.mxu0  ;;  %4584 = vmatpush.msra.mxu3 %v4551_v0 }
 0x4c2   : > { %4585 = vmatpush.msra.mxu3 %v4550_v23 }
 0x4c3   : > { %5058 = vmatmul.bf16.gmra.mxu0 %v4874_v62 }
 0x4c8   : > { %v9046_v5 = vpop.f32.mrf.mxu0 }
 0x4d0   : > { %v9062_v22 = vpop.f32.mrf.mxu0 }
 0x4d3   : > { %5063 = vmatmul.bf16.gmra.mxu0 %v4883_v36  ;;  %v4903_v36 = vshrl.u32 %v6306_v37, 16  ;;  %v4924_v37 = vshll.u32 %v4758_v34, 16 }
 0x4d5   : > { %v4905_v39 = vrot.slane %v4903_v36, 1 }
 0x4d7   : > { %v4909_v1 = vor.u32 %v4908_v56, %v4905_v39  ;;  %v4926_v39 = vrot.slane %v4924_v37, 2 }
 0x4d8   : > { %v9081_v62 = vpop.f32.mrf.mxu0 }
 0x4d9   : > { %v4910_v11 = vsel %vm2505_vm5, %v4900_v42, %v4909_v1 }
 0x4e0   : > { %v9086_v51 = vpop.f32.mrf.mxu0 }
 0x4e3   : > { %5068 = vmatmul.bf16.gmra.mxu0 %v4892_v32  ;;  %v4917_v32 = vrot.slane %v4915_v63, 2 }
 0x4e5   : > { %v4918_v26 = vor.u32 %v4917_v32, %v4914_v44 }
 0x4e7   : > { %v4919_v19 = vsel %vm2505_vm5, %v4909_v1, %v4918_v26 }
 0x4e8   : > { %v9090_v8 = vpop.f32.mrf.mxu0 }
 0x4f0   : > { %v9103_v28 = vpop.f32.mrf.mxu0 }
 0x4f3   : > { %5073 = vmatmul.bf16.gmra.mxu0 %v4901_v10  ;;  %v4921_v10 = vshrl.u32 %v4758_v34, 16 }
 0x4f5   : > { %v4923_v0 = vrot.slane %v4921_v10, 1 }
 0x4f7   : > { %v4927_v56 = vor.u32 %v4926_v39, %v4923_v0 }
 0x4f8   : > { %v9106_v57 = vpop.f32.mrf.mxu0 }
 0x4f9   : > { %v4928_v1 = vsel %vm2505_vm5, %v4918_v26, %v4927_v56 }
 0x500   : > { %v9112_v36 = vpop.f32.mrf.mxu0 }
 0x503   : > { %5078 = vmatmul.bf16.gmra.mxu0 %v4910_v11 }
 0x508   : > { %v9114_v23 = vpop.f32.mrf.mxu0 }
 0x510   : > { %v9117_v11 = vpop.f32.mrf.mxu0 }
 0x513   : > { %5083 = vmatmul.bf16.gmra.mxu0 %v4919_v19 }
 0x518   : > { %v9119_v61 = vpop.f32.mrf.mxu0 }
 0x51b   : > { %v4546_v42 = vpop.f32.mrf.mxu3 }
 0x51c   : > { %v4547_v33 = vadd.f32 %v6483_v18, %v4546_v42  ;;  %v6484_v42 = vld [vmem:[%s9360_s10] ss:$0 sm:$0xff] }
 0x51e   : > { %v4549_v24 = vmax.f32 %v4547_v33, 0.0 }
 0x520   : > { %4586 = vmatmul.f32.vlgmr.msra.gmra.mxu3 %v4549_v24  ;;  %v9121_v27 = vpop.f32.mrf.mxu0 }
 0x523   : > { %5088 = vmatmul.bf16.gmra.mxu0 %v4928_v1 }
 0x528   : > { %v9123_v63 = vpop.f32.mrf.mxu0 }
 0x530   : > { %v9125_v44 = vpop.f32.mrf.mxu0 }
 0x538   : > { %v9127_v32 = vpop.f32.mrf.mxu0 }
 0x540   : > { %v9129_v49 = vpop.f32.mrf.mxu0 }
 0x548   : > { %v9131_v58 = vpop.f32.mrf.mxu0 }
 0x550   : > { %v9133_v19 = vpop.f32.mrf.mxu0 }
 0x558   : > { %v9135_v26 = vpop.f32.mrf.mxu0 }
 0x560   : > { %v9137_v34 = vpop.f32.mrf.mxu0 }
 0x568   : > { %v9139_v18 = vpop.f32.mrf.mxu0 }
 0x569   : > { %9604 = vst [vmem:[#allocation40_spill] sm:$0xff] %v9139_v18 }
 0x570   : > { %v9144_v24 = vpop.f32.mrf.mxu0 }
 0x571   : > { %9605 = vst [vmem:[#allocation38_spill] sm:$0xff] %v9144_v24 }
 0x578   : > { %v9146_v1 = vpop.f32.mrf.mxu0 }
 0x579   : > { %9606 = vst [vmem:[#allocation4_spill] sm:$0xff] %v9146_v1 }
 0x580   : > { %v9148_v31 = vpop.f32.mrf.mxu0 }
 0x581   : > { %9607 = vst [vmem:[#allocation43_spill] sm:$0xff] %v9148_v31  ;;  %v9610_v31 = vld [vmem:[#allocation56_spill] sm:$0xff] }
 0x5a3   : > { %v4587_v10 = vpop.f32.mrf.mxu3 }
 0x5a4   : > { %v4588_v37 = vadd.f32 %v6484_v42, %v4587_v10 }
 0x5a6   : > { %v4590_v33 = vsub.f32 0.0, %v4588_v37 }
 0x5a8   : > { %v4591_v0 = vmul.f32 1.442695, %v4590_v33  ;;  %v9150_v33 = vpop.f32.mrf.mxu0 }
 0x5a9   : > { %9608 = vst [vmem:[#allocation41_spill] sm:$0xff] %v9150_v33  ;;  %v9614_v33 = vld [vmem:[#allocation19_spill] sm:$0xff] }
 0x5aa   : > { %6485 = vpow2.f32 %v4591_v0 }
 0x5b0   : > { %v6486_v39 = vpop.eup %6485 }
 0x5b1   : > { %v4593_v56 = vadd.f32 1.0, %v6486_v39 }
 0x5b3   : > { %6487 = vrcp.f32 %v4593_v56  ;;  %v4605_v47 = vand.u32 2147483648, %v4593_v56  ;;  %vm4599_vm7 = vweird.f32 %v4593_v56  ;;  %v4603_v42 = vand.u32 2147483647, %v4593_v56 }
 0x5b5   : > { %v4606_v37 = vor.u32 1.1754944e-38, %v4605_v47  ;;  %vm4604_vm9 = vcmp.eq.f32.partialorder %v4603_v42, 8.507059e+37 }
 0x5b9   : > { %v6488_v40 = vpop.eup %6487 }
 0x5ba   : > { %v4595_v7 = vmul.f32 %v6488_v40, %v4593_v56  ;;  %vm4600_vm6 = vweird.f32 %v6488_v40 }
 0x5bb   : > { %vm4601_vm8 = vmor %vm4599_vm7, %vm4600_vm6 }
 0x5bc   : > { %v4596_v46 = vsub.f32 1.0, %v4595_v7  ;;  %v9157_v7 = vld [vmem:[%s9362_s12] ss:$0 sm:$0xff] }
 0x5bd   : > { %v5020_v18 = vadd.f32 %v9157_v7, %v9035_v38 }
 0x5be   : > { %v4597_v14 = vmul.f32 %v6488_v40, %v4596_v46 }
 0x5c0   : > { %v4598_v13 = vadd.f32 %v6488_v40, %v4597_v14  ;;  %v9609_v14 = vld [vmem:[#allocation39_spill] sm:$0xff] }
 0x5c2   : > { %v4602_v10 = vsel %vm4601_vm8, %v6488_v40, %v4598_v13  ;;  %v9611_v13 = vld [vmem:[#allocation11_spill] sm:$0xff]  ;;  %v9612_v40 = vld [vmem:[#allocation18_spill] sm:$0xff] }
 0x5c3   : > { %v4607_v0 = vsel %vm4604_vm9, %v4606_v37, %v4602_v10  ;;  %v5005_v10 = vadd.f32 %v9157_v7, %v9015_v4  ;;  %v5007_v37 = vadd.f32 %v9157_v7, %v9019_v43  ;;  %v5015_v4 = vadd.f32 %v9157_v7, %v9029_v3 }
 0x5c4   : > { %v9152_v39 = vperm.slane %v4607_v0, 0  ;;  %v9171_v0 = vpop.f32.mrf.mxu0 }
 0x5c5   : > { %9613 = vst [vmem:[#allocation7_spill] sm:$0xff] %v9171_v0 }
 0x5c6   : > { %v5095_v46 = vmul.f32 %v9152_v39, %v9609_v14  ;;  %v5096_v56 = vmul.f32 %v9152_v39, %v9610_v31  ;;  %v5097_v47 = vmul.f32 %v9152_v39, %v9611_v13  ;;  %v5098_v42 = vmul.f32 %v9152_v39, %v9612_v40 }
 0x5c7   : > { %v5099_v14 = vmul.f32 %v9152_v39, %v9614_v33  ;;  %v5010_v31 = vadd.f32 %v9157_v7, %v9021_v17  ;;  %v5012_v13 = vadd.f32 %v9157_v7, %v9025_v35  ;;  %v5100_v40 = vmul.f32 %v9152_v39, %v8758_v6 }
 0x5c8   : > { %v5101_v43 = vmul.f32 %v9152_v39, %v8766_v55  ;;  %v5131_v0 = vadd.f32 %v5095_v46, %v5005_v10  ;;  %v5132_v1 = vadd.f32 %v5096_v56, %v5007_v37  ;;  %v5017_v33 = vadd.f32 %v9157_v7, %v9031_v25  ;;  %v9616_v56 = vld [vmem:[#allocation48_spill] sm:$0xff] }
 0x5c9   : > { %v5102_v17 = vmul.f32 %v9152_v39, %v8776_v54  ;;  %v5133_v24 = vadd.f32 %v5097_v47, %v5010_v31  ;;  %v5134_v35 = vadd.f32 %v5098_v42, %v5012_v13  ;;  %v5022_v6 = vadd.f32 %v9157_v7, %v9046_v5  ;;  %v9615_v54 = vld [vmem:[#allocation23_spill] sm:$0xff] }
 0x5ca   : > { %v5103_v3 = vmul.f32 %v9152_v39, %v8784_v30  ;;  %v5135_v55 = vadd.f32 %v5099_v14, %v5015_v4  ;;  %v5025_v46 = vadd.f32 %v9157_v7, %v9062_v22  ;;  %v5027_v25 = vadd.f32 %v9157_v7, %v9081_v62 }
 0x5cb   : > { %v5104_v38 = vmul.f32 %v9152_v39, %v9615_v54  ;;  %v5136_v5 = vadd.f32 %v5100_v40, %v5017_v33  ;;  %v5105_v30 = vmul.f32 %v9152_v39, %v9616_v56  ;;  %v5137_v47 = vadd.f32 %v5101_v43, %v5020_v18 }
 0x5cc   : > { %v5167_v42 = vmax.f32 %v5131_v0, 0.0  ;;  %v5168_v22 = vmax.f32 %v5132_v1, 0.0  ;;  %v5106_v62 = vmul.f32 %v9152_v39, %v8810_v15  ;;  %v5138_v10 = vadd.f32 %v5102_v17, %v5022_v6  ;;  %v9226_v33 = vpop.f32.mrf.mxu0 }
 0x5cd   : > { %v5169_v37 = vmax.f32 %v5133_v24, 0.0  ;;  %v5170_v14 = vmax.f32 %v5134_v35, 0.0  ;;  %v5030_v31 = vadd.f32 %v9157_v7, %v9086_v51  ;;  %v5107_v13 = vmul.f32 %v9152_v39, %v8818_v41 }
 0x5ce   : > { %v5139_v40 = vadd.f32 %v5103_v3, %v5025_v46  ;;  %v5171_v4 = vmax.f32 %v5135_v55, 0.0  ;;  %5203 = vst [vmem:[%s9203_s29] sm:$0xff] %v5167_v42  ;;  %v5032_v18 = vadd.f32 %v9157_v7, %v9090_v8  ;;  %v5108_v15 = vmul.f32 %v9152_v39, %v8829_v9  ;;  %v9618_v46 = vld [vmem:[#allocation27_spill] sm:$0xff] }
 0x5cf   : > { %v5140_v1 = vadd.f32 %v5104_v38, %v5027_v25  ;;  %v5172_v24 = vmax.f32 %v5136_v5, 0.0  ;;  %5204 = vst [vmem:[%s9203_s29 + $0x8] sm:$0xff] %v5168_v22  ;;  %v5035_v51 = vadd.f32 %v9157_v7, %v9103_v28  ;;  %v5109_v41 = vmul.f32 %v9152_v39, %v8835_v59  ;;  %v9617_v59 = vld [vmem:[#allocation31_spill] sm:$0xff] }
 0x5d0   : > { %v5141_v0 = vadd.f32 %v5105_v30, %v5030_v31  ;;  %v5173_v43 = vmax.f32 %v5137_v47, 0.0  ;;  %5205 = vst [vmem:[%s9203_s29 + $0x10] sm:$0xff] %v5169_v37  ;;  %v5037_v8 = vadd.f32 %v9157_v7, %v9106_v57  ;;  %v5110_v9 = vmul.f32 %v9152_v39, %v8843_v53 }
 0x5d1   : > { %v5142_v17 = vadd.f32 %v5106_v62, %v5032_v18  ;;  %v5174_v35 = vmax.f32 %v5138_v10, 0.0  ;;  %5206 = vst [vmem:[%s9203_s29 + $0x18] sm:$0xff] %v5170_v14  ;;  %v5040_v28 = vadd.f32 %v9157_v7, %v9112_v36  ;;  %v5111_v6 = vmul.f32 %v9152_v39, %v9617_v59 }
 0x5d2   : > { %v5143_v3 = vadd.f32 %v5107_v13, %v5035_v51  ;;  %v5175_v55 = vmax.f32 %v5139_v40, 0.0  ;;  %5207 = vst [vmem:[%s9203_s29 + $0x20] sm:$0xff] %v5171_v4  ;;  %v5042_v57 = vadd.f32 %v9157_v7, %v9114_v23  ;;  %v5112_v53 = vmul.f32 %v9152_v39, %v9618_v46  ;;  %v9623_v46 = vld [vmem:[#allocation4_spill] sm:$0xff] }
 0x5d3   : > { %v5144_v25 = vadd.f32 %v5108_v15, %v5037_v8  ;;  %v5176_v54 = vmax.f32 %v5140_v1, 0.0  ;;  %5208 = vst [vmem:[%s9203_s29 + $0x28] sm:$0xff] %v5172_v24  ;;  %v5045_v36 = vadd.f32 %v9157_v7, %v9117_v11  ;;  %v5113_v38 = vmul.f32 %v9152_v39, %v8874_v2 }
 0x5d4   : > { %v5145_v5 = vadd.f32 %v5109_v41, %v5040_v28  ;;  %v5177_v56 = vmax.f32 %v5141_v0, 0.0  ;;  %5209 = vst [vmem:[%s9203_s29 + $0x30] sm:$0xff] %v5173_v43  ;;  %v5047_v23 = vadd.f32 %v9157_v7, %v9119_v61  ;;  %v5114_v30 = vmul.f32 %v9152_v39, %v8881_v45  ;;  %v5089_v15 = vpop.f32.mrf.mxu0 }
 0x5d5   : > { %v5146_v47 = vadd.f32 %v5110_v9, %v5042_v57  ;;  %v5178_v42 = vmax.f32 %v5142_v17, 0.0  ;;  %5210 = vst [vmem:[%s9203_s29 + $0x38] sm:$0xff] %v5174_v35  ;;  %v5050_v11 = vadd.f32 %v9157_v7, %v9121_v27  ;;  %v5115_v2 = vmul.f32 %v9152_v39, %v8892_v20  ;;  %v9619_v17 = vld [vmem:[#allocation40_spill] sm:$0xff] }
 0x5d6   : > { %v5147_v22 = vadd.f32 %v5111_v6, %v5045_v36  ;;  %v5179_v62 = vmax.f32 %v5143_v3, 0.0  ;;  %5211 = vst [vmem:[%s9203_s29 + $0x40] sm:$0xff] %v5175_v55  ;;  %v5052_v61 = vadd.f32 %v9157_v7, %v9123_v63  ;;  %v5116_v45 = vmul.f32 %v9152_v39, %v8901_v60  ;;  %v9620_v35 = vld [vmem:[#allocation52_spill] sm:$0xff]  ;;  %v9621_v6 = vld [vmem:[#allocation38_spill] sm:$0xff] }
 0x5d7   : > { %v5148_v10 = vadd.f32 %v5112_v53, %v5047_v23  ;;  %v5180_v37 = vmax.f32 %v5144_v25, 0.0  ;;  %5212 = vst [vmem:[%s9203_s29 + $0x48] sm:$0xff] %v5176_v54  ;;  %v5055_v27 = vadd.f32 %v9157_v7, %v9125_v44  ;;  %v5117_v20 = vmul.f32 %v9152_v39, %v8914_v52  ;;  %v9622_v3 = vld [vmem:[#allocation34_spill] sm:$0xff]  ;;  %v9624_v25 = vld [vmem:[#allocation32_spill] sm:$0xff]  ;;  %v9626_v23 = vld [vmem:[#allocation57_spill] sm:$0xff] }
 0x5d8   : > { %v5149_v14 = vadd.f32 %v5113_v38, %v5050_v11  ;;  %v5181_v31 = vmax.f32 %v5145_v5, 0.0  ;;  %5213 = vst [vmem:[%s9203_s29 + $0x50] sm:$0xff] %v5177_v56  ;;  %v5057_v63 = vadd.f32 %v9157_v7, %v9127_v32  ;;  %v5118_v60 = vmul.f32 %v9152_v39, %v8923_v50  ;;  %v9625_v5 = vld [vmem:[#allocation43_spill] sm:$0xff]  ;;  %v9627_v11 = vld [vmem:[#allocation41_spill] sm:$0xff] }
 0x5d9   : > { %v5150_v13 = vadd.f32 %v5114_v30, %v5052_v61  ;;  %v5182_v40 = vmax.f32 %v5146_v47, 0.0  ;;  %5214 = vst [vmem:[%s9203_s29 + $0x58] sm:$0xff] %v5178_v42  ;;  %v5060_v44 = vadd.f32 %v9157_v7, %v9129_v49  ;;  %v5119_v52 = vmul.f32 %v9152_v39, %v8937_v16  ;;  %v9628_v61 = vld [vmem:[#allocation37_spill] sm:$0xff] }
 0x5da   : > { %v5151_v4 = vadd.f32 %v5115_v2, %v5055_v27  ;;  %v5183_v18 = vmax.f32 %v5147_v22, 0.0  ;;  %5215 = vst [vmem:[%s9203_s29 + $0x60] sm:$0xff] %v5179_v62  ;;  %v5062_v32 = vadd.f32 %v9157_v7, %v9131_v58  ;;  %v5120_v50 = vmul.f32 %v9152_v39, %v8945_v48 }
 0x5db   : > { %v5152_v1 = vadd.f32 %v5116_v45, %v5057_v63  ;;  %v5184_v24 = vmax.f32 %v5148_v10, 0.0  ;;  %5216 = vst [vmem:[%s9203_s29 + $0x68] sm:$0xff] %v5180_v37  ;;  %v5065_v49 = vadd.f32 %v9157_v7, %v9133_v19  ;;  %v5121_v16 = vmul.f32 %v9152_v39, %v8955_v12  ;;  %v9629_v10 = vld [vmem:[#allocation7_spill] sm:$0xff] }
 0x5dc   : > { %v5153_v51 = vadd.f32 %v5117_v20, %v5060_v44  ;;  %v5185_v41 = vmax.f32 %v5149_v14, 0.0  ;;  %5217 = vst [vmem:[%s9203_s29 + $0x70] sm:$0xff] %v5181_v31  ;;  %v5067_v58 = vadd.f32 %v9157_v7, %v9135_v26  ;;  %v5122_v48 = vmul.f32 %v9152_v39, %v8962_v21  ;;  %v9630_v14 = vld [vmem:[#allocation35_spill] sm:$0xff]  ;;  %v5091_v63 = vpop.f32.mrf.mxu0  ;;  %v9631_v44 = vld [vmem:[#allocation58_spill] sm:$0xff] }
 0x5dd   : > { %v5154_v0 = vadd.f32 %v5118_v60, %v5062_v32  ;;  %v5186_v43 = vmax.f32 %v5150_v13, 0.0  ;;  %5218 = vst [vmem:[%s9203_s29 + $0x78] sm:$0xff] %v5182_v40  ;;  %v5070_v19 = vadd.f32 %v9157_v7, %v9137_v34  ;;  %v5123_v12 = vmul.f32 %v9152_v39, %v8974_v29 }
 0x5de   : > { %v5155_v8 = vadd.f32 %v5119_v52, %v5065_v49  ;;  %v5187_v9 = vmax.f32 %v5151_v4, 0.0  ;;  %5219 = vst [vmem:[%s9203_s29 + $0x80] sm:$0xff] %v5183_v18  ;;  %v5072_v26 = vadd.f32 %v9157_v7, %v9619_v17  ;;  %v5124_v21 = vmul.f32 %v9152_v39, %v9620_v35 }
 0x5df   : > { %v5156_v28 = vadd.f32 %v5120_v50, %v5067_v58  ;;  %v5188_v59 = vmax.f32 %v5152_v1, 0.0  ;;  %5220 = vst [vmem:[%s9203_s29 + $0x88] sm:$0xff] %v5184_v24  ;;  %v5075_v34 = vadd.f32 %v9157_v7, %v9621_v6  ;;  %v5125_v29 = vmul.f32 %v9152_v39, %v9622_v3 }
 0x5e0   : > { %v5157_v55 = vadd.f32 %v5121_v16, %v5070_v19  ;;  %v5189_v57 = vmax.f32 %v5153_v51, 0.0  ;;  %5221 = vst [vmem:[%s9203_s29 + $0x90] sm:$0xff] %v5185_v41  ;;  %v5077_v53 = vadd.f32 %v9157_v7, %v9623_v46  ;;  %v5126_v54 = vmul.f32 %v9152_v39, %v9624_v25 }
 0x5e1   : > { %v5158_v36 = vadd.f32 %v5122_v48, %v5072_v26  ;;  %v5190_v38 = vmax.f32 %v5154_v0, 0.0  ;;  %5222 = vst [vmem:[%s9203_s29 + $0x98] sm:$0xff] %v5186_v43  ;;  %v5080_v56 = vadd.f32 %v9157_v7, %v9625_v5  ;;  %v5127_v30 = vmul.f32 %v9152_v39, %v9626_v23 }
 0x5e2   : > { %v5159_v47 = vadd.f32 %v5123_v12, %v5075_v34  ;;  %v5191_v42 = vmax.f32 %v5155_v8, 0.0  ;;  %5223 = vst [vmem:[%s9203_s29 + $0xa0] sm:$0xff] %v5187_v9  ;;  %v5082_v2 = vadd.f32 %v9157_v7, %v9627_v11  ;;  %v5160_v22 = vadd.f32 %v5124_v21, %v5077_v53 }
 0x5e3   : > { %v5192_v62 = vmax.f32 %v5156_v28, 0.0  ;;  %5224 = vst [vmem:[%s9203_s29 + $0xa8] sm:$0xff] %v5188_v59  ;;  %v5128_v45 = vmul.f32 %v9152_v39, %v9628_v61  ;;  %v5085_v37 = vadd.f32 %v9157_v7, %v9629_v10  ;;  %v5161_v27 = vadd.f32 %v5125_v29, %v5080_v56 }
 0x5e4   : > { %v5193_v20 = vmax.f32 %v5157_v55, 0.0  ;;  %5225 = vst [vmem:[%s9203_s29 + $0xb0] sm:$0xff] %v5189_v57  ;;  %v5129_v31 = vmul.f32 %v9152_v39, %v9630_v14  ;;  %v5162_v60 = vadd.f32 %v5126_v54, %v5082_v2  ;;  %v5194_v13 = vmax.f32 %v5158_v36, 0.0 }
 0x5e5   : > { %5226 = vst [vmem:[%s9203_s29 + $0xb8] sm:$0xff] %v5190_v38  ;;  %v5087_v40 = vadd.f32 %v9157_v7, %v9226_v33  ;;  %v5130_v52 = vmul.f32 %v9152_v39, %v9631_v44  ;;  %v5163_v4 = vadd.f32 %v5127_v30, %v5085_v37  ;;  %v5195_v18 = vmax.f32 %v5159_v47, 0.0 }
 0x5e6   : > { %5227 = vst [vmem:[%s9203_s29 + $0xc0] sm:$0xff] %v5191_v42  ;;  %v5090_v32 = vadd.f32 %v9157_v7, %v5089_v15  ;;  %v5196_v50 = vmax.f32 %v5160_v22, 0.0  ;;  %v5092_v24 = vadd.f32 %v9157_v7, %v5091_v63  ;;  %v5197_v33 = vmax.f32 %v5161_v27, 0.0 }
 0x5e7   : > { %5228 = vst [vmem:[%s9203_s29 + $0xc8] sm:$0xff] %v5192_v62  ;;  %v5164_v1 = vadd.f32 %v5128_v45, %v5087_v40  ;;  %v5198_v49 = vmax.f32 %v5162_v60, 0.0  ;;  %v5199_v51 = vmax.f32 %v5163_v4, 0.0 }
 0x5e8   : > { %5229 = vst [vmem:[%s9203_s29 + $0xd0] sm:$0xff] %v5193_v20  ;;  %v5165_v39 = vadd.f32 %v5129_v31, %v5090_v32  ;;  %v5166_v16 = vadd.f32 %v5130_v52, %v5092_v24 }
 0x5e9   : > { %5230 = vst [vmem:[%s9203_s29 + $0xd8] sm:$0xff] %v5194_v13  ;;  %v5200_v15 = vmax.f32 %v5164_v1, 0.0 }
 0x5ea   : > { %5231 = vst [vmem:[%s9203_s29 + $0xe0] sm:$0xff] %v5195_v18  ;;  %v5201_v41 = vmax.f32 %v5165_v39, 0.0  ;;  %v5202_v58 = vmax.f32 %v5166_v16, 0.0 }
 0x5eb   : > { %5232 = vst [vmem:[%s9203_s29 + $0xe8] sm:$0xff] %v5196_v50 }
 0x5ec   : > { %5233 = vst [vmem:[%s9203_s29 + $0xf0] sm:$0xff] %v5197_v33 }
 0x5ed   : > { %5234 = vst [vmem:[%s9203_s29 + $0xf8] sm:$0xff] %v5198_v49 }
 0x5ee   : > { %5235 = vst [vmem:[%s9203_s29 + $0x100] sm:$0xff] %v5199_v51 }
 0x5ef   : > { %5236 = vst [vmem:[%s9203_s29 + $0x108] sm:$0xff] %v5200_v15 }
 0x5f0   : > { %5237 = vst [vmem:[%s9203_s29 + $0x110] sm:$0xff] %v5201_v41 }
 0x5f1   : > { %5238 = vst [vmem:[%s9203_s29 + $0x118] sm:$0xff] %v5202_v58 }
 0x5f2 PF: > { %s23_s25 = sadd.s32 1, %s6516_s25  }
 0x5f3   : > { %p20_p4 = scmp.ge.s32.totalorder %s23_s25, 4  }
 0x5f5   :  { %22 = sbr.rel (!%p20_p4) target bundleno = 1 (0x1), region = 110 }

</bundles_post_ra>
